<compile_context>
chip_gen: v7x
topology: tpu7x:2x2x1
jax: 0.10.0
libtpu: 0.0.40
codegen_flags: <defaults>
</compile_context>

<pallas_src>
import functools

import jax
import jax.numpy as jnp
from jax import lax
from jax.experimental import pallas as pl
from jax.experimental.pallas import tpu as pltpu


# ---------------------------------------------------------------------------
# Fused Bottleneck kernel
# ---------------------------------------------------------------------------

def _bottleneck_kernel(x_ref, w1_ref, b1_ref, w2_ref, b2_ref, w3_ref, b3_ref,
                       o_ref, col_ref, *, B, H, W, Cin, P, Cout):
    # x_ref  : (B, H, W, Cin)      f32   block of batch images (NHWC)
    # w1_ref : (Cin, P)            bf16  conv1 1x1 weight  (BN1 scale folded in)
    # w2_ref : (9*P, P)            bf16  conv2 3x3 weight, tap-major im2col rows
    # w3_ref : (P, Cout)           bf16  conv3 1x1 weight  (BN3 scale folded in)
    # b*_ref : (1, C)              f32   folded BatchNorm shifts
    # o_ref  : (B, H, W, Cout)     f32
    # col_ref: (B, H, W, 9*P)      bf16  VMEM scratch (im2col patches)
    M = B * H * W
    x2d = x_ref[...].reshape(M, Cin)                      # f32, kept for residual

    # ---- conv1 (1x1) + bn1 shift + relu ----------------------------------
    y1 = jnp.dot(x2d.astype(jnp.bfloat16), w1_ref[...],
                 preferred_element_type=jnp.float32)      # (M, P)
    y1b = jnp.maximum(y1 + b1_ref[...], 0.0).astype(jnp.bfloat16)
    y1r = y1b.reshape(B, H, W, P)

    # ---- conv2 (3x3, pad=1) as one big-K matmul via in-VMEM im2col --------
    # Taps are written bf16 directly; only the halo strips each tap leaves
    # unwritten are zeroed (no full-buffer zero pass, no program_id gating).
    zrow = jnp.zeros((B, 1, W, P), jnp.bfloat16)
    zcol = jnp.zeros((B, H, 1, P), jnp.bfloat16)
    for t in range(9):                                    # static, unrolled
        oy, ox = t // 3 - 1, t % 3 - 1
        ys, ye = max(0, -oy), min(H, H - oy)
        xs, xe = max(0, -ox), min(W, W - ox)
        ts = slice(t * P, (t + 1) * P)
        col_ref[:, ys:ye, xs:xe, ts] = (
            y1r[:, ys + oy:ye + oy, xs + ox:xe + ox, :])
        if oy == -1:
            col_ref[:, 0:1, :, ts] = zrow
        elif oy == 1:
            col_ref[:, H - 1:H, :, ts] = zrow
        if ox == -1:
            col_ref[:, :, 0:1, ts] = zcol
        elif ox == 1:
            col_ref[:, :, W - 1:W, ts] = zcol

    col = col_ref[...].reshape(M, 9 * P)                  # bf16, no extra cast
    y2 = jnp.dot(col, w2_ref[...], preferred_element_type=jnp.float32)
    y2b = jnp.maximum(y2 + b2_ref[...], 0.0).astype(jnp.bfloat16)   # (M, P)

    # ---- conv3 (1x1) + bn3 shift + residual add + relu --------------------
    y3 = jnp.dot(y2b, w3_ref[...], preferred_element_type=jnp.float32)  # (M, Cout)
    y3 = y3 + b3_ref[...] + x2d
    o_ref[...] = jnp.maximum(y3, 0.0).reshape(B, H, W, Cout)


def bottleneck_forward(x_nhwc, params, *, block_batch=1):
    """Bottleneck.forward with stride=1, downsample=None (module defaults).

    Activations are NHWC end-to-end (no layout transposes in the wrapper).
    `block_batch` images are processed per grid step; keep grid length >= 2
    so megacore (v7x) can split the batch across both TensorCores.
    """
    N, H, W, Cin = x_nhwc.shape
    w1, b1 = params["conv1"]
    w2, b2 = params["conv2"]
    w3, b3 = params["conv3"]
    P = w1.shape[1]
    Cout = w3.shape[1]
    assert Cout == Cin, "residual add requires inplanes == planes*4 when downsample is None"
    assert N % block_batch == 0, "batch must be divisible by block_batch"
    B = block_batch

    kern = functools.partial(_bottleneck_kernel,
                             B=B, H=H, W=W, Cin=Cin, P=P, Cout=Cout)
    out = pl.pallas_call(
        kern,
        out_shape=jax.ShapeDtypeStruct((N, H, W, Cout), jnp.float32),
        grid=(N // B,),
        in_specs=[
            pl.BlockSpec((B, H, W, Cin), lambda n: (n, 0, 0, 0)),   # x
            pl.BlockSpec((Cin, P), lambda n: (0, 0)),               # w1 (scaled)
            pl.BlockSpec((1, P), lambda n: (0, 0)),                 # bn1 shift
            pl.BlockSpec((9 * P, P), lambda n: (0, 0)),             # w2 (im2col, scaled)
            pl.BlockSpec((1, P), lambda n: (0, 0)),                 # bn2 shift
            pl.BlockSpec((P, Cout), lambda n: (0, 0)),              # w3 (scaled)
            pl.BlockSpec((1, Cout), lambda n: (0, 0)),              # bn3 shift
        ],
        out_specs=pl.BlockSpec((B, H, W, Cout), lambda n: (n, 0, 0, 0)),
        scratch_shapes=[pltpu.VMEM((B, H, W, 9 * P), jnp.bfloat16)],
        compiler_params=pltpu.CompilerParams(
            dimension_semantics=("parallel",)),            # megacore on v7x
    )(x_nhwc, w1, b1, w2, b2, w3, b3)
    return out


# ---------------------------------------------------------------------------
# Pure-JAX reference (same folded bf16 weights) for the correctness check
# ---------------------------------------------------------------------------

def bottleneck_reference(x_nhwc, params):
    w1, b1 = params["conv1"]
    w2, b2 = params["conv2"]
    w3, b3 = params["conv3"]
    P = w1.shape[1]
    x = x_nhwc.astype(jnp.float32)
    y = jnp.einsum("nhwc,cp->nhwp", x, w1.astype(jnp.float32))
    y = jnp.maximum(y + b1[0], 0.0)
    w2_hwio = w2.astype(jnp.float32).reshape(3, 3, P, P)
    y = lax.conv_general_dilated(
        y, w2_hwio, window_strides=(1, 1), padding="SAME",
        dimension_numbers=("NHWC", "HWIO", "NHWC"))
    y = jnp.maximum(y + b2[0], 0.0)
    y = jnp.einsum("nhwp,pc->nhwc", y, w3.astype(jnp.float32))
    y = jnp.maximum(y + b3[0] + x, 0.0)
    return y


# ---------------------------------------------------------------------------
# Deterministic parameter construction (BN scale folded into bf16 weights)
# ---------------------------------------------------------------------------

def _fold_bn(channels, salt, eps=1e-5):
    # BatchNorm2d inference-mode parameters folded into scale/shift
    # (conv layers in Bottleneck have bias=False).
    c = jnp.arange(channels, dtype=jnp.float32)
    gamma = 1.0 + 0.1 * jnp.cos(c + salt)
    beta = 0.05 * jnp.sin(c + salt)
    running_mean = 0.01 * (c - 0.5 * channels) / channels
    running_var = 1.0 + 0.1 * jnp.sin(c + salt) ** 2
    scale = gamma / jnp.sqrt(running_var + eps)
    shift = beta - running_mean * scale
    return scale.reshape(1, channels), shift.reshape(1, channels)


def init_bottleneck_params(key, inplanes, planes):
    expansion = 4
    cout = planes * expansion
    k1, k2, k3 = jax.random.split(key, 3)
    # f32 master weights
    w1f = jax.random.normal(k1, (inplanes, planes), jnp.float32) / (inplanes ** 0.5)
    w2f = jax.random.normal(k2, (9 * planes, planes), jnp.float32) / ((9 * planes) ** 0.5)
    w3f = jax.random.normal(k3, (planes, cout), jnp.float32) / (planes ** 0.5)
    s1, b1 = _fold_bn(planes, salt=0.3)
    s2, b2 = _fold_bn(planes, salt=1.7)
    s3, b3 = _fold_bn(cout, salt=2.9)
    # Fold the BN scale into the weight's output-channel columns; only the
    # shift is applied in the kernel epilogue.
    w1 = (w1f * s1).astype(jnp.bfloat16)          # (Cin, P)
    w2 = (w2f * s2).astype(jnp.bfloat16)          # (9*P, P) tap-major im2col
    w3 = (w3f * s3).astype(jnp.bfloat16)          # (P, Cout)
    return {"conv1": (w1, b1),
            "conv2": (w2, b2),
            "conv3": (w3, b3)}


# ---------------------------------------------------------------------------

if __name__ == "__main__":
    key = jax.random.PRNGKey(0)
    kx, kp = jax.random.split(key)

    # Bottleneck(inplanes=128, planes=32, stride=1, downsample=None)
    # Activations kept NHWC end-to-end.
    N, H, W, C = 2, 16, 16, 128
    x = jax.random.normal(kx, (N, H, W, C), jnp.float32)
    params = init_bottleneck_params(kp, inplanes=C, planes=C // 4)

    # block_batch=1 keeps grid length = 2 -> both v7x TensorCores stay busy.
    out = jax.block_until_ready(bottleneck_forward(x, params, block_batch=1))

    assert out.shape == (N, H, W, C), out.shape
    assert bool(jnp.all(jnp.isfinite(out)))

    ref = bottleneck_reference(x, params)
    rel_err = float(jnp.max(jnp.abs(out - ref)) / (jnp.max(jnp.abs(ref)) + 1e-6))
    assert rel_err < 2e-2, f"mismatch vs reference: rel_err={rel_err}"

    print("KERNEL_OK")
</pallas_src>

<mosaic_0001>
module attributes {stable_mosaic.version = 11 : i64} {
  func.func @_bottleneck_kernel(%arg0: i32, %arg1: memref<1x16x16x128xf32, #tpu.memory_space<vmem>>, %arg2: memref<128x32xbf16, #tpu.memory_space<vmem>>, %arg3: memref<1x32xf32, #tpu.memory_space<vmem>>, %arg4: memref<288x32xbf16, #tpu.memory_space<vmem>>, %arg5: memref<1x32xf32, #tpu.memory_space<vmem>>, %arg6: memref<32x128xbf16, #tpu.memory_space<vmem>>, %arg7: memref<1x128xf32, #tpu.memory_space<vmem>>, %arg8: memref<1x16x16x128xf32, #tpu.memory_space<vmem>>, %arg9: memref<1x16x16x288xbf16, #tpu.memory_space<vmem>>) attributes {dimension_semantics = [#tpu.dimension_semantics<parallel>], iteration_bounds = array<i64: 2>, scalar_prefetch = 0 : i64, scratch_operands = 1 : i64, tpu.core_type = #tpu.core_type<tc>, window_params = [{transform_indices = @transform_0, window_bounds = array<i64: 1, 16, 16, 128>}, {pipeline_mode = #tpu.pipeline_mode<synchronous>, transform_indices = @transform_1, window_bounds = array<i64: 128, 32>}, {pipeline_mode = #tpu.pipeline_mode<synchronous>, transform_indices = @transform_2, window_bounds = array<i64: 1, 32>}, {pipeline_mode = #tpu.pipeline_mode<synchronous>, transform_indices = @transform_3, window_bounds = array<i64: 288, 32>}, {pipeline_mode = #tpu.pipeline_mode<synchronous>, transform_indices = @transform_4, window_bounds = array<i64: 1, 32>}, {pipeline_mode = #tpu.pipeline_mode<synchronous>, transform_indices = @transform_5, window_bounds = array<i64: 32, 128>}, {pipeline_mode = #tpu.pipeline_mode<synchronous>, transform_indices = @transform_6, window_bounds = array<i64: 1, 128>}, {transform_indices = @transform_7, window_bounds = array<i64: 1, 16, 16, 128>}]} {
    %c0 = arith.constant 0 : index
    %c0_0 = arith.constant 0 : index
    %c0_1 = arith.constant 0 : index
    %c0_2 = arith.constant 0 : index
    %0 = vector.load %arg1[%c0, %c0_0, %c0_1, %c0_2] : memref<1x16x16x128xf32, #tpu.memory_space<vmem>>, vector<1x16x16x128xf32>
    %1 = vector.shape_cast %0 : vector<1x16x16x128xf32> to vector<256x128xf32>
    %2 = arith.truncf %1 : vector<256x128xf32> to vector<256x128xbf16>
    %c0_3 = arith.constant 0 : index
    %c0_4 = arith.constant 0 : index
    %3 = vector.load %arg2[%c0_3, %c0_4] : memref<128x32xbf16, #tpu.memory_space<vmem>>, vector<128x32xbf16>
    %cst = arith.constant dense<0.000000e+00> : vector<256x32xf32>
    %4 = tpu.matmul %2, %3, %cst {dimension_numbers = #tpu.dot_dimension_numbers<[1], [0], [0], [1], [0, 0, 1, 1], [], []>} : vector<256x128xbf16>, vector<128x32xbf16>, vector<256x32xf32> -> vector<256x32xf32>
    %c0_5 = arith.constant 0 : index
    %c0_6 = arith.constant 0 : index
    %5 = vector.load %arg3[%c0_5, %c0_6] : memref<1x32xf32, #tpu.memory_space<vmem>>, vector<1x32xf32>
    %6 = vector.broadcast %5 : vector<1x32xf32> to vector<256x32xf32>
    %7 = arith.addf %4, %6 : vector<256x32xf32>
    %cst_7 = arith.constant 0.000000e+00 : f32
    %8 = vector.broadcast %cst_7 : f32 to vector<256x32xf32>
    %9 = arith.maximumf %7, %8 : vector<256x32xf32>
    %10 = arith.truncf %9 : vector<256x32xf32> to vector<256x32xbf16>
    %11 = vector.shape_cast %10 : vector<256x32xbf16> to vector<1x16x16x32xbf16>
    %cst_8 = arith.constant 0.000000e+00 : bf16
    %12 = vector.broadcast %cst_8 : bf16 to vector<1x1x16x32xbf16>
    %cst_9 = arith.constant 0.000000e+00 : bf16
    %13 = vector.broadcast %cst_9 : bf16 to vector<1x16x1x32xbf16>
    %14 = vector.extract_strided_slice %11 {offsets = [0, 0, 0, 0], sizes = [1, 15, 15, 32], strides = [1, 1, 1, 1]} : vector<1x16x16x32xbf16> to vector<1x15x15x32xbf16>
    %c0_10 = arith.constant 0 : index
    %c1 = arith.constant 1 : index
    %c1_11 = arith.constant 1 : index
    %c0_12 = arith.constant 0 : index
    %15 = vector.load %arg9[%c0_10, %c1, %c1_11, %c0_12] : memref<1x16x16x288xbf16, #tpu.memory_space<vmem>>, vector<1x15x15x32xbf16>
    tpu.vector_store %arg9[%c0_10, %c1, %c1_11, %c0_12], %14 {strides = array<i32>} : memref<1x16x16x288xbf16, #tpu.memory_space<vmem>>, vector<1x15x15x32xbf16>,
    %c0_13 = arith.constant 0 : index
    %c0_14 = arith.constant 0 : index
    %c0_15 = arith.constant 0 : index
    %c0_16 = arith.constant 0 : index
    %16 = vector.load %arg9[%c0_13, %c0_14, %c0_15, %c0_16] : memref<1x16x16x288xbf16, #tpu.memory_space<vmem>>, vector<1x1x16x32xbf16>
    tpu.vector_store %arg9[%c0_13, %c0_14, %c0_15, %c0_16], %12 {strides = array<i32>} : memref<1x16x16x288xbf16, #tpu.memory_space<vmem>>, vector<1x1x16x32xbf16>,
    %c0_17 = arith.constant 0 : index
    %c0_18 = arith.constant 0 : index
    %c0_19 = arith.constant 0 : index
    %c0_20 = arith.constant 0 : index
    %17 = vector.load %arg9[%c0_17, %c0_18, %c0_19, %c0_20] : memref<1x16x16x288xbf16, #tpu.memory_space<vmem>>, vector<1x16x1x32xbf16>
    tpu.vector_store %arg9[%c0_17, %c0_18, %c0_19, %c0_20], %13 {strides = array<i32>} : memref<1x16x16x288xbf16, #tpu.memory_space<vmem>>, vector<1x16x1x32xbf16>,
    %18 = vector.extract_strided_slice %11 {offsets = [0, 0, 0, 0], sizes = [1, 15, 16, 32], strides = [1, 1, 1, 1]} : vector<1x16x16x32xbf16> to vector<1x15x16x32xbf16>
    %c0_21 = arith.constant 0 : index
    %c1_22 = arith.constant 1 : index
    %c0_23 = arith.constant 0 : index
    %c32 = arith.constant 32 : index
    %19 = vector.load %arg9[%c0_21, %c1_22, %c0_23, %c32] : memref<1x16x16x288xbf16, #tpu.memory_space<vmem>>, vector<1x15x16x32xbf16>
    tpu.vector_store %arg9[%c0_21, %c1_22, %c0_23, %c32], %18 {strides = array<i32>} : memref<1x16x16x288xbf16, #tpu.memory_space<vmem>>, vector<1x15x16x32xbf16>,
    %c0_24 = arith.constant 0 : index
    %c0_25 = arith.constant 0 : index
    %c0_26 = arith.constant 0 : index
    %c32_27 = arith.constant 32 : index
    %20 = vector.load %arg9[%c0_24, %c0_25, %c0_26, %c32_27] : memref<1x16x16x288xbf16, #tpu.memory_space<vmem>>, vector<1x1x16x32xbf16>
    tpu.vector_store %arg9[%c0_24, %c0_25, %c0_26, %c32_27], %12 {strides = array<i32>} : memref<1x16x16x288xbf16, #tpu.memory_space<vmem>>, vector<1x1x16x32xbf16>,
    %21 = vector.extract_strided_slice %11 {offsets = [0, 0, 1, 0], sizes = [1, 15, 15, 32], strides = [1, 1, 1, 1]} : vector<1x16x16x32xbf16> to vector<1x15x15x32xbf16>
    %c0_28 = arith.constant 0 : index
    %c1_29 = arith.constant 1 : index
    %c0_30 = arith.constant 0 : index
    %c64 = arith.constant 64 : index
    %22 = vector.load %arg9[%c0_28, %c1_29, %c0_30, %c64] : memref<1x16x16x288xbf16, #tpu.memory_space<vmem>>, vector<1x15x15x32xbf16>
    tpu.vector_store %arg9[%c0_28, %c1_29, %c0_30, %c64], %21 {strides = array<i32>} : memref<1x16x16x288xbf16, #tpu.memory_space<vmem>>, vector<1x15x15x32xbf16>,
    %c0_31 = arith.constant 0 : index
    %c0_32 = arith.constant 0 : index
    %c0_33 = arith.constant 0 : index
    %c64_34 = arith.constant 64 : index
    %23 = vector.load %arg9[%c0_31, %c0_32, %c0_33, %c64_34] : memref<1x16x16x288xbf16, #tpu.memory_space<vmem>>, vector<1x1x16x32xbf16>
    tpu.vector_store %arg9[%c0_31, %c0_32, %c0_33, %c64_34], %12 {strides = array<i32>} : memref<1x16x16x288xbf16, #tpu.memory_space<vmem>>, vector<1x1x16x32xbf16>,
    %c0_35 = arith.constant 0 : index
    %c0_36 = arith.constant 0 : index
    %c15 = arith.constant 15 : index
    %c64_37 = arith.constant 64 : index
    %24 = vector.load %arg9[%c0_35, %c0_36, %c15, %c64_37] : memref<1x16x16x288xbf16, #tpu.memory_space<vmem>>, vector<1x16x1x32xbf16>
    tpu.vector_store %arg9[%c0_35, %c0_36, %c15, %c64_37], %13 {strides = array<i32>} : memref<1x16x16x288xbf16, #tpu.memory_space<vmem>>, vector<1x16x1x32xbf16>,
    %25 = vector.extract_strided_slice %11 {offsets = [0, 0, 0, 0], sizes = [1, 16, 15, 32], strides = [1, 1, 1, 1]} : vector<1x16x16x32xbf16> to vector<1x16x15x32xbf16>
    %c0_38 = arith.constant 0 : index
    %c0_39 = arith.constant 0 : index
    %c1_40 = arith.constant 1 : index
    %c96 = arith.constant 96 : index
    %26 = vector.load %arg9[%c0_38, %c0_39, %c1_40, %c96] : memref<1x16x16x288xbf16, #tpu.memory_space<vmem>>, vector<1x16x15x32xbf16>
    tpu.vector_store %arg9[%c0_38, %c0_39, %c1_40, %c96], %25 {strides = array<i32>} : memref<1x16x16x288xbf16, #tpu.memory_space<vmem>>, vector<1x16x15x32xbf16>,
    %c0_41 = arith.constant 0 : index
    %c0_42 = arith.constant 0 : index
    %c0_43 = arith.constant 0 : index
    %c96_44 = arith.constant 96 : index
    %27 = vector.load %arg9[%c0_41, %c0_42, %c0_43, %c96_44] : memref<1x16x16x288xbf16, #tpu.memory_space<vmem>>, vector<1x16x1x32xbf16>
    tpu.vector_store %arg9[%c0_41, %c0_42, %c0_43, %c96_44], %13 {strides = array<i32>} : memref<1x16x16x288xbf16, #tpu.memory_space<vmem>>, vector<1x16x1x32xbf16>,
    %c0_45 = arith.constant 0 : index
    %c0_46 = arith.constant 0 : index
    %c0_47 = arith.constant 0 : index
    %c128 = arith.constant 128 : index
    %28 = vector.load %arg9[%c0_45, %c0_46, %c0_47, %c128] : memref<1x16x16x288xbf16, #tpu.memory_space<vmem>>, vector<1x16x16x32xbf16>
    tpu.vector_store %arg9[%c0_45, %c0_46, %c0_47, %c128], %11 {strides = array<i32>} : memref<1x16x16x288xbf16, #tpu.memory_space<vmem>>, vector<1x16x16x32xbf16>,
    %29 = vector.extract_strided_slice %11 {offsets = [0, 0, 1, 0], sizes = [1, 16, 15, 32], strides = [1, 1, 1, 1]} : vector<1x16x16x32xbf16> to vector<1x16x15x32xbf16>
    %c0_48 = arith.constant 0 : index
    %c0_49 = arith.constant 0 : index
    %c0_50 = arith.constant 0 : index
    %c160 = arith.constant 160 : index
    %30 = vector.load %arg9[%c0_48, %c0_49, %c0_50, %c160] : memref<1x16x16x288xbf16, #tpu.memory_space<vmem>>, vector<1x16x15x32xbf16>
    tpu.vector_store %arg9[%c0_48, %c0_49, %c0_50, %c160], %29 {strides = array<i32>} : memref<1x16x16x288xbf16, #tpu.memory_space<vmem>>, vector<1x16x15x32xbf16>,
    %c0_51 = arith.constant 0 : index
    %c0_52 = arith.constant 0 : index
    %c15_53 = arith.constant 15 : index
    %c160_54 = arith.constant 160 : index
    %31 = vector.load %arg9[%c0_51, %c0_52, %c15_53, %c160_54] : memref<1x16x16x288xbf16, #tpu.memory_space<vmem>>, vector<1x16x1x32xbf16>
    tpu.vector_store %arg9[%c0_51, %c0_52, %c15_53, %c160_54], %13 {strides = array<i32>} : memref<1x16x16x288xbf16, #tpu.memory_space<vmem>>, vector<1x16x1x32xbf16>,
    %32 = vector.extract_strided_slice %11 {offsets = [0, 1, 0, 0], sizes = [1, 15, 15, 32], strides = [1, 1, 1, 1]} : vector<1x16x16x32xbf16> to vector<1x15x15x32xbf16>
    %c0_55 = arith.constant 0 : index
    %c0_56 = arith.constant 0 : index
    %c1_57 = arith.constant 1 : index
    %c192 = arith.constant 192 : index
    %33 = vector.load %arg9[%c0_55, %c0_56, %c1_57, %c192] : memref<1x16x16x288xbf16, #tpu.memory_space<vmem>>, vector<1x15x15x32xbf16>
    tpu.vector_store %arg9[%c0_55, %c0_56, %c1_57, %c192], %32 {strides = array<i32>} : memref<1x16x16x288xbf16, #tpu.memory_space<vmem>>, vector<1x15x15x32xbf16>,
    %c0_58 = arith.constant 0 : index
    %c15_59 = arith.constant 15 : index
    %c0_60 = arith.constant 0 : index
    %c192_61 = arith.constant 192 : index
    %34 = vector.load %arg9[%c0_58, %c15_59, %c0_60, %c192_61] : memref<1x16x16x288xbf16, #tpu.memory_space<vmem>>, vector<1x1x16x32xbf16>
    tpu.vector_store %arg9[%c0_58, %c15_59, %c0_60, %c192_61], %12 {strides = array<i32>} : memref<1x16x16x288xbf16, #tpu.memory_space<vmem>>, vector<1x1x16x32xbf16>,
    %c0_62 = arith.constant 0 : index
    %c0_63 = arith.constant 0 : index
    %c0_64 = arith.constant 0 : index
    %c192_65 = arith.constant 192 : index
    %35 = vector.load %arg9[%c0_62, %c0_63, %c0_64, %c192_65] : memref<1x16x16x288xbf16, #tpu.memory_space<vmem>>, vector<1x16x1x32xbf16>
    tpu.vector_store %arg9[%c0_62, %c0_63, %c0_64, %c192_65], %13 {strides = array<i32>} : memref<1x16x16x288xbf16, #tpu.memory_space<vmem>>, vector<1x16x1x32xbf16>,
    %36 = vector.extract_strided_slice %11 {offsets = [0, 1, 0, 0], sizes = [1, 15, 16, 32], strides = [1, 1, 1, 1]} : vector<1x16x16x32xbf16> to vector<1x15x16x32xbf16>
    %c0_66 = arith.constant 0 : index
    %c0_67 = arith.constant 0 : index
    %c0_68 = arith.constant 0 : index
    %c224 = arith.constant 224 : index
    %37 = vector.load %arg9[%c0_66, %c0_67, %c0_68, %c224] : memref<1x16x16x288xbf16, #tpu.memory_space<vmem>>, vector<1x15x16x32xbf16>
    tpu.vector_store %arg9[%c0_66, %c0_67, %c0_68, %c224], %36 {strides = array<i32>} : memref<1x16x16x288xbf16, #tpu.memory_space<vmem>>, vector<1x15x16x32xbf16>,
    %c0_69 = arith.constant 0 : index
    %c15_70 = arith.constant 15 : index
    %c0_71 = arith.constant 0 : index
    %c224_72 = arith.constant 224 : index
    %38 = vector.load %arg9[%c0_69, %c15_70, %c0_71, %c224_72] : memref<1x16x16x288xbf16, #tpu.memory_space<vmem>>, vector<1x1x16x32xbf16>
    tpu.vector_store %arg9[%c0_69, %c15_70, %c0_71, %c224_72], %12 {strides = array<i32>} : memref<1x16x16x288xbf16, #tpu.memory_space<vmem>>, vector<1x1x16x32xbf16>,
    %39 = vector.extract_strided_slice %11 {offsets = [0, 1, 1, 0], sizes = [1, 15, 15, 32], strides = [1, 1, 1, 1]} : vector<1x16x16x32xbf16> to vector<1x15x15x32xbf16>
    %c0_73 = arith.constant 0 : index
    %c0_74 = arith.constant 0 : index
    %c0_75 = arith.constant 0 : index
    %c256 = arith.constant 256 : index
    %40 = vector.load %arg9[%c0_73, %c0_74, %c0_75, %c256] : memref<1x16x16x288xbf16, #tpu.memory_space<vmem>>, vector<1x15x15x32xbf16>
    tpu.vector_store %arg9[%c0_73, %c0_74, %c0_75, %c256], %39 {strides = array<i32>} : memref<1x16x16x288xbf16, #tpu.memory_space<vmem>>, vector<1x15x15x32xbf16>,
    %c0_76 = arith.constant 0 : index
    %c15_77 = arith.constant 15 : index
    %c0_78 = arith.constant 0 : index
    %c256_79 = arith.constant 256 : index
    %41 = vector.load %arg9[%c0_76, %c15_77, %c0_78, %c256_79] : memref<1x16x16x288xbf16, #tpu.memory_space<vmem>>, vector<1x1x16x32xbf16>
    tpu.vector_store %arg9[%c0_76, %c15_77, %c0_78, %c256_79], %12 {strides = array<i32>} : memref<1x16x16x288xbf16, #tpu.memory_space<vmem>>, vector<1x1x16x32xbf16>,
    %c0_80 = arith.constant 0 : index
    %c0_81 = arith.constant 0 : index
    %c15_82 = arith.constant 15 : index
    %c256_83 = arith.constant 256 : index
    %42 = vector.load %arg9[%c0_80, %c0_81, %c15_82, %c256_83] : memref<1x16x16x288xbf16, #tpu.memory_space<vmem>>, vector<1x16x1x32xbf16>
    tpu.vector_store %arg9[%c0_80, %c0_81, %c15_82, %c256_83], %13 {strides = array<i32>} : memref<1x16x16x288xbf16, #tpu.memory_space<vmem>>, vector<1x16x1x32xbf16>,
    %c0_84 = arith.constant 0 : index
    %c0_85 = arith.constant 0 : index
    %c0_86 = arith.constant 0 : index
    %c0_87 = arith.constant 0 : index
    %43 = vector.load %arg9[%c0_84, %c0_85, %c0_86, %c0_87] : memref<1x16x16x288xbf16, #tpu.memory_space<vmem>>, vector<1x16x16x288xbf16>
    %44 = vector.shape_cast %43 : vector<1x16x16x288xbf16> to vector<256x288xbf16>
    %c0_88 = arith.constant 0 : index
    %c0_89 = arith.constant 0 : index
    %45 = vector.load %arg4[%c0_88, %c0_89] : memref<288x32xbf16, #tpu.memory_space<vmem>>, vector<288x32xbf16>
    %cst_90 = arith.constant dense<0.000000e+00> : vector<256x32xf32>
    %46 = tpu.matmul %44, %45, %cst_90 {dimension_numbers = #tpu.dot_dimension_numbers<[1], [0], [0], [1], [0, 0, 1, 1], [], []>} : vector<256x288xbf16>, vector<288x32xbf16>, vector<256x32xf32> -> vector<256x32xf32>
    %c0_91 = arith.constant 0 : index
    %c0_92 = arith.constant 0 : index
    %47 = vector.load %arg5[%c0_91, %c0_92] : memref<1x32xf32, #tpu.memory_space<vmem>>, vector<1x32xf32>
    %48 = vector.broadcast %47 : vector<1x32xf32> to vector<256x32xf32>
    %49 = arith.addf %46, %48 : vector<256x32xf32>
    %cst_93 = arith.constant 0.000000e+00 : f32
    %50 = vector.broadcast %cst_93 : f32 to vector<256x32xf32>
    %51 = arith.maximumf %49, %50 : vector<256x32xf32>
    %52 = arith.truncf %51 : vector<256x32xf32> to vector<256x32xbf16>
    %c0_94 = arith.constant 0 : index
    %c0_95 = arith.constant 0 : index
    %53 = vector.load %arg6[%c0_94, %c0_95] : memref<32x128xbf16, #tpu.memory_space<vmem>>, vector<32x128xbf16>
    %cst_96 = arith.constant dense<0.000000e+00> : vector<256x128xf32>
    %54 = tpu.matmul %52, %53, %cst_96 {dimension_numbers = #tpu.dot_dimension_numbers<[1], [0], [0], [1], [0, 0, 1, 1], [], []>} : vector<256x32xbf16>, vector<32x128xbf16>, vector<256x128xf32> -> vector<256x128xf32>
    %c0_97 = arith.constant 0 : index
    %c0_98 = arith.constant 0 : index
    %55 = vector.load %arg7[%c0_97, %c0_98] : memref<1x128xf32, #tpu.memory_space<vmem>>, vector<1x128xf32>
    %56 = vector.broadcast %55 : vector<1x128xf32> to vector<256x128xf32>
    %57 = arith.addf %54, %56 : vector<256x128xf32>
    %58 = arith.addf %57, %1 : vector<256x128xf32>
    %cst_99 = arith.constant 0.000000e+00 : f32
    %59 = vector.broadcast %cst_99 : f32 to vector<256x128xf32>
    %60 = arith.maximumf %58, %59 : vector<256x128xf32>
    %61 = vector.shape_cast %60 : vector<256x128xf32> to vector<1x16x16x128xf32>
    %c0_100 = arith.constant 0 : index
    %c0_101 = arith.constant 0 : index
    %c0_102 = arith.constant 0 : index
    %c0_103 = arith.constant 0 : index
    %62 = vector.load %arg8[%c0_100, %c0_101, %c0_102, %c0_103] : memref<1x16x16x128xf32, #tpu.memory_space<vmem>>, vector<1x16x16x128xf32>
    tpu.vector_store %arg8[%c0_100, %c0_101, %c0_102, %c0_103], %61 {strides = array<i32>} : memref<1x16x16x128xf32, #tpu.memory_space<vmem>>, vector<1x16x16x128xf32>,
    return
  }
  func.func @transform_0(%arg0: i32) -> (i32, i32, i32, i32) {
    %c0_i32 = arith.constant 0 : i32
    %c0_i32_0 = arith.constant 0 : i32
    %c0_i32_1 = arith.constant 0 : i32
    %c0_i32_2 = arith.constant 0 : i32
    return %arg0, %c0_i32, %c0_i32_0, %c0_i32_1 : i32, i32, i32, i32
  }
  func.func @transform_1(%arg0: i32) -> (i32, i32) {
    %c0_i32 = arith.constant 0 : i32
    %c0_i32_0 = arith.constant 0 : i32
    %c0_i32_1 = arith.constant 0 : i32
    return %c0_i32, %c0_i32_0 : i32, i32
  }
  func.func @transform_2(%arg0: i32) -> (i32, i32) {
    %c0_i32 = arith.constant 0 : i32
    %c0_i32_0 = arith.constant 0 : i32
    %c0_i32_1 = arith.constant 0 : i32
    return %c0_i32, %c0_i32_0 : i32, i32
  }
  func.func @transform_3(%arg0: i32) -> (i32, i32) {
    %c0_i32 = arith.constant 0 : i32
    %c0_i32_0 = arith.constant 0 : i32
    %c0_i32_1 = arith.constant 0 : i32
    return %c0_i32, %c0_i32_0 : i32, i32
  }
  func.func @transform_4(%arg0: i32) -> (i32, i32) {
    %c0_i32 = arith.constant 0 : i32
    %c0_i32_0 = arith.constant 0 : i32
    %c0_i32_1 = arith.constant 0 : i32
    return %c0_i32, %c0_i32_0 : i32, i32
  }
  func.func @transform_5(%arg0: i32) -> (i32, i32) {
    %c0_i32 = arith.constant 0 : i32
    %c0_i32_0 = arith.constant 0 : i32
    %c0_i32_1 = arith.constant 0 : i32
    return %c0_i32, %c0_i32_0 : i32, i32
  }
  func.func @transform_6(%arg0: i32) -> (i32, i32) {
    %c0_i32 = arith.constant 0 : i32
    %c0_i32_0 = arith.constant 0 : i32
    %c0_i32_1 = arith.constant 0 : i32
    return %c0_i32, %c0_i32_0 : i32, i32
  }
  func.func @transform_7(%arg0: i32) -> (i32, i32, i32, i32) {
    %c0_i32 = arith.constant 0 : i32
    %c0_i32_0 = arith.constant 0 : i32
    %c0_i32_1 = arith.constant 0 : i32
    %c0_i32_2 = arith.constant 0 : i32
    return %arg0, %c0_i32, %c0_i32_0, %c0_i32_1 : i32, i32, i32, i32
  }
}

</mosaic_0001>

<bundles_post_ra>
// kernel: tpu_custom_call.1
= control target key start
LH: loop header
LB: loop body
LE: loop exit
PB: predicated region body
PF: predicated region fallthrough
CT: control target
= control target key end

     0   :  { %12 = vsyncpa [#allocation4], 0  ;;  %s4996_s0 = inlined_call_operand.hbm [shape: f32[2,16,16,128], index: 0, kind: input, shape index: {}]   ;;  %s4997_s1 = inlined_call_operand.vmem [shape: bf16[128,32], index: 1, kind: input, shape index: {}]   ;;  %s4998_s2 = inlined_call_operand.vmem [shape: f32[1,32], index: 2, kind: input, shape index: {}]   ;;  %s4999_s3 = inlined_call_operand.vmem [shape: bf16[288,32], index: 3, kind: input, shape index: {}]   ;;  %s5000_s4 = inlined_call_operand.vmem [shape: f32[1,32], index: 4, kind: input, shape index: {}]   ;;  %s5001_s5 = inlined_call_operand.vmem [shape: bf16[32,128], index: 5, kind: input, shape index: {}]   ;;  %s5002_s6 = inlined_call_operand.vmem [shape: f32[1,128], index: 6, kind: input, shape index: {}]   ;;  %s5003_s7 = inlined_call_operand.hbm [shape: f32[2,16,16,128], index: 7, kind: output, shape index: {}]  }
   0x1   :  { %14 = vsyncpa [#allocation4 + $0x1], 0 }
   0x2   :  { %15 = vsyncpa [#allocation5], 0 }
   0x3   :  { %17 = vsyncpa [#allocation5 + $0x1], 0  ;;  %s3421_s24 = smov 0   ;;  %s3423_s25 = smov 0  }
   0x4   :  { %s3425_s26 = smov 0   ;;  %s3427_s27 = smov 0  }
   0x5 LB: > { %s3442_s28 = sadd.s32 4294967295, %s3369_s27   ;;  %s2772_s29 = sadd.s32 4294967294, %s3369_s27   ;;  %s3369_s27 = sphi %s3427_s27, %s5040_s27   ;;  %s3365_s26 = sphi %s3425_s26, %s5039_s26   ;;  %s3361_s25 = sphi %s3423_s25, %s5038_s25   ;;  %s3357_s24 = sphi %s3421_s24, %s5037_s24  }
   0x6   : > { %s3446_s30 = sadd.s32 1, %s3369_s27   ;;  %s30_s8 = sadd.s32 1, %s3365_s26 }
   0x7   : > { %s27_s9 = ssub.s32 %s3369_s27, %s3446_s30  ;;  %p37_p0 = scmp.ne.s32.totalorder %s3365_s26, %s3361_s25 }
   0x8   : > { %p28_p1 = scmp.eq.s32.totalorder %s27_s9, 0  ;;  %p38_p2 = scmp.eq.s32.totalorder %s3369_s27, 0 }
   0x9   : > { %p43_p3 = scmp.ne.s32.totalorder %s3361_s25, %s3357_s24  ;;  %p44_p4 = scmp.eq.s32.totalorder %s3442_s28, 0 }
   0xa   : > { %s3458_s10 = scalar_select %p28_p1, %s3365_s26, %s30_s8  }
   0xb   : > { %p3460_p5 = por %p38_p2, %p37_p0  ;;  %p3464_p6 = por %p44_p4, %p43_p3 }
   0xc   : > { %p193_p7 = scmp.eq.s32.totalorder %s3442_s28, 1  ;;  %p199_p8 = scmp.eq.s32.totalorder %s2772_s29, 1 }
   0xd   : > { %p3171_p10 = scmp.lt.s32.totalorder %s3369_s27, 2  ;;  %s237_s15 = sand.u32 1, %s3365_s26  }
   0xe   : > { %p3471_p11 = por %p193_p7, %p37_p0  ;;  %p3475_p12 = por %p199_p8, %p43_p3 }
   0xf   : > { %s2849_s16 = sshll.u32 %s3369_s27, 12  ;;  %s2775_s17 = sshll.u32 %s237_s15, 8 }
  0x10   : > { %s5007_s13 = scalar_select %p3471_p11, 1, 0 }
  0x11   : > { %s5008_s14 = scalar_select %p3475_p12, 1, 0 }
  0x12   : > { %s3484_s20 = scalar_lea.hbm %s4996_s0, %s2849_s16  ;;  %s241_s21 = scalar_lea.vmem [#allocation3], %s2775_s17 }
  0x13   : > { %s248_s22 = sshll.u32 %s241_s21, 4  ;;  %p3488_p13 = pnand %p3171_p10, %p3460_p5  ;;  %s3492_s22 = int_to_ptr.vmem [resolvable:$true] %s248_s22 }
  0x14   : > { %s3494_s29 = scalar_lea.sflag [#allocation4], %s237_s15  ;;  %s3273_s8 = scalar_lea.hbm %s3484_s20, 4096 }
  0x15   : > { %p3274_p0 = scmp.ne.s32.totalorder %s3484_s20, %s3273_s8  ;;  %p3275_p1 = pneg %p3488_p13 }
  0x16   : > { %s3278_s16 = scalar_lea.hbm %s4996_s0, 8192  ;;  %p3279_p4 = scmp.lt.u32.totalorder %s3484_s20, %s4996_s0 }
  0x17   : > { %p3276_p2 = pnand %p3275_p1, %p3274_p0  ;;  %p3280_p5 = scmp.lt.u32.totalorder %s3278_s16, %s3273_s8 }
  0x18   : > { %p3282_p8 = scmp.lt.u32.totalorder %s3273_s8, %s3484_s20 }
  0x19   : > { %p3277_p3 = pneg %p3276_p2  ;;  %p3281_p7 = por %p3280_p5, %p3279_p4 }
  0x1b   : > { %p3283_p10 = por %p3282_p8, %p3281_p7 }
  0x1d   : > { %p3284_p9 = pnand %p3283_p10, %p3277_p3 }
  0x1f   : > { %3287 = shalt.err (!%p3284_p9)
}
  0x20   : > { %s3288_s15 = scalar_lea.vmem %s3492_s22, 4096  ;;  %s3371_s19 = smov [#allocation3]  }
  0x21   : > { %p3289_p0 = scmp.ne.s32.totalorder %s3492_s22, %s3288_s15  ;;  %s3293_s21 = sshll.u32 %s3371_s19, 4  ;;  %s3294_s21 = int_to_ptr.vmem [resolvable:$false] %s3293_s21 }
  0x22   : > { %s3295_s9 = scalar_lea.vmem %s3294_s21, 8192  ;;  %p3296_p11 = scmp.lt.s32.totalorder %s3492_s22, %s3294_s21 }
  0x23   : > { %p3291_p2 = pnand %p3289_p0, %p3275_p1  ;;  %p3297_p4 = scmp.lt.s32.totalorder %s3295_s9, %s3288_s15 }
  0x25   : > { %p3292_p12 = pneg %p3291_p2  ;;  %p3298_p5 = por %p3297_p4, %p3296_p11 }
  0x27   : > { %p3299_p7 = pnand %p3298_p5, %p3292_p12 }
  0x29   : > { %3302 = shalt.err (!%p3299_p7)
}
  0x2a   : > { %s3372_s8 = smov 128   ;;  %s3373_s11 = smov 8  }
  0x2b   : > { %3166 = dma.hbm_to_vmem [thread:$0]  (!%p3488_p13), %s3484_s20, 4096, %s3492_s22, %s3494_s29, %s3372_s8, %s3372_s8, %s3373_s11  }
  0x2c   : > { %p2778_p9 = scmp.ge.s32.totalorder %s3369_s27, 1  ;;  %p256_p1 = scmp.lt.s32.totalorder %s3369_s27, 3 }
  0x2e   : > { %p257_p3 = pnand %p2778_p9, %p256_p1 }
  0x2f   : > { %s3525_s16 = sand.u32 (!%p257_p3), 1, %s3361_s25  }
  0x30   : > { %260 = sbr.rel (%p257_p3) target bundleno = 1091 (0x443), region = 48  ;;  %s2779_s17 = sshll.u32 (!%p257_p3), %s3525_s16, 8 }
  0x31   : > { %s263_s18 = scalar_lea.sflag (!%p257_p3), [#allocation4], %s3525_s16  ;;  %s3531_s15 = scalar_lea.vmem (!%p257_p3), [#allocation3], %s2779_s17 }
  0x37   : > { %3348 = dma.done.wait (%p3464_p6), %s263_s18, 4096  }
  0x38   : > { %3350 = vsyncadd (%p3464_p6), %s263_s18, 4294963200  ;;  %v3213_v0 = vld [vmem:[%s4997_s1] sm:$0xff]   ;;  %v3214_v1 = vld [vmem:[%s4997_s1 + $0x8] sm:$0xff]   ;;  %vm747_vm0 = vcmask 261120   ;;  %vm1001_vm1 = vsmask.f32 7424 }
  0x39   : > { %3023 = vmatprep.subr.bf16.mxu0 %v3213_v0  ;;  %3143 = vmatprep.subr.bf16.mxu1 %v3213_v0  ;;  %v3215_v2 = vld [vmem:[%s4997_s1 + $0x10] sm:$0xff]   ;;  %v3216_v3 = vld [vmem:[%s4997_s1 + $0x18] sm:$0xff]   ;;  %v298_v4 = vld [vmem:[%s3531_s15] sm:$0xff]  ;;  %vm748_vm2 = vsmask.f32 7938  ;;  %s3374_s20 = smov 32  }
  0x3a   : > { %3024 = vmatpush3.bf16.msra.mxu0 %v3213_v0  ;;  %3151 = vmatpush3.bf16.msra.mxu1 %v3213_v0  ;;  %v299_v5 = vld [vmem:[%s3531_s15 + $0x8] sm:$0xff]  ;;  %v314_v6 = vld [vmem:[%s3531_s15 + $0x80] sm:$0xff]  ;;  %v3219_v12 = vld [vmem:[%s4997_s1 + $0x30] sm:$0xff]   ;;  %vm1051_vm3 = vsmask.f32 7966  ;;  %vm1690_vm4 = vcmask 261127  }
  0x3b   : > { %3025 = vmatprep.subr.bf16.mxu0 %v3214_v1  ;;  %3144 = vmatprep.subr.bf16.mxu1 %v3214_v1  ;;  %v330_v7 = vpack.c.bf16 %v299_v5, %v298_v4  ;;  %v315_v8 = vld [vmem:[%s3531_s15 + $0x88] sm:$0xff]  ;;  %v3217_v10 = vld [vmem:[%s4997_s1 + $0x20] sm:$0xff]   ;;  %v3220_v13 = vld [vmem:[%s4997_s1 + $0x38] sm:$0xff]   ;;  %vm797_vm5 = vcmask 253952   ;;  %vm798_vm6 = vsmask.f32 256 }
  0x3c   : > { %v338_v9 = vpack.c.bf16 %v315_v8, %v314_v6  ;;  %v3218_v11 = vld [vmem:[%s4997_s1 + $0x28] sm:$0xff]   ;;  %v300_v14 = vld [vmem:[%s3531_s15 + $0x10] sm:$0xff]  ;;  %v301_v15 = vld [vmem:[%s3531_s15 + $0x18] sm:$0xff]  ;;  %s3375_s22 = smov 96   ;;  %s3376_s23 = smov 64   ;;  %vm908_vm11 = vcmask 523520  }
  0x3d   : > { %3039 = vmatprep.mubr.bf16.mxu0 %v330_v7  ;;  %v316_v16 = vld [vmem:[%s3531_s15 + $0x90] sm:$0xff]  ;;  %v317_v17 = vld [vmem:[%s3531_s15 + $0x98] sm:$0xff]  ;;  %v302_v18 = vld [vmem:[%s3531_s15 + $0x20] sm:$0xff]  ;;  %v331_v22 = vpack.c.bf16 %v301_v15, %v300_v14  ;;  %vm1000_vm12 = vcmask 785920   ;;  %vm1050_vm13 = vcmask 785927   ;;  %s4855_s8 = scalar_lea.vmem [#allocation6], %s2779_s17 }
  0x3e   : > { %3026 = vmatpush3.bf16.msra.mxu0 %v3214_v1  ;;  %3152 = vmatpush3.bf16.msra.mxu1 %v3214_v1  ;;  %v303_v19 = vld [vmem:[%s3531_s15 + $0x28] sm:$0xff]  ;;  %v318_v20 = vld [vmem:[%s3531_s15 + $0xa0] sm:$0xff]  ;;  %v339_v23 = vpack.c.bf16 %v317_v17, %v316_v16  ;;  %v304_v26 = vld [vmem:[%s3531_s15 + $0x30] sm:$0xff]  ;;  %s2850_s17 = sshll.u32 %s3442_s28, 12  ;;  %s2699_s11 = sshll.u32 %s4855_s8, 4  ;;  %s4949_s11 = int_to_ptr.vmem [resolvable:$true] %s2699_s11 }
  0x3f   : > { %3027 = vmatprep.subr.bf16.mxu0 %v3215_v2  ;;  %3145 = vmatprep.subr.bf16.mxu1 %v3215_v2  ;;  %v319_v21 = vld [vmem:[%s3531_s15 + $0xa8] sm:$0xff]  ;;  %v332_v24 = vpack.c.bf16 %v303_v19, %v302_v18  ;;  %v305_v27 = vld [vmem:[%s3531_s15 + $0x38] sm:$0xff]  ;;  %v306_v28 = vld [vmem:[%s3531_s15 + $0x40] sm:$0xff]  ;;  %s2686_s28 = scalar_lea.sflag [#allocation5], %s3525_s16  ;;  %p5034_p11 = scmp.ne.s32.totalorder %s5007_s13, 0 }
  0x40   : > { %3055 = vmatprep.mubr.bf16.mxu1 %v338_v9  ;;  %v340_v25 = vpack.c.bf16 %v319_v21, %v318_v20  ;;  %v320_v29 = vld [vmem:[%s3531_s15 + $0xb0] sm:$0xff]  ;;  %v321_v30 = vld [vmem:[%s3531_s15 + $0xb8] sm:$0xff]  ;;  %v307_v31 = vld [vmem:[%s3531_s15 + $0x48] sm:$0xff]  ;;  %v333_v34 = vpack.c.bf16 %v305_v27, %v304_v26 }
  0x41   : > { %v322_v32 = vld [vmem:[%s3531_s15 + $0xc0] sm:$0xff]  ;;  %v323_v33 = vld [vmem:[%s3531_s15 + $0xc8] sm:$0xff]  ;;  %v341_v35 = vpack.c.bf16 %v321_v30, %v320_v29  ;;  %v334_v36 = vpack.c.bf16 %v307_v31, %v306_v28  ;;  %v308_v38 = vld [vmem:[%s3531_s15 + $0x50] sm:$0xff] }
  0x42   : > { %3028 = vmatpush3.bf16.msra.mxu0 %v3215_v2  ;;  %3153 = vmatpush3.bf16.msra.mxu1 %v3215_v2  ;;  %v342_v37 = vpack.c.bf16 %v323_v33, %v322_v32  ;;  %v309_v39 = vld [vmem:[%s3531_s15 + $0x58] sm:$0xff]  ;;  %v310_v40 = vld [vmem:[%s3531_s15 + $0x60] sm:$0xff]  ;;  %v324_v41 = vld [vmem:[%s3531_s15 + $0xd0] sm:$0xff] }
  0x43   : > { %3029 = vmatprep.subr.bf16.mxu0 %v3216_v3  ;;  %3146 = vmatprep.subr.bf16.mxu1 %v3216_v3  ;;  %v325_v42 = vld [vmem:[%s3531_s15 + $0xd8] sm:$0xff]  ;;  %v311_v43 = vld [vmem:[%s3531_s15 + $0x68] sm:$0xff]  ;;  %v326_v44 = vld [vmem:[%s3531_s15 + $0xe0] sm:$0xff]  ;;  %v335_v46 = vpack.c.bf16 %v309_v39, %v308_v38 }
  0x44   : > { %v327_v45 = vld [vmem:[%s3531_s15 + $0xe8] sm:$0xff]  ;;  %v343_v47 = vpack.c.bf16 %v325_v42, %v324_v41  ;;  %v336_v48 = vpack.c.bf16 %v311_v43, %v310_v40  ;;  %v312_v50 = vld [vmem:[%s3531_s15 + $0x70] sm:$0xff]  ;;  %v313_v51 = vld [vmem:[%s3531_s15 + $0x78] sm:$0xff] }
  0x45   : > { %v344_v49 = vpack.c.bf16 %v327_v45, %v326_v44  ;;  %v328_v52 = vld [vmem:[%s3531_s15 + $0xf0] sm:$0xff]  ;;  %v329_v53 = vld [vmem:[%s3531_s15 + $0xf8] sm:$0xff]  ;;  %v337_v54 = vpack.c.bf16 %v313_v51, %v312_v50  ;;  %v3221_v56 = vld [vmem:[%s4999_s3 + $0x80] sm:$0xff]  }
  0x46   : > { %3030 = vmatpush3.bf16.msra.mxu0 %v3216_v3  ;;  %3154 = vmatpush3.bf16.msra.mxu1 %v3216_v3  ;;  %v345_v55 = vpack.c.bf16 %v329_v53, %v328_v52  ;;  %v3222_v57 = vld [vmem:[%s4999_s3 + $0x88] sm:$0xff]   ;;  %v3602_v58 = vld [vmem:[%s4998_s2] ss:$0 sm:$0xff]  ;;  %vm3637_vm7 = vmand %vm747_vm0, %vm1001_vm1 }
  0x47   : > { %3031 = vmatprep.subr.bf16.mxu0 %v3217_v10  ;;  %3147 = vmatprep.subr.bf16.mxu1 %v3217_v10  ;;  %vm3646_vm8 = vmand %vm747_vm0, %vm748_vm2  ;;  %v1668_v53 = vld [vmem:[#allocation2 + $0xd0] sm:$0xff] }
  0x48   : > { %vm3709_vm9 = vmand %vm1690_vm4, %vm1051_vm3  ;;  %vm1372_vm4 = vcmask 523527  }
  0x49   : > { %vm3718_vm10 = vmand %vm797_vm5, %vm798_vm6 }
  0x4a   : > { %3032 = vmatpush3.bf16.msra.mxu0 %v3217_v10  ;;  %3155 = vmatpush3.bf16.msra.mxu1 %v3217_v10  ;;  %vm4172_vm14 = vmand %vm1050_vm13, %vm1051_vm3 }
  0x4b   : > { %3033 = vmatprep.subr.bf16.mxu0 %v3218_v11  ;;  %3148 = vmatprep.subr.bf16.mxu1 %v3218_v11  ;;  %vm4269_vm15 = vmand %vm908_vm11, %vm1001_vm1 }
  0x4c   : > { %vm4286_vm5 = vmand %vm1000_vm12, %vm1001_vm1 }
  0x4d   : > { %vm4347_vm13 = vmand %vm1000_vm12, %vm748_vm2 }
  0x4e   : > { %3034 = vmatpush3.bf16.msra.mxu0 %v3218_v11  ;;  %3156 = vmatpush3.bf16.msra.mxu1 %v3218_v11 }
  0x4f   : > { %3035 = vmatprep.subr.bf16.mxu0 %v3219_v12  ;;  %3149 = vmatprep.subr.bf16.mxu1 %v3219_v12 }
  0x52   : > { %3036 = vmatpush3.bf16.msra.mxu0 %v3219_v12  ;;  %3157 = vmatpush3.bf16.msra.mxu1 %v3219_v12 }
  0x53   : > { %3037 = vmatprep.subr.bf16.mxu0 %v3220_v13  ;;  %3150 = vmatprep.subr.bf16.mxu1 %v3220_v13 }
  0x56   : > { %3038 = vmatpush3.bf16.msra.mxu0 %v3220_v13  ;;  %3158 = vmatpush3.bf16.msra.mxu1 %v3220_v13 }
  0x57   : > { %3071 = vmatprep.subr.bf16.mxu0 %v3221_v56 }
  0x59   : > { %3040 = vmatmul.mubr.bf16.vlgmr.msra.gmra.mrb[0].mxu0 %v331_v22  ;;  %3056 = vmatmul.mubr.bf16.vlgmr.msra.gmra.mrb[0].mxu1 %v339_v23 }
  0x5a   : > { %3043 = vmatprep.mubr.bf16.mxu0 %v332_v24  ;;  %3059 = vmatprep.mubr.bf16.mxu1 %v340_v25 }
  0x5b   : > { %3072 = vmatpush3.bf16.msra.mxu0 %v3221_v56 }
  0x5c   : > { %3073 = vmatprep.subr.bf16.mxu0 %v3222_v57 }
  0x5f   : > { %3074 = vmatpush3.bf16.msra.mxu0 %v3222_v57 }
  0x61   : > { %3044 = vmatmul.mubr.bf16.gmra.mrb[4].mxu0 %v333_v34  ;;  %3060 = vmatmul.mubr.bf16.gmra.mrb[4].mxu1 %v341_v35 }
  0x62   : > { %3047 = vmatprep.mubr.bf16.mxu0 %v334_v36  ;;  %3063 = vmatprep.mubr.bf16.mxu1 %v342_v37 }
  0x69   : > { %3048 = vmatmul.mubr.bf16.gmra.mrb[8].mxu0 %v335_v46  ;;  %3064 = vmatmul.mubr.bf16.gmra.mrb[8].mxu1 %v343_v47  ;;  %v753_v47 = vld [vmem:[#allocation2 + $0x30] sm:$0xff] }
  0x6a   : > { %3051 = vmatprep.mubr.bf16.mxu0 %v336_v48  ;;  %3067 = vmatprep.mubr.bf16.mxu1 %v344_v49  ;;  %v1644_v49 = vld [vmem:[#allocation2 + $0x10] sm:$0xff] }
  0x71   : > { %3052 = vmatmul.mubr.bf16.gmra.mrb[12].mxu0 %v337_v54  ;;  %3068 = vmatmul.mubr.bf16.gmra.mrb[12].mxu1 %v345_v55 }
 0x12c   : > { %v3041_v59 = vpop.f32.mrb[0].mxu0  ;;  %v3057_v60 = vpop.f32.mrb[0].mxu1 }
 0x12d   : > { %v460_v61 = vadd.f32 %v3041_v59, %v3602_v58  ;;  %v524_v62 = vadd.f32 %v3057_v60, %v3602_v58  ;;  %v451_v63 = vpop.f32.mrb[1].mxu0  ;;  %v515_v0 = vpop.f32.mrb[1].mxu1  ;;  %v750_v60 = vld [vmem:[#allocation2 + $0x18] sm:$0xff] }
 0x12e   : > { %v452_v1 = vadd.f32 %v3602_v58, %v451_v63  ;;  %v516_v2 = vadd.f32 %v3602_v58, %v515_v0  ;;  %v3042_v3 = vpop.f32.mrb[2].mxu0  ;;  %v3058_v4 = vpop.f32.mrb[2].mxu1 }
 0x12f   : > { %v596_v5 = vmax.f32 %v524_v62, 0.0  ;;  %v463_v6 = vadd.f32 %v3042_v3, %v3602_v58  ;;  %v527_v7 = vadd.f32 %v3058_v4, %v3602_v58  ;;  %v454_v8 = vpop.f32.mrb[3].mxu0  ;;  %v518_v9 = vpop.f32.mrb[3].mxu1  ;;  %v580_v13 = vmax.f32 %v460_v61, 0.0 }
 0x130   : > { %v594_v10 = vmax.f32 %v516_v2, 0.0  ;;  %v455_v11 = vadd.f32 %v3602_v58, %v454_v8  ;;  %v519_v12 = vadd.f32 %v3602_v58, %v518_v9  ;;  %v578_v16 = vmax.f32 %v452_v1, 0.0 }
 0x131   : > { %v581_v14 = vmax.f32 %v463_v6, 0.0  ;;  %v597_v15 = vmax.f32 %v527_v7, 0.0 }
 0x132   : > { %v579_v17 = vmax.f32 %v455_v11, 0.0  ;;  %v595_v18 = vmax.f32 %v519_v12, 0.0 }
 0x133   : > { %v611_v19 = vpack.c.bf16 %v581_v14, %v580_v13  ;;  %v3612_v20 = vpack.c.bf16 %v597_v15, %v596_v5 }
 0x134   : > { %v610_v21 = vpack.c.bf16 %v579_v17, %v578_v16  ;;  %v3614_v22 = vpack.c.bf16 %v595_v18, %v594_v10  ;;  %v3045_v23 = vpop.f32.mrb[4].mxu0  ;;  %v3616_v24 = vpop.f32.mrb[4].mxu1 }
 0x135   : > { %v476_v25 = vadd.f32 %v3045_v23, %v3602_v58  ;;  %865 = vrot.lane.b32.xlu1 %v611_v19, %s3374_s20  ;;  %v467_v26 = vpop.f32.mrb[5].mxu0  ;;  %1257 = vst.msk [vmem:[#allocation2 + $0x20] sm:$0xff] %vm747_vm0, %v611_v19  ;;  %1265 = vst.msk [vmem:[#allocation2 + $0xe0] sm:$0xff] %vm747_vm0, %v3612_v20  ;;  %v634_v27 = vshrl.u32 %v611_v19, 16  ;;  %v637_v28 = vshll.u32 %v611_v19, 16  ;;  %v690_v29 = vshrl.u32 %v3612_v20, 16 }
 0x136   : > { %v3624_v30 = vpop.f32.mrb[5].mxu1  ;;  %v468_v31 = vadd.f32 %v3602_v58, %v467_v26  ;;  %v3046_v32 = vpop.f32.mrb[6].mxu0  ;;  %863 = vrot.lane.b32.xlu0 %v610_v21, %s3374_s20  ;;  %1256 = vst.msk [vmem:[#allocation2 + $0x8] sm:$0xff] %vm747_vm0, %v610_v21  ;;  %1264 = vst.msk [vmem:[#allocation2 + $0xc8] sm:$0xff] %vm747_vm0, %v3614_v22  ;;  %v693_v33 = vshll.u32 %v3612_v20, 16  ;;  %v627_v34 = vshrl.u32 %v610_v21, 16 }
 0x137   : > { %v630_v35 = vshll.u32 %v610_v21, 16  ;;  %v3632_v36 = vpop.f32.mrb[6].mxu1  ;;  %v584_v37 = vmax.f32 %v476_v25, 0.0  ;;  %v479_v38 = vadd.f32 %v3046_v32, %v3602_v58  ;;  %v470_v39 = vpop.f32.mrb[7].mxu0  ;;  %v636_v41 = vrot.slane %v634_v27, 7 }
 0x138   : > { %v927_v42 = vrot.slane %v637_v28, 1  ;;  %v3641_v43 = vpop.f32.mrb[7].mxu1  ;;  %v582_v44 = vmax.f32 %v468_v31, 0.0  ;;  %v471_v45 = vadd.f32 %v3602_v58, %v470_v39  ;;  %v943_v48 = vrot.slane %v693_v33, 1 }
 0x139   : > { %v925_v50 = vrot.slane %v630_v35, 1  ;;  %v585_v51 = vmax.f32 %v479_v38, 0.0  ;;  %1566 = vrot.lane.b32.xlu1 %v611_v19, %s3375_s22  ;;  %v639_v52 = vor.u32 %v637_v28, %v636_v41  ;;  %v629_v55 = vrot.slane %v627_v34, 7  ;;  %v774_v19 = vld [vmem:[#allocation2 + $0xd8] sm:$0xff]  ;;  %v1650_v41 = vld [vmem:[#allocation2 + $0x40] sm:$0xff] }
 0x13a   : > { %v3653_v54 = vor.u32 %v927_v42, %v634_v27  ;;  %v583_v56 = vmax.f32 %v471_v45, 0.0  ;;  %v3657_v57 = vor.u32 %v943_v48, %v690_v29  ;;  %v683_v61 = vshrl.u32 %v3614_v22, 16  ;;  %v1665_v27 = vld [vmem:[#allocation2 + $0xb8] sm:$0xff]  ;;  %v1647_v42 = vld [vmem:[#allocation2 + $0x28] sm:$0xff] }
 0x13b   : > { %v3659_v59 = vor.u32 %v925_v50, %v627_v34  ;;  %v3662_v62 = vpack.c.bf16 %v585_v51, %v584_v37  ;;  %v754_v63 = vsel %vm3646_vm8, %v639_v52, %v753_v47  ;;  %1422 = vrot.lane.b32.xlu0 %v639_v52, %s3376_s23  ;;  %v3670_v1 = vor.u32 %v630_v35, %v629_v55 }
 0x13c   : > { %v1645_v0 = vsel %vm3637_vm7, %v3653_v54, %v1644_v49  ;;  %v3672_v2 = vpack.c.bf16 %v583_v56, %v582_v44  ;;  %755 = vst [vmem:[#allocation2 + $0x30] sm:$0xff] %v754_v63  ;;  %v3049_v3 = vpop.f32.mrb[8].mxu0  ;;  %v1669_v4 = vsel %vm3637_vm7, %v3657_v57, %v1668_v53  ;;  %v686_v5 = vshll.u32 %v3614_v22, 16  ;;  %v3678_v7 = vpop.f32.mrb[8].mxu1 }
 0x13d   : > { %1646 = vst [vmem:[#allocation2 + $0x10] sm:$0xff] %v1645_v0  ;;  %v685_v6 = vrot.slane %v683_v61, 7  ;;  %1259 = vst.msk [vmem:[#allocation2 + $0x50] sm:$0xff] %vm747_vm0, %v3662_v62  ;;  %v492_v8 = vadd.f32 %v3049_v3, %v3602_v58  ;;  %881 = vrot.lane.b32.xlu1 %v3612_v20, %s3374_s20  ;;  %v483_v9 = vpop.f32.mrb[9].mxu0  ;;  %v751_v10 = vsel %vm3646_vm8, %v3670_v1, %v750_v60  ;;  %v648_v11 = vshrl.u32 %v3662_v62, 16  ;;  %v3690_v13 = vpop.f32.mrb[9].mxu1 }
 0x13e   : > { %1670 = vst [vmem:[#allocation2 + $0xd0] sm:$0xff] %v1669_v4  ;;  %v651_v12 = vshll.u32 %v3662_v62, 16  ;;  %v641_v14 = vshrl.u32 %v3672_v2, 16  ;;  %v644_v15 = vshll.u32 %v3672_v2, 16  ;;  %1258 = vst.msk [vmem:[#allocation2 + $0x38] sm:$0xff] %vm747_vm0, %v3672_v2  ;;  %v484_v16 = vadd.f32 %v3602_v58, %v483_v9  ;;  %v3050_v17 = vpop.f32.mrb[10].mxu0 }
 0x13f   : > { %752 = vst [vmem:[#allocation2 + $0x18] sm:$0xff] %v751_v10  ;;  %v941_v18 = vrot.slane %v686_v5, 1  ;;  %v3697_v21 = vpop.f32.mrb[10].mxu1  ;;  %v588_v23 = vmax.f32 %v492_v8, 0.0  ;;  %v495_v25 = vadd.f32 %v3050_v17, %v3602_v58  ;;  %v486_v26 = vpop.f32.mrb[11].mxu0  ;;  %1110 = vrot.lane.b32.xlu0 %v639_v52, %s3375_s22  ;;  %v3701_v28 = vor.u32 %v686_v5, %v685_v6  ;;  %v759_v0 = vld [vmem:[#allocation2 + $0x60] sm:$0xff] }
 0x140   : > { %v931_v31 = vrot.slane %v651_v12, 1  ;;  %v3703_v32 = vpop.f32.mrb[11].mxu1  ;;  %v929_v34 = vrot.slane %v644_v15, 1  ;;  %v586_v37 = vmax.f32 %v484_v16, 0.0  ;;  %v487_v38 = vadd.f32 %v3602_v58, %v486_v26 }
 0x141   : > { %v3714_v39 = vor.u32 %v941_v18, %v683_v61  ;;  %v589_v45 = vmax.f32 %v495_v25, 0.0  ;;  %879 = vrot.lane.b32.xlu1 %v3614_v22, %s3374_s20  ;;  %v775_v47 = vsel %vm3646_vm8, %v3701_v28, %v774_v19  ;;  %v650_v49 = vrot.slane %v648_v11, 7 }
 0x142   : > { %v3727_v48 = vor.u32 %v931_v31, %v648_v11  ;;  %v3729_v50 = vor.u32 %v929_v34, %v641_v14  ;;  %v587_v51 = vmax.f32 %v487_v38, 0.0  ;;  %776 = vst [vmem:[#allocation2 + $0xd8] sm:$0xff] %v775_v47  ;;  %v643_v53 = vrot.slane %v641_v14, 7 }
 0x143   : > { %v1666_v52 = vsel %vm3637_vm7, %v3714_v39, %v1665_v27  ;;  %v806_v55 = vld [vmem:[#allocation2 + $0x30] sm:$0x1]  ;;  %v3734_v56 = vpack.c.bf16 %v589_v45, %v588_v23  ;;  %1292 = vrot.lane.b32.xlu0 %v3657_v57, %s3374_s20  ;;  %v3741_v63 = vor.u32 %v651_v12, %v650_v49  ;;  %v3745_v3 = vadd.f32 %v3616_v24, %v3602_v58  ;;  %v756_v45 = vld [vmem:[#allocation2 + $0x48] sm:$0xff] }
 0x144   : > { %v1692_v60 = vld [vmem:[#allocation2 + $0x10] sm:$0x80]  ;;  %1667 = vst [vmem:[#allocation2 + $0xb8] sm:$0xff] %v1666_v52  ;;  %v1651_v61 = vsel %vm3637_vm7, %v3727_v48, %v1650_v41  ;;  %v1648_v4 = vsel %vm3637_vm7, %v3729_v50, %v1647_v42  ;;  %v807_v5 = vsel %vm3718_vm10, 0, %v806_v55  ;;  %v3752_v6 = vpack.c.bf16 %v587_v51, %v586_v37  ;;  %v3053_v9 = vpop.f32.mrb[12].mxu0  ;;  %v3756_v11 = vpop.f32.mrb[12].mxu1 }
 0x145   : > { %v1716_v8 = vld [vmem:[#allocation2 + $0xd0] sm:$0x80]  ;;  %v1693_v10 = vsel %vm3709_vm9, 0, %v1692_v60  ;;  %1652 = vst [vmem:[#allocation2 + $0x40] sm:$0xff] %v1651_v61  ;;  %1649 = vst [vmem:[#allocation2 + $0x28] sm:$0xff] %v1648_v4  ;;  %v662_v24 = vshrl.u32 %v3734_v56, 16  ;;  %v508_v16 = vadd.f32 %v3053_v9, %v3602_v58  ;;  %1276 = vrot.lane.b32.xlu1 %v3653_v54, %s3374_s20  ;;  %v760_v42 = vsel %vm3646_vm8, %v3741_v63, %v759_v0 }
 0x146   : > { %808 = vst [vmem:[#allocation2 + $0x30] sm:$0x1] %v807_v5  ;;  %v665_v12 = vshll.u32 %v3734_v56, 16  ;;  %1261 = vst.msk [vmem:[#allocation2 + $0x80] sm:$0xff] %vm747_vm0, %v3734_v56  ;;  %v1717_v14 = vsel %vm3709_vm9, 0, %v1716_v8  ;;  %v499_v17 = vpop.f32.mrb[13].mxu0  ;;  %v3791_v60 = vor.u32 %v644_v15, %v643_v53 }
 0x147   : > { %1694 = vst [vmem:[#allocation2 + $0x10] sm:$0x80] %v1693_v10  ;;  %v803_v18 = vld [vmem:[#allocation2 + $0x18] sm:$0x1]  ;;  %v655_v19 = vshrl.u32 %v3752_v6, 16  ;;  %v658_v23 = vshll.u32 %v3752_v6, 16  ;;  %v500_v25 = vadd.f32 %v3602_v58, %v499_v17  ;;  %1274 = vrot.lane.b32.xlu0 %v3659_v59, %s3374_s20  ;;  %v532_v10 = vadd.f32 %v3602_v58, %v3624_v30 }
 0x148   : > { %1260 = vst.msk [vmem:[#allocation2 + $0x68] sm:$0xff] %vm747_vm0, %v3752_v6  ;;  %1718 = vst [vmem:[#allocation2 + $0xd0] sm:$0x80] %v1717_v14  ;;  %v3054_v26 = vpop.f32.mrb[14].mxu0  ;;  %v804_v27 = vsel %vm3718_vm10, 0, %v803_v18  ;;  %v3774_v31 = vpop.f32.mrb[13].mxu1  ;;  %v757_v17 = vsel %vm3646_vm8, %v3791_v60, %v756_v45 }
 0x149   : > { %v935_v34 = vrot.slane %v665_v12, 1  ;;  %v592_v37 = vmax.f32 %v508_v16, 0.0  ;;  %v511_v38 = vadd.f32 %v3054_v26, %v3602_v58  ;;  %v502_v41 = vpop.f32.mrb[15].mxu0  ;;  %805 = vst [vmem:[#allocation2 + $0x18] sm:$0x1] %v804_v27  ;;  %v3784_v47 = vpop.f32.mrb[14].mxu1  ;;  %957 = vrot.lane.b32.xlu1 %v3653_v54, %s3376_s23 }
 0x14a   : > { %v1656_v49 = vld [vmem:[#allocation2 + $0x70] sm:$0xff]  ;;  %v933_v51 = vrot.slane %v658_v23, 1  ;;  %v590_v52 = vmax.f32 %v500_v25, 0.0  ;;  %v503_v55 = vadd.f32 %v3602_v58, %v502_v41  ;;  %761 = vst [vmem:[#allocation2 + $0x60] sm:$0xff] %v760_v42  ;;  %v3793_v61 = vpop.f32.mrb[15].mxu1  ;;  %v1653_v0 = vld [vmem:[#allocation2 + $0x58] sm:$0xff] }
 0x14b   : > { %v3795_v4 = vor.u32 %v935_v34, %v662_v24  ;;  %v593_v5 = vmax.f32 %v511_v38, 0.0  ;;  %v827_v8 = vld [vmem:[#allocation2 + $0xd8] sm:$0x1]  ;;  %v600_v9 = vmax.f32 %v3745_v3, 0.0  ;;  %v1713_v53 = vld [vmem:[#allocation2 + $0xb8] sm:$0x80]  ;;  %955 = vrot.lane.b32.xlu0 %v3659_v59, %s3376_s23 }
 0x14c   : > { %v3804_v14 = vor.u32 %v933_v51, %v655_v19  ;;  %v591_v15 = vmax.f32 %v503_v55, 0.0  ;;  %v828_v16 = vsel %vm3718_vm10, 0, %v827_v8  ;;  %v1714_v30 = vsel %vm3709_vm9, 0, %v1713_v53  ;;  %v1698_v18 = vld [vmem:[#allocation2 + $0x40] sm:$0x80]  ;;  %758 = vst [vmem:[#allocation2 + $0x48] sm:$0xff] %v757_v17 }
 0x14d   : > { %v1657_v54 = vsel %vm3637_vm7, %v3795_v4, %v1656_v49  ;;  %v3814_v3 = vpack.c.bf16 %v593_v5, %v592_v37  ;;  %829 = vst [vmem:[#allocation2 + $0xd8] sm:$0x1] %v828_v16  ;;  %v598_v25 = vmax.f32 %v532_v10, 0.0  ;;  %v1695_v26 = vld [vmem:[#allocation2 + $0x28] sm:$0x80]  ;;  %v1699_v59 = vsel %vm3709_vm9, 0, %v1698_v18  ;;  %1108 = vrot.lane.b32.xlu1 %v3670_v1, %s3375_s22 }
 0x14e   : > { %1658 = vst [vmem:[#allocation2 + $0x70] sm:$0xff] %v1657_v54  ;;  %v1654_v27 = vsel %vm3637_vm7, %v3804_v14, %v1653_v0  ;;  %v3823_v34 = vpack.c.bf16 %v591_v15, %v590_v52  ;;  %v1742_v37 = vld [vmem:[#allocation2 + $0x10] sm:$0xff]  ;;  %1715 = vst [vmem:[#allocation2 + $0xb8] sm:$0x80] %v1714_v30  ;;  %v664_v38 = vrot.slane %v662_v24, 7  ;;  %v1696_v41 = vsel %vm3709_vm9, 0, %v1695_v26 }
 0x14f   : > { %1655 = vst [vmem:[#allocation2 + $0x58] sm:$0xff] %v1654_v27  ;;  %v676_v42 = vshrl.u32 %v3814_v3, 16  ;;  %v679_v45 = vshll.u32 %v3814_v3, 16  ;;  %1263 = vst.msk [vmem:[#allocation2 + $0xb0] sm:$0xff] %vm747_vm0, %v3814_v3  ;;  %3075 = vmatprep.mubr.msk.bf16.mxu0 %vm747_vm0, %v1742_v37  ;;  %v765_v49 = vld [vmem:[#allocation2 + $0x90] sm:$0xff]  ;;  %v543_v24 = vadd.f32 %v3632_v36, %v3602_v58  ;;  %v535_v1 = vadd.f32 %v3602_v58, %v3641_v43  ;;  %v1662_v15 = vld [vmem:[#allocation2 + $0xa0] sm:$0xff] }
 0x150   : > { %1700 = vst [vmem:[#allocation2 + $0x40] sm:$0x80] %v1699_v59  ;;  %1697 = vst [vmem:[#allocation2 + $0x28] sm:$0x80] %v1696_v41  ;;  %v669_v51 = vshrl.u32 %v3823_v34, 16  ;;  %v672_v52 = vshll.u32 %v3823_v34, 16  ;;  %v3844_v55 = vor.u32 %v665_v12, %v664_v38  ;;  %1290 = vrot.lane.b32.xlu0 %v3714_v39, %s3374_s20  ;;  %v556_v41 = vadd.f32 %v3678_v7, %v3602_v58 }
 0x151   : > { %1262 = vst.msk [vmem:[#allocation2 + $0x98] sm:$0xff] %vm747_vm0, %v3823_v34  ;;  %v939_v0 = vrot.slane %v679_v45, 1  ;;  %v812_v36 = vld [vmem:[#allocation2 + $0x60] sm:$0x1]  ;;  %v601_v5 = vmax.f32 %v543_v24, 0.0  ;;  %v657_v8 = vrot.slane %v655_v19, 7  ;;  %1436 = vrot.lane.b32.xlu1 %v3701_v28, %s3376_s23 }
 0x152   : > { %v678_v10 = vrot.slane %v676_v42, 7  ;;  %v937_v53 = vrot.slane %v672_v52, 1  ;;  %v813_v12 = vsel %vm3718_vm10, 0, %v812_v36  ;;  %v766_v43 = vsel %vm3646_vm8, %v3844_v55, %v765_v49  ;;  %v1659_v54 = vld [vmem:[#allocation2 + $0x88] sm:$0xff]  ;;  %v762_v18 = vld [vmem:[#allocation2 + $0x78] sm:$0xff]  ;;  %v771_v27 = vld [vmem:[#allocation2 + $0xc0] sm:$0xff] }
 0x153   : > { %v599_v16 = vmax.f32 %v535_v1, 0.0  ;;  %v3859_v17 = vor.u32 %v939_v0, %v676_v42  ;;  %814 = vst [vmem:[#allocation2 + $0x60] sm:$0x1] %v813_v12  ;;  %767 = vst [vmem:[#allocation2 + $0x90] sm:$0xff] %v766_v43  ;;  %v3863_v19 = vpack.c.bf16 %v601_v5, %v600_v9  ;;  %v3867_v30 = vor.u32 %v658_v23, %v657_v8  ;;  %v809_v59 = vld [vmem:[#allocation2 + $0x48] sm:$0x1] }
 0x154   : > { %v3869_v26 = vor.u32 %v679_v45, %v678_v10  ;;  %v3873_v37 = vor.u32 %v937_v53, %v669_v51  ;;  %v548_v9 = vadd.f32 %v3602_v58, %v3690_v13  ;;  %971 = vrot.lane.b32.xlu0 %v3714_v39, %s3376_s23  ;;  %v810_v45 = vsel %vm3718_vm10, 0, %v809_v59  ;;  %v1674_v53 = vld [vmem:[#allocation2 + $0x100] sm:$0xff]  ;;  %v768_v59 = vld [vmem:[#allocation2 + $0xa8] sm:$0xff]  ;;  %v1766_v46 = vld [vmem:[#allocation2 + $0xd0] sm:$0xff] }
 0x155   : > { %v3875_v38 = vpack.c.bf16 %v599_v16, %v598_v25  ;;  %v1704_v42 = vld [vmem:[#allocation2 + $0x70] sm:$0x80]  ;;  %v1663_v23 = vsel %vm3637_vm7, %v3859_v17, %v1662_v15  ;;  %v704_v25 = vshrl.u32 %v3863_v19, 16  ;;  %v707_v49 = vshll.u32 %v3863_v19, 16  ;;  %1267 = vst.msk [vmem:[#allocation2 + $0x110] sm:$0xff] %vm747_vm0, %v3863_v19  ;;  %869 = vrot.lane.b32.xlu1 %v3662_v62, %s3374_s20 }
 0x156   : > { %v1705_v7 = vsel %vm3709_vm9, 0, %v1704_v42  ;;  %v1701_v13 = vld [vmem:[#allocation2 + $0x58] sm:$0x80]  ;;  %1664 = vst [vmem:[#allocation2 + $0xa0] sm:$0xff] %v1663_v23  ;;  %v1660_v24 = vsel %vm3637_vm7, %v3873_v37, %v1659_v54  ;;  %811 = vst [vmem:[#allocation2 + $0x48] sm:$0x1] %v810_v45  ;;  %v763_v1 = vsel %vm3646_vm8, %v3867_v30, %v762_v18  ;;  %v772_v0 = vsel %vm3646_vm8, %v3869_v26, %v771_v27 }
 0x157   : > { %v1748_v39 = vld [vmem:[#allocation2 + $0x40] sm:$0xff]  ;;  %1266 = vst.msk [vmem:[#allocation2 + $0xf8] sm:$0xff] %vm747_vm0, %v3875_v38  ;;  %1706 = vst [vmem:[#allocation2 + $0x70] sm:$0x80] %v1705_v7  ;;  %v1702_v36 = vsel %vm3709_vm9, 0, %v1701_v13  ;;  %v1745_v5 = vld [vmem:[#allocation2 + $0x28] sm:$0xff]  ;;  %v559_v16 = vadd.f32 %v3697_v21, %v3602_v58  ;;  %v551_v54 = vadd.f32 %v3602_v58, %v3703_v32  ;;  %v3931_v32 = vadd.f32 %v3756_v11, %v3602_v58 }
 0x158   : > { %1661 = vst [vmem:[#allocation2 + $0x88] sm:$0xff] %v1660_v24  ;;  %v947_v8 = vrot.slane %v707_v49, 1  ;;  %764 = vst [vmem:[#allocation2 + $0x78] sm:$0xff] %v763_v1  ;;  %v604_v10 = vmax.f32 %v556_v41, 0.0  ;;  %v602_v15 = vmax.f32 %v548_v9, 0.0  ;;  %3076 = vmatmul.mubr.msk.bf16.vlgmr.msra.gmra.mrb[16].mxu0 %vm747_vm0, %v1745_v5  ;;  %v697_v12 = vshrl.u32 %v3875_v38, 16  ;;  %867 = vrot.lane.b32.xlu0 %v3672_v2, %s3374_s20 }
 0x159   : > { %773 = vst [vmem:[#allocation2 + $0xc0] sm:$0xff] %v772_v0  ;;  %1703 = vst [vmem:[#allocation2 + $0x58] sm:$0x80] %v1702_v36  ;;  %v700_v43 = vshll.u32 %v3875_v38, 16  ;;  %3079 = vmatprep.mubr.msk.bf16.mxu0 %vm747_vm0, %v1748_v39  ;;  %v671_v27 = vrot.slane %v669_v51, 7  ;;  %v692_v41 = vrot.slane %v690_v29, 7  ;;  %1570 = vrot.lane.b32.xlu1 %v3662_v62, %s3375_s22 }
 0x15a   : > { %v3923_v18 = vor.u32 %v947_v8, %v704_v25  ;;  %v777_v21 = vld [vmem:[#allocation2 + $0xf0] sm:$0xff]  ;;  %v605_v23 = vmax.f32 %v559_v16, 0.0  ;;  %v603_v45 = vmax.f32 %v551_v54, 0.0  ;;  %v699_v7 = vrot.slane %v697_v12, 7  ;;  %v1671_v13 = vld [vmem:[#allocation2 + $0xe8] sm:$0xff] }
 0x15b   : > { %v818_v9 = vld [vmem:[#allocation2 + $0x90] sm:$0x1]  ;;  %v945_v42 = vrot.slane %v700_v43, 1  ;;  %v3942_v11 = vor.u32 %v672_v52, %v671_v27  ;;  %v3946_v24 = vor.u32 %v693_v33, %v692_v41  ;;  %v780_v39 = vld [vmem:[#allocation2 + $0x108] sm:$0xff]  ;;  %v3223_v52 = vld [vmem:[%s4999_s3 + $0x40] sm:$0xff]  }
 0x15c   : > { %v819_v51 = vsel %vm3718_vm10, 0, %v818_v9  ;;  %v1675_v29 = vsel %vm3637_vm7, %v3923_v18, %v1674_v53  ;;  %v3950_v1 = vpack.c.bf16 %v605_v23, %v604_v10  ;;  %v3952_v0 = vpack.c.bf16 %v603_v45, %v602_v15  ;;  %v3224_v33 = vld [vmem:[%s4999_s3] sm:$0xff]   ;;  %v3225_v5 = vld [vmem:[%s4999_s3 + $0x48] sm:$0xff]   ;;  %1280 = vrot.lane.b32.xlu0 %v3727_v48, %s3374_s20  ;;  %2875 = vmatprep.subr.bf16.mxu1 %v3223_v52 }
 0x15d   : > { %820 = vst [vmem:[#allocation2 + $0x90] sm:$0x1] %v819_v51  ;;  %1676 = vst [vmem:[#allocation2 + $0x100] sm:$0xff] %v1675_v29  ;;  %v3948_v62 = vor.u32 %v945_v42, %v697_v12  ;;  %v3954_v36 = vor.u32 %v700_v43, %v699_v7  ;;  %v1710_v8 = vld [vmem:[#allocation2 + $0xa0] sm:$0x80]  ;;  %v769_v10 = vsel %vm3646_vm8, %v3942_v11, %v768_v59  ;;  %v608_v53 = vmax.f32 %v3931_v32, 0.0 }
 0x15e   : > { %v778_v15 = vsel %vm3646_vm8, %v3946_v24, %v777_v21  ;;  %v564_v12 = vadd.f32 %v3602_v58, %v3774_v31  ;;  %v3226_v43 = vld [vmem:[%s4999_s3 + $0x8] sm:$0xff]   ;;  %v1711_v16 = vsel %vm3709_vm9, 0, %v1710_v8  ;;  %v1754_v27 = vld [vmem:[#allocation2 + $0x70] sm:$0xff]  ;;  %1269 = vst.msk [vmem:[#allocation2 + $0x140] sm:$0xff] %vm747_vm0, %v3950_v1  ;;  %1268 = vst.msk [vmem:[#allocation2 + $0x128] sm:$0xff] %vm747_vm0, %v3952_v0  ;;  %v575_v21 = vadd.f32 %v3784_v47, %v3602_v58 }
 0x15f   : > { %v1707_v54 = vld [vmem:[#allocation2 + $0x88] sm:$0x80]  ;;  %v815_v41 = vld [vmem:[#allocation2 + $0x78] sm:$0x1]  ;;  %v1672_v59 = vsel %vm3637_vm7, %v3948_v62, %v1671_v13  ;;  %770 = vst [vmem:[#allocation2 + $0xa8] sm:$0xff] %v769_v10  ;;  %779 = vst [vmem:[#allocation2 + $0xf0] sm:$0xff] %v778_v15  ;;  %v781_v31 = vsel %vm3646_vm8, %v3954_v36, %v780_v39  ;;  %1568 = vrot.lane.b32.xlu1 %v3672_v2, %s3375_s22  ;;  %v567_v47 = vadd.f32 %v3602_v58, %v3793_v61 }
 0x160   : > { %1712 = vst [vmem:[#allocation2 + $0xa0] sm:$0x80] %v1711_v16  ;;  %v1708_v32 = vsel %vm3709_vm9, 0, %v1707_v54  ;;  %v1751_v9 = vld [vmem:[#allocation2 + $0x58] sm:$0xff]  ;;  %v816_v42 = vsel %vm3718_vm10, 0, %v815_v41  ;;  %1673 = vst [vmem:[#allocation2 + $0xe8] sm:$0xff] %v1672_v59  ;;  %2876 = vmatpush3.bf16.msra.mxu1 %v3224_v33  ;;  %961 = vrot.lane.b32.xlu0 %v3727_v48, %s3376_s23 }
 0x161   : > { %v824_v23 = vld [vmem:[#allocation2 + $0xc0] sm:$0x1]  ;;  %v718_v45 = vshrl.u32 %v3950_v1, 16  ;;  %782 = vst [vmem:[#allocation2 + $0x108] sm:$0xff] %v781_v31  ;;  %1709 = vst [vmem:[#allocation2 + $0x88] sm:$0x80] %v1708_v32  ;;  %3080 = vmatmul.mubr.msk.bf16.gmra.mrb[20].mxu0 %vm747_vm0, %v1751_v9  ;;  %2877 = vmatprep.subr.bf16.mxu1 %v3225_v5 }
 0x162   : > { %817 = vst [vmem:[#allocation2 + $0x78] sm:$0x1] %v816_v42  ;;  %v825_v2 = vsel %vm3718_vm10, 0, %v824_v23  ;;  %v721_v7 = vshll.u32 %v3950_v1, 16  ;;  %v606_v51 = vmax.f32 %v564_v12, 0.0  ;;  %v609_v29 = vmax.f32 %v575_v21, 0.0  ;;  %3083 = vmatprep.mubr.msk.bf16.mxu0 %vm747_vm0, %v1754_v27 }
 0x163   : > { %v3227_v13 = vld [vmem:[%s4999_s3 + $0x50] sm:$0xff]   ;;  %826 = vst [vmem:[#allocation2 + $0xc0] sm:$0x1] %v825_v2  ;;  %v607_v58 = vmax.f32 %v567_v47, 0.0  ;;  %v711_v61 = vshrl.u32 %v3952_v0, 16  ;;  %v714_v39 = vshll.u32 %v3952_v0, 16  ;;  %1426 = vrot.lane.b32.xlu1 %v3741_v63, %s3376_s23 }
 0x164   : > { %v951_v52 = vrot.slane %v721_v7, 1  ;;  %v4016_v33 = vpack.c.bf16 %v609_v29, %v608_v53  ;;  %v1722_v5 = vld [vmem:[#allocation2 + $0x100] sm:$0x80]  ;;  %v1680_v8 = vld [vmem:[#allocation2 + $0x130] sm:$0xff]  ;;  %v706_v15 = vrot.slane %v704_v25, 7  ;;  %2878 = vmatpush3.bf16.msra.mxu1 %v3226_v43  ;;  %v1677_v25 = vld [vmem:[#allocation2 + $0x118] sm:$0xff]  ;;  %1114 = vrot.lane.b32.xlu0 %v3741_v63, %s3375_s22 }
 0x165   : > { %v4020_v10 = vpack.c.bf16 %v607_v58, %v606_v51  ;;  %v949_v48 = vrot.slane %v714_v39, 1  ;;  %v3228_v12 = vld [vmem:[%s4999_s3 + $0x10] sm:$0xff]   ;;  %v1723_v53 = vsel %vm3709_vm9, 0, %v1722_v5  ;;  %v783_v43 = vld [vmem:[#allocation2 + $0x120] sm:$0xff]  ;;  %2879 = vmatprep.subr.bf16.mxu1 %v3227_v13  ;;  %v3229_v41 = vld [vmem:[%s4999_s3 + $0x58] sm:$0xff]   ;;  %v3377_v29 = vmov 0  }
 0x166   : > { %v4033_v16 = vor.u32 %v951_v52, %v718_v45  ;;  %v1102_v54 = vshrl.u32 %v4016_v33, 16  ;;  %v1105_v27 = vshll.u32 %v4016_v33, 16  ;;  %1271 = vst.msk [vmem:[#allocation2 + $0x170] sm:$0xff] %vm747_vm0, %v4016_v33  ;;  %1724 = vst [vmem:[#allocation2 + $0x100] sm:$0x80] %v1723_v53  ;;  %v1686_v21 = vld [vmem:[#allocation2 + $0x160] sm:$0xff]  ;;  %v4050_v9 = vor.u32 %v707_v49, %v706_v15 }
 0x167   : > { %v821_v59 = vld [vmem:[#allocation2 + $0xa8] sm:$0x1]  ;;  %v830_v31 = vld [vmem:[#allocation2 + $0xf0] sm:$0x1]  ;;  %1270 = vst.msk [vmem:[#allocation2 + $0x158] sm:$0xff] %vm747_vm0, %v4020_v10  ;;  %v4046_v32 = vor.u32 %v949_v48, %v711_v61  ;;  %v1760_v42 = vld [vmem:[#allocation2 + $0xa0] sm:$0xff]  ;;  %1278 = vrot.lane.b32.xlu1 %v3729_v50, %s3374_s20 }
 0x168   : > { %v1719_v23 = vld [vmem:[#allocation2 + $0xe8] sm:$0x80]  ;;  %v1681_v47 = vsel %vm3637_vm7, %v4033_v16, %v1680_v8  ;;  %v822_v63 = vsel %vm3718_vm10, 0, %v821_v59  ;;  %v831_v2 = vsel %vm3718_vm10, 0, %v830_v31  ;;  %v1272_v51 = vrot.slane %v1105_v27, 1  ;;  %796 = vst.msk [vmem:[#allocation2] sm:$0xff] %vm747_vm0, %v3377_v29  ;;  %2880 = vmatpush3.bf16.msra.mxu1 %v3228_v12  ;;  %959 = vrot.lane.b32.xlu0 %v3729_v50, %s3376_s23 }
 0x169   : > { %1689 = vst.msk [vmem:[#allocation2 + $0x178] sm:$0xff] %vm747_vm0, %v3377_v29  ;;  %v1757_v49 = vld [vmem:[#allocation2 + $0x88] sm:$0xff]  ;;  %v1720_v13 = vsel %vm3709_vm9, 0, %v1719_v23  ;;  %1682 = vst [vmem:[#allocation2 + $0x130] sm:$0xff] %v1681_v47  ;;  %v1678_v52 = vsel %vm3637_vm7, %v4046_v32, %v1677_v25  ;;  %v784_v5 = vsel %vm3646_vm8, %v4050_v9, %v783_v43  ;;  %v713_v8 = vrot.slane %v711_v61, 7  ;;  %v3230_v48 = vld [vmem:[%s4999_s3 + $0x18] sm:$0xff]   ;;  %2881 = vmatprep.subr.bf16.mxu1 %v3229_v41 }
 0x16a   : > { %823 = vst [vmem:[#allocation2 + $0xa8] sm:$0x1] %v822_v63  ;;  %832 = vst [vmem:[#allocation2 + $0xf0] sm:$0x1] %v831_v2  ;;  %v833_v58 = vld [vmem:[#allocation2 + $0x108] sm:$0x1]  ;;  %3084 = vmatmul.mubr.msk.bf16.gmra.mrb[24].mxu0 %vm747_vm0, %v1757_v49  ;;  %v4081_v53 = vor.u32 %v1272_v51, %v1102_v54 }
 0x16b   : > { %1721 = vst [vmem:[#allocation2 + $0xe8] sm:$0x80] %v1720_v13  ;;  %v834_v15 = vsel %vm3718_vm10, 0, %v833_v58  ;;  %1679 = vst [vmem:[#allocation2 + $0x118] sm:$0xff] %v1678_v52  ;;  %v786_v25 = vld [vmem:[#allocation2 + $0x138] sm:$0xff]  ;;  %v3231_v61 = vld [vmem:[%s4999_s3 + $0x60] sm:$0xff]   ;;  %3087 = vmatprep.mubr.msk.bf16.mxu0 %vm747_vm0, %v1760_v42  ;;  %v4094_v59 = vor.u32 %v714_v39, %v713_v8  ;;  %1424 = vrot.lane.b32.xlu1 %v3791_v60, %s3376_s23 }
 0x16c   : > { %785 = vst [vmem:[#allocation2 + $0x120] sm:$0xff] %v784_v5  ;;  %v720_v12 = vrot.slane %v718_v45, 7  ;;  %v725_v43 = vshrl.u32 %v4020_v10, 16  ;;  %835 = vst [vmem:[#allocation2 + $0x108] sm:$0x1] %v834_v15  ;;  %v789_v41 = vld [vmem:[#allocation2 + $0x150] sm:$0xff]  ;;  %v1687_v45 = vsel %vm3637_vm7, %v4081_v53, %v1686_v21  ;;  %2882 = vmatpush3.bf16.msra.mxu1 %v3230_v48  ;;  %1112 = vrot.lane.b32.xlu0 %v3791_v60, %s3375_s22 }
 0x16d   : > { %v728_v31 = vshll.u32 %v4020_v10, 16  ;;  %v1104_v23 = vrot.slane %v1102_v54, 7  ;;  %1688 = vst [vmem:[#allocation2 + $0x160] sm:$0xff] %v1687_v45  ;;  %v787_v39 = vsel %vm3646_vm8, %v4094_v59, %v786_v25  ;;  %v3232_v54 = vld [vmem:[%s4999_s3 + $0x20] sm:$0xff]   ;;  %v792_v21 = vld [vmem:[#allocation2 + $0x168] sm:$0xff]  ;;  %2883 = vmatprep.subr.bf16.mxu1 %v3231_v61  ;;  %v1763_v58 = vld [vmem:[#allocation2 + $0xb8] sm:$0xff] }
 0x16e   : > { %v4102_v47 = vor.u32 %v721_v7, %v720_v12  ;;  %v727_v50 = vrot.slane %v725_v43, 7  ;;  %788 = vst [vmem:[#allocation2 + $0x138] sm:$0xff] %v787_v39  ;;  %v1683_v2 = vld [vmem:[#allocation2 + $0x148] sm:$0xff] }
 0x16f   : > { %v953_v42 = vrot.slane %v728_v31, 1  ;;  %v4114_v7 = vor.u32 %v1105_v27, %v1104_v23  ;;  %v3233_v51 = vld [vmem:[%s4999_s3 + $0x68] sm:$0xff]   ;;  %v800_v13 = vld [vmem:[#allocation2] sm:$0x1]  ;;  %873 = vrot.lane.b32.xlu1 %v3734_v56, %s3374_s20 }
 0x170   : > { %v790_v63 = vsel %vm3646_vm8, %v4102_v47, %v789_v41  ;;  %v4122_v49 = vor.u32 %v728_v31, %v727_v50  ;;  %v1728_v52 = vld [vmem:[#allocation2 + $0x130] sm:$0x80]  ;;  %v801_v5 = vsel %vm3718_vm10, 0, %v800_v13  ;;  %2884 = vmatpush3.bf16.msra.mxu1 %v3232_v54  ;;  %v3234_v61 = vld [vmem:[%s4999_s3 + $0x28] sm:$0xff]   ;;  %1284 = vrot.lane.b32.xlu0 %v3795_v4, %s3374_s20 }
 0x171   : > { %791 = vst [vmem:[#allocation2 + $0x150] sm:$0xff] %v790_v63  ;;  %v4126_v27 = vor.u32 %v953_v42, %v725_v43  ;;  %v1729_v60 = vsel %vm3709_vm9, 0, %v1728_v52  ;;  %802 = vst [vmem:[#allocation2] sm:$0x1] %v801_v5  ;;  %2885 = vmatprep.subr.bf16.mxu1 %v3233_v51  ;;  %v3235_v50 = vld [vmem:[%s4999_s3 + $0x70] sm:$0xff]   ;;  %v1772_v42 = vld [vmem:[#allocation2 + $0x100] sm:$0xff] }
 0x172   : > { %v793_v8 = vsel %vm3646_vm8, %v4122_v49, %v792_v21  ;;  %v1725_v48 = vld [vmem:[#allocation2 + $0x118] sm:$0x80]  ;;  %3088 = vmatmul.mubr.msk.bf16.gmra.mrb[28].mxu0 %vm747_vm0, %v1763_v58  ;;  %1730 = vst [vmem:[#allocation2 + $0x130] sm:$0x80] %v1729_v60  ;;  %924 = vst.msk [vmem:[#allocation2] sm:$0xff] %vm908_vm11, %v3377_v29  ;;  %v1769_v39 = vld [vmem:[#allocation2 + $0xe8] sm:$0xff] }
 0x173   : > { %v836_v15 = vld [vmem:[#allocation2 + $0x120] sm:$0x1]  ;;  %v1684_v25 = vsel %vm3637_vm7, %v4126_v27, %v1683_v2  ;;  %794 = vst [vmem:[#allocation2 + $0x168] sm:$0xff] %v793_v8  ;;  %v1726_v12 = vsel %vm3709_vm9, 0, %v1725_v48  ;;  %3091 = vmatprep.mubr.msk.bf16.mxu0 %vm747_vm0, %v1766_v46  ;;  %1049 = vst.msk [vmem:[#allocation2] sm:$0xff] %vm1000_vm12, %v3377_v29  ;;  %1574 = vrot.lane.b32.xlu1 %v3734_v56, %s3375_s22  ;;  %v3236_v54 = vld [vmem:[%s4999_s3 + $0x30] sm:$0xff]  }
 0x174   : > { %v837_v43 = vsel %vm3718_vm10, 0, %v836_v15  ;;  %1685 = vst [vmem:[#allocation2 + $0x148] sm:$0xff] %v1684_v25  ;;  %1727 = vst [vmem:[#allocation2 + $0x118] sm:$0x80] %v1726_v12  ;;  %v1734_v40 = vld [vmem:[#allocation2 + $0x160] sm:$0x80]  ;;  %2886 = vmatpush3.bf16.msra.mxu1 %v3234_v61  ;;  %965 = vrot.lane.b32.xlu0 %v3795_v4, %s3376_s23 }
 0x175   : > { %838 = vst [vmem:[#allocation2 + $0x120] sm:$0x1] %v837_v43  ;;  %v1735_v41 = vsel %vm3709_vm9, 0, %v1734_v40  ;;  %v839_v31 = vld [vmem:[#allocation2 + $0x138] sm:$0x1]  ;;  %2887 = vmatprep.subr.bf16.mxu1 %v3235_v50  ;;  %vm1156_vm7 = vcmask 1048320   ;;  %vm4295_vm8 = vmand %vm1372_vm4, %vm1051_vm3 }
 0x176   : > { %1736 = vst [vmem:[#allocation2 + $0x160] sm:$0x80] %v1735_v41  ;;  %v840_v23 = vsel %vm3718_vm10, 0, %v839_v31  ;;  %v3237_v58 = vld [vmem:[%s4999_s3 + $0x78] sm:$0xff]   ;;  %vm4303_vm1 = vmand %vm1156_vm7, %vm748_vm2  ;;  %vm1206_vm3 = vcmask 1041152   ;;  %vm1515_vm2 = vcmask 778752  }
 0x177   : > { %841 = vst [vmem:[#allocation2 + $0x138] sm:$0x1] %v840_v23  ;;  %871 = vrot.lane.b32.xlu1 %v3752_v6, %s3374_s20  ;;  %v3238_v52 = vld [vmem:[%s4999_s3 + $0x38] sm:$0xff]   ;;  %vm4381_vm4 = vmand %vm1515_vm2, %vm798_vm6 }
 0x178   : > { %v842_v45 = vld [vmem:[#allocation2 + $0x150] sm:$0x1]  ;;  %2888 = vmatpush3.bf16.msra.mxu1 %v3236_v54  ;;  %1118 = vrot.lane.b32.xlu0 %v3844_v55, %s3375_s22 }
 0x179   : > { %v843_v56 = vsel %vm3718_vm10, 0, %v842_v45  ;;  %2889 = vmatprep.subr.bf16.mxu1 %v3237_v58  ;;  %v1778_v8 = vld [vmem:[#allocation2 + $0x130] sm:$0xff] }
 0x17a   : > { %844 = vst [vmem:[#allocation2 + $0x150] sm:$0x1] %v843_v56  ;;  %v845_v63 = vld [vmem:[#allocation2 + $0x168] sm:$0x1]  ;;  %3092 = vmatmul.mubr.msk.bf16.gmra.mrb[32].mxu0 %vm747_vm0, %v1769_v39  ;;  %v1053_v51 = vld [vmem:[#allocation2] sm:$0x80] }
 0x17b   : > { %v1731_v4 = vld [vmem:[#allocation2 + $0x148] sm:$0x80]  ;;  %v846_v2 = vsel %vm3718_vm10, 0, %v845_v63  ;;  %3095 = vmatprep.mubr.msk.bf16.mxu0 %vm747_vm0, %v1772_v42  ;;  %v1054_v44 = vsel %vm4172_vm14, 0, %v1053_v51  ;;  %1572 = vrot.lane.b32.xlu1 %v3752_v6, %s3375_s22  ;;  %v1775_v5 = vld [vmem:[#allocation2 + $0x118] sm:$0xff]  ;;  %vm4334_vm10 = vmand %vm1206_vm3, %vm798_vm6 }
 0x17c   : > { %v1732_v13 = vsel %vm3709_vm9, 0, %v1731_v4  ;;  %847 = vst [vmem:[#allocation2 + $0x168] sm:$0x1] %v846_v2  ;;  %1055 = vst [vmem:[#allocation2] sm:$0x80] %v1054_v44  ;;  %2890 = vmatpush3.bf16.msra.mxu1 %v3238_v52  ;;  %1282 = vrot.lane.b32.xlu0 %v3804_v14, %s3374_s20  ;;  %v1348_v42 = vld [vmem:[#allocation2 + $0xc8] sm:$0xff] }
 0x17d   : > { %1733 = vst [vmem:[#allocation2 + $0x148] sm:$0x80] %v1732_v13  ;;  %v1784_v60 = vld [vmem:[#allocation2 + $0x160] sm:$0xff] }
 0x17f   : > { %1430 = vrot.lane.b32.xlu1 %v3844_v55, %s3376_s23 }
 0x180   : > { %963 = vrot.lane.b32.xlu0 %v3804_v14, %s3376_s23 }
 0x182   : > { %3096 = vmatmul.mubr.msk.bf16.gmra.mrb[36].mxu0 %vm747_vm0, %v1775_v5 }
 0x183   : > { %3099 = vmatprep.mubr.msk.bf16.mxu0 %vm747_vm0, %v1778_v8  ;;  %1428 = vrot.lane.b32.xlu1 %v3867_v30, %s3376_s23 }
 0x184   : > { %1116 = vrot.lane.b32.xlu0 %v3867_v30, %s3375_s22  ;;  %v1781_v6 = vld [vmem:[#allocation2 + $0x148] sm:$0xff]  ;;  %v1351_v30 = vld [vmem:[#allocation2 + $0xe0] sm:$0xff] }
 0x187   : > { %877 = vrot.lane.b32.xlu1 %v3814_v3, %s3374_s20 }
 0x188   : > { %1288 = vrot.lane.b32.xlu0 %v3859_v17, %s3374_s20 }
 0x18a   : > { %3100 = vmatmul.mubr.msk.bf16.gmra.mrb[40].mxu0 %vm747_vm0, %v1781_v6 }
 0x18b   : > { %3103 = vmatprep.mubr.msk.bf16.mxu0 %vm747_vm0, %v1784_v60  ;;  %1578 = vrot.lane.b32.xlu1 %v3814_v3, %s3375_s22 }
 0x18c   : > { %969 = vrot.lane.b32.xlu0 %v3859_v17, %s3376_s23 }
 0x18f   : > { %875 = vrot.lane.b32.xlu1 %v3823_v34, %s3374_s20 }
 0x190   : > { %1122 = vrot.lane.b32.xlu0 %v3869_v26, %s3375_s22 }
 0x193   : > { %1576 = vrot.lane.b32.xlu1 %v3823_v34, %s3375_s22 }
 0x194   : > { %1286 = vrot.lane.b32.xlu0 %v3873_v37, %s3374_s20 }
 0x197   : > { %1434 = vrot.lane.b32.xlu1 %v3869_v26, %s3376_s23 }
 0x198   : > { %1294 = vrot.lane.b32.xlu0 %v3948_v62, %s3374_s20 }
 0x19b   : > { %1432 = vrot.lane.b32.xlu1 %v3942_v11, %s3376_s23 }
 0x19c   : > { %967 = vrot.lane.b32.xlu0 %v3873_v37, %s3376_s23  ;;  %v1327_v37 = vld [vmem:[#allocation2 + $0x20] sm:$0xff] }
 0x19f   : > { %883 = vrot.lane.b32.xlu1 %v3875_v38, %s3374_s20 }
 0x1a0   : > { %973 = vrot.lane.b32.xlu0 %v3657_v57, %s3376_s23 }
 0x1a3   : > { %1438 = vrot.lane.b32.xlu1 %v3946_v24, %s3376_s23 }
 0x1a4   : > { %1124 = vrot.lane.b32.xlu0 %v3701_v28, %s3375_s22 }
 0x1a7   : > { %1580 = vrot.lane.b32.xlu1 %v3614_v22, %s3375_s22  ;;  %v866_v14 = vpop.permute.xlu1 %865 }
 0x1a8   : > { %1120 = vrot.lane.b32.xlu0 %v3942_v11, %s3375_s22  ;;  %910 = vst.msk [vmem:[#allocation2 + $0x30] sm:$0xff] %vm908_vm11, %v866_v14  ;;  %v864_v3 = vpop.permute.xlu0 %863 }
 0x1a9   : > { %909 = vst.msk [vmem:[#allocation2 + $0x18] sm:$0xff] %vm908_vm11, %v864_v3 }
 0x1ab   : > { %885 = vrot.lane.b32.xlu1 %v3863_v19, %s3374_s20  ;;  %v4250_v57 = vpop.permute.xlu1 %1566 }
 0x1ac   : > { %1296 = vrot.lane.b32.xlu0 %v3923_v18, %s3374_s20 }
 0x1ad   : > { %v4254_v28 = vpop.permute.xlu0 %1422 }
 0x1af   : > { %1440 = vrot.lane.b32.xlu1 %v3954_v36, %s3376_s23  ;;  %v882_v22 = vpop.permute.xlu1 %881  ;;  %v1006_v46 = vld [vmem:[#allocation2 + $0x30] sm:$0xff] }
 0x1b0   : > { %975 = vrot.lane.b32.xlu0 %v3948_v62, %s3376_s23  ;;  %918 = vst.msk [vmem:[#allocation2 + $0xf0] sm:$0xff] %vm908_vm11, %v882_v22  ;;  %v1324_v62 = vld [vmem:[#allocation2 + $0x8] sm:$0xff]  ;;  %v1003_v31 = vld [vmem:[#allocation2 + $0x18] sm:$0xff] }
 0x1b1   : > { %v4261_v34 = vpop.permute.xlu0 %1110 }
 0x1b3   : > { %1582 = vrot.lane.b32.xlu1 %v3612_v20, %s3375_s22  ;;  %v880_v55 = vpop.permute.xlu1 %879 }
 0x1b4   : > { %1126 = vrot.lane.b32.xlu0 %v3946_v24, %s3375_s22  ;;  %917 = vst.msk [vmem:[#allocation2 + $0xd8] sm:$0xff] %vm908_vm11, %v880_v55 }
 0x1b5   : > { %v1293_v26 = vpop.permute.xlu0 %1292 }
 0x1b6   : > { %v1352_v20 = vsel %vm4269_vm15, %v1293_v26, %v1351_v30 }
 0x1b7   : > { %887 = vrot.lane.b32.xlu1 %v3952_v0, %s3374_s20  ;;  %1353 = vst [vmem:[#allocation2 + $0xe0] sm:$0xff] %v1352_v20  ;;  %v1277_v11 = vpop.permute.xlu1 %1276 }
 0x1b8   : > { %1298 = vrot.lane.b32.xlu0 %v4046_v32, %s3374_s20  ;;  %v1328_v24 = vsel %vm4269_vm15, %v1277_v11, %v1327_v37 }
 0x1b9   : > { %1329 = vst [vmem:[#allocation2 + $0x20] sm:$0xff] %v1328_v24  ;;  %v1275_v48 = vpop.permute.xlu0 %1274 }
 0x1ba   : > { %v1325_v25 = vsel %vm4269_vm15, %v1275_v48, %v1324_v62 }
 0x1bb   : > { %1442 = vrot.lane.b32.xlu1 %v4050_v9, %s3376_s23  ;;  %1326 = vst [vmem:[#allocation2 + $0x8] sm:$0xff] %v1325_v25  ;;  %v958_v61 = vpop.permute.xlu1 %957  ;;  %v1027_v44 = vld [vmem:[#allocation2 + $0xd8] sm:$0xff] }
 0x1bc   : > { %977 = vrot.lane.b32.xlu0 %v3923_v18, %s3376_s23  ;;  %v1007_v43 = vsel %vm4286_vm5, %v958_v61, %v1006_v46  ;;  %v1158_v18 = vld [vmem:[#allocation2] sm:$0xff] }
 0x1bd   : > { %1008 = vst [vmem:[#allocation2 + $0x30] sm:$0xff] %v1007_v43  ;;  %v956_v41 = vpop.permute.xlu0 %955 }
 0x1be   : > { %v1401_v23 = vld [vmem:[#allocation2 + $0xe0] sm:$0x80]  ;;  %v1004_v45 = vsel %vm4286_vm5, %v956_v41, %v1003_v31  ;;  %v4750_v41 = vld [vmem:[%s5000_s4] ss:$0 sm:$0xff] }
 0x1bf   : > { %1584 = vrot.lane.b32.xlu1 %v3875_v38, %s3375_s22  ;;  %v1402_v50 = vsel %vm4295_vm8, 0, %v1401_v23  ;;  %1005 = vst [vmem:[#allocation2 + $0x18] sm:$0xff] %v1004_v45  ;;  %v1109_v39 = vpop.permute.xlu1 %1108 }
 0x1c0   : > { %1128 = vrot.lane.b32.xlu0 %v3954_v36, %s3375_s22  ;;  %1403 = vst [vmem:[#allocation2 + $0xe0] sm:$0x80] %v1402_v50  ;;  %v1377_v56 = vld [vmem:[#allocation2 + $0x20] sm:$0x80]  ;;  %v1159_v54 = vsel %vm4303_vm1, %v1109_v39, %v1158_v18  ;;  %v1330_v39 = vld [vmem:[#allocation2 + $0x38] sm:$0xff] }
 0x1c1   : > { %v1378_v38 = vsel %vm4295_vm8, 0, %v1377_v56  ;;  %1160 = vst [vmem:[#allocation2] sm:$0xff] %v1159_v54 }
 0x1c2   : > { %v1291_v63 = vpop.permute.xlu0 %1290  ;;  %1379 = vst [vmem:[#allocation2 + $0x20] sm:$0x80] %v1378_v38  ;;  %v1374_v4 = vld [vmem:[#allocation2 + $0x8] sm:$0x80] }
 0x1c3   : > { %889 = vrot.lane.b32.xlu1 %v3950_v1, %s3374_s20  ;;  %v1349_v36 = vsel %vm4269_vm15, %v1291_v63, %v1348_v42  ;;  %v1375_v2 = vsel %vm4295_vm8, 0, %v1374_v4  ;;  %v4327_v51 = vpop.permute.xlu1 %1436 }
 0x1c4   : > { %1350 = vst [vmem:[#allocation2 + $0xc8] sm:$0xff] %v1349_v36  ;;  %1300 = vrot.lane.b32.xlu0 %v4033_v16, %s3374_s20  ;;  %1376 = vst [vmem:[#allocation2 + $0x8] sm:$0x80] %v1375_v2  ;;  %v1059_v13 = vld [vmem:[#allocation2 + $0x30] sm:$0x80] }
 0x1c5   : > { %v1060_v58 = vsel %vm4172_vm14, 0, %v1059_v13 }
 0x1c6   : > { %v972_v52 = vpop.permute.xlu0 %971  ;;  %1061 = vst [vmem:[#allocation2 + $0x30] sm:$0x80] %v1060_v58  ;;  %v1056_v8 = vld [vmem:[#allocation2 + $0x18] sm:$0x80] }
 0x1c7   : > { %1444 = vrot.lane.b32.xlu1 %v4094_v59, %s3376_s23  ;;  %v1028_v6 = vsel %vm4286_vm5, %v972_v52, %v1027_v44  ;;  %v1057_v60 = vsel %vm4172_vm14, 0, %v1056_v8  ;;  %v870_v14 = vpop.permute.xlu1 %869 }
 0x1c8   : > { %1029 = vst [vmem:[#allocation2 + $0xd8] sm:$0xff] %v1028_v6  ;;  %979 = vrot.lane.b32.xlu0 %v4046_v32, %s3376_s23  ;;  %1058 = vst [vmem:[#allocation2 + $0x18] sm:$0x80] %v1057_v60  ;;  %v1208_v3 = vld [vmem:[#allocation2] sm:$0x1] }
 0x1c9   : > { %912 = vst.msk [vmem:[#allocation2 + $0x60] sm:$0xff] %vm908_vm11, %v870_v14  ;;  %v1209_v55 = vsel %vm4334_vm10, 0, %v1208_v3  ;;  %v1471_v36 = vld [vmem:[#allocation2 + $0x20] sm:$0xff] }
 0x1ca   : > { %v868_v30 = vpop.permute.xlu0 %867  ;;  %1210 = vst [vmem:[#allocation2] sm:$0x1] %v1209_v55  ;;  %v1339_v3 = vld [vmem:[#allocation2 + $0x80] sm:$0xff] }
 0x1cb   : > { %1586 = vrot.lane.b32.xlu1 %v3863_v19, %s3375_s22  ;;  %v1398_v32 = vld [vmem:[#allocation2 + $0xc8] sm:$0x80]  ;;  %911 = vst.msk [vmem:[#allocation2 + $0x48] sm:$0xff] %vm908_vm11, %v868_v30  ;;  %v4360_v37 = vpop.permute.xlu1 %1570  ;;  %v1333_v19 = vld [vmem:[#allocation2 + $0x50] sm:$0xff] }
 0x1cc   : > { %v1468_v26 = vld [vmem:[#allocation2 + $0x8] sm:$0xff]  ;;  %v1399_v20 = vsel %vm4295_vm8, 0, %v1398_v32  ;;  %1130 = vrot.lane.b32.xlu0 %v4050_v9, %s3375_s22 }
 0x1cd   : > { %v1469_v11 = vsel %vm4347_vm13, %v4254_v28, %v1468_v26  ;;  %1400 = vst [vmem:[#allocation2 + $0xc8] sm:$0x80] %v1399_v20  ;;  %v1164_v58 = vld [vmem:[#allocation2 + $0x30] sm:$0xff] }
 0x1ce   : > { %1470 = vst [vmem:[#allocation2 + $0x8] sm:$0xff] %v1469_v11  ;;  %v1281_v24 = vpop.permute.xlu0 %1280 }
 0x1cf   : > { %891 = vrot.lane.b32.xlu1 %v4020_v10, %s3374_s20  ;;  %v1080_v62 = vld [vmem:[#allocation2 + $0xd8] sm:$0x80]  ;;  %v1334_v48 = vsel %vm4269_vm15, %v1281_v24, %v1333_v19 }
 0x1d0   : > { %v1161_v25 = vld [vmem:[#allocation2 + $0x18] sm:$0xff]  ;;  %v1081_v9 = vsel %vm4172_vm14, 0, %v1080_v62  ;;  %1335 = vst [vmem:[#allocation2 + $0x50] sm:$0xff] %v1334_v48  ;;  %981 = vrot.lane.b32.xlu0 %v4033_v16, %s3376_s23  ;;  %v1012_v43 = vld [vmem:[#allocation2 + $0x60] sm:$0xff] }
 0x1d1   : > { %v4373_v28 = vpop.permute.xlu1 %1568  ;;  %v1162_v61 = vsel %vm4303_vm1, %v4261_v34, %v1161_v25  ;;  %1082 = vst [vmem:[#allocation2 + $0xd8] sm:$0x80] %v1081_v9  ;;  %v1740_v6 = vld [vmem:[#allocation2] sm:$0xff] }
 0x1d2   : > { %1163 = vst [vmem:[#allocation2 + $0x18] sm:$0xff] %v1162_v61  ;;  %v962_v46 = vpop.permute.xlu0 %961  ;;  %v1009_v42 = vld [vmem:[#allocation2 + $0x48] sm:$0xff] }
 0x1d3   : > { %1446 = vrot.lane.b32.xlu1 %v4102_v47, %s3376_s23  ;;  %v1013_v16 = vsel %vm4286_vm5, %v962_v46, %v1012_v43 }
 0x1d4   : > { %1014 = vst [vmem:[#allocation2 + $0x60] sm:$0xff] %v1013_v16  ;;  %1302 = vrot.lane.b32.xlu0 %v4126_v27, %s3374_s20  ;;  %v1336_v16 = vld [vmem:[#allocation2 + $0x68] sm:$0xff] }
 0x1d5   : > { %v4389_v34 = vpop.permute.xlu1 %1426  ;;  %v1517_v31 = vld [vmem:[#allocation2 + $0x8] sm:$0x1] }
 0x1d6   : > { %v1518_v18 = vsel %vm4381_vm4, 0, %v1517_v31  ;;  %v4393_v23 = vpop.permute.xlu0 %1114 }
 0x1d7   : > { %1588 = vrot.lane.b32.xlu1 %v3952_v0, %s3375_s22  ;;  %1519 = vst [vmem:[#allocation2 + $0x8] sm:$0x1] %v1518_v18  ;;  %v1383_v45 = vld [vmem:[#allocation2 + $0x50] sm:$0x80] }
 0x1d8   : > { %1612 = vst.msk [vmem:[#allocation2 + $0x8] sm:$0xff] %vm1156_vm7, %v4250_v57  ;;  %v1384_v50 = vsel %vm4295_vm8, 0, %v1383_v45  ;;  %1132 = vrot.lane.b32.xlu0 %v4094_v59, %s3375_s22 }
 0x1d9   : > { %v1279_v56 = vpop.permute.xlu1 %1278  ;;  %v1211_v54 = vld [vmem:[#allocation2 + $0x18] sm:$0x1]  ;;  %1385 = vst [vmem:[#allocation2 + $0x50] sm:$0x80] %v1384_v50 }
 0x1da   : > { %v1331_v38 = vsel %vm4269_vm15, %v1279_v56, %v1330_v39  ;;  %v1212_v0 = vsel %vm4334_vm10, 0, %v1211_v54  ;;  %v960_v63 = vpop.permute.xlu0 %959 }
 0x1db   : > { %1332 = vst [vmem:[#allocation2 + $0x38] sm:$0xff] %v1331_v38  ;;  %1448 = vrot.lane.b32.xlu1 %v4122_v49, %s3376_s23  ;;  %1213 = vst [vmem:[#allocation2 + $0x18] sm:$0x1] %v1212_v0  ;;  %v1065_v57 = vld [vmem:[#allocation2 + $0x60] sm:$0x80]  ;;  %v1010_v59 = vsel %vm4286_vm5, %v960_v63, %v1009_v42 }
 0x1dc   : > { %v1066_v4 = vsel %vm4172_vm14, 0, %v1065_v57  ;;  %1011 = vst [vmem:[#allocation2 + $0x48] sm:$0xff] %v1010_v59  ;;  %983 = vrot.lane.b32.xlu0 %v4126_v27, %s3376_s23 }
 0x1dd   : > { %v1425_v2 = vpop.permute.xlu1 %1424  ;;  %1067 = vst [vmem:[#allocation2 + $0x60] sm:$0x80] %v1066_v4 }
 0x1de   : > { %v1472_v13 = vsel %vm4347_vm13, %v1425_v2, %v1471_v36  ;;  %v1113_v44 = vpop.permute.xlu0 %1112 }
 0x1df   : > { %1473 = vst [vmem:[#allocation2 + $0x20] sm:$0xff] %v1472_v13  ;;  %1590 = vrot.lane.b32.xlu1 %v3950_v1, %s3375_s22  ;;  %v1165_v52 = vsel %vm4303_vm1, %v1113_v44, %v1164_v58  ;;  %v1741_v8 = vld [vmem:[#allocation2 + $0x8] sm:$0xff] }
 0x1e0   : > { %1166 = vst [vmem:[#allocation2 + $0x30] sm:$0xff] %v1165_v52  ;;  %1134 = vrot.lane.b32.xlu0 %v4102_v47, %s3375_s22  ;;  %2019 = vmatprep.mubr.bf16.mxu1 %v1741_v8  ;;  %v1477_v42 = vld [vmem:[#allocation2 + $0x50] sm:$0xff] }
 0x1e1   : > { %v874_v27 = vpop.permute.xlu1 %873  ;;  %2020 = vmatmul.mubr.bf16.vlgmr.msra.gmra.mrb[16].mxu1 %v1740_v6 }
 0x1e2   : > { %v1380_v60 = vld [vmem:[#allocation2 + $0x38] sm:$0x80]  ;;  %914 = vst.msk [vmem:[#allocation2 + $0x90] sm:$0xff] %vm908_vm11, %v874_v27  ;;  %v1285_v1 = vpop.permute.xlu0 %1284 }
 0x1e3   : > { %v1381_v14 = vsel %vm4295_vm8, 0, %v1380_v60  ;;  %1450 = vrot.lane.b32.xlu1 %v4114_v7, %s3376_s23  ;;  %v1062_v55 = vld [vmem:[#allocation2 + $0x48] sm:$0x80]  ;;  %v1340_v47 = vsel %vm4269_vm15, %v1285_v1, %v1339_v3  ;;  %v1743_v50 = vld [vmem:[#allocation2 + $0x18] sm:$0xff]  ;;  %s3303_s23 = scalar_lea.vmem %s4949_s11, 4096 }
 0x1e4   : > { %1382 = vst [vmem:[#allocation2 + $0x38] sm:$0x80] %v1381_v14  ;;  %v1063_v30 = vsel %vm4172_vm14, 0, %v1062_v55  ;;  %1341 = vst [vmem:[#allocation2 + $0x80] sm:$0xff] %v1340_v47  ;;  %1304 = vrot.lane.b32.xlu0 %v4081_v53, %s3374_s20  ;;  %v1170_v2 = vld [vmem:[#allocation2 + $0x60] sm:$0xff]  ;;  %p3304_p6 = scmp.ne.s32.totalorder %s4949_s11, %s3303_s23 }
 0x1e5   : > { %v4434_v32 = vpop.permute.xlu1 %1574  ;;  %1064 = vst [vmem:[#allocation2 + $0x48] sm:$0x80] %v1063_v30 }
 0x1e6   : > { %v1520_v26 = vld [vmem:[#allocation2 + $0x20] sm:$0x1]  ;;  %v966_v11 = vpop.permute.xlu0 %965  ;;  %p3305_p12 = pnand %p3304_p6, %p5034_p11 }
 0x1e7   : > { %v1521_v20 = vsel %vm4381_vm4, 0, %v1520_v26  ;;  %1592 = vrot.lane.b32.xlu1 %v4020_v10, %s3375_s22  ;;  %v1214_v19 = vld [vmem:[#allocation2 + $0x30] sm:$0x1] }
 0x1e8   : > { %1522 = vst [vmem:[#allocation2 + $0x20] sm:$0x1] %v1521_v20  ;;  %v1215_v24 = vsel %vm4334_vm10, 0, %v1214_v19  ;;  %1136 = vrot.lane.b32.xlu0 %v4122_v49, %s3375_s22  ;;  %p3306_p13 = pneg %p3305_p12 }
 0x1e9   : > { %1613 = vst.msk [vmem:[#allocation2 + $0x20] sm:$0xff] %vm1156_vm7, %v4373_v28  ;;  %v1018_v53 = vld [vmem:[#allocation2 + $0x90] sm:$0xff]  ;;  %v872_v62 = vpop.permute.xlu1 %871  ;;  %1216 = vst [vmem:[#allocation2 + $0x30] sm:$0x1] %v1215_v24 }
 0x1ea   : > { %v1019_v48 = vsel %vm4286_vm5, %v966_v11, %v1018_v53  ;;  %913 = vst.msk [vmem:[#allocation2 + $0x78] sm:$0xff] %vm908_vm11, %v872_v62  ;;  %v4449_v25 = vpop.permute.xlu0 %1118 }
 0x1eb   : > { %v1474_v10 = vld [vmem:[#allocation2 + $0x38] sm:$0xff]  ;;  %1020 = vst [vmem:[#allocation2 + $0x90] sm:$0xff] %v1019_v48  ;;  %1594 = vrot.lane.b32.xlu1 %v4016_v33, %s3375_s22  ;;  %v1389_v28 = vld [vmem:[#allocation2 + $0x80] sm:$0x80] }
 0x1ec   : > { %v1475_v9 = vsel %vm4347_vm13, %v4389_v34, %v1474_v10  ;;  %v1167_v49 = vld [vmem:[#allocation2 + $0x48] sm:$0xff]  ;;  %v1390_v61 = vsel %vm4295_vm8, 0, %v1389_v28  ;;  %1138 = vrot.lane.b32.xlu0 %v4114_v7, %s3375_s22  ;;  %v1737_v33 = vld [vmem:[#allocation2 + $0x178] sm:$0x80]  ;;  %s4947_s22 = scalar_lea.hbm %s5003_s7, %s2850_s17 }
 0x1ed   : > { %1476 = vst [vmem:[#allocation2 + $0x38] sm:$0xff] %v1475_v9  ;;  %v4460_v46 = vpop.permute.xlu1 %1572  ;;  %v1168_v43 = vsel %vm4303_vm1, %v4393_v23, %v1167_v49  ;;  %1391 = vst [vmem:[#allocation2 + $0x80] sm:$0x80] %v1390_v61  ;;  %v1738_v31 = vsel %vm3709_vm9, 0, %v1737_v33 }
 0x1ee   : > { %1169 = vst [vmem:[#allocation2 + $0x48] sm:$0xff] %v1168_v43  ;;  %v1283_v34 = vpop.permute.xlu0 %1282  ;;  %1739 = vst [vmem:[#allocation2 + $0x178] sm:$0x80] %v1738_v31  ;;  %v1342_v43 = vld [vmem:[#allocation2 + $0x98] sm:$0xff] }
 0x1ef   : > { %v1337_v18 = vsel %vm4269_vm15, %v1283_v34, %v1336_v16 }
 0x1f0   : > { %v1744_v45 = vld [vmem:[#allocation2 + $0x20] sm:$0xff]  ;;  %1338 = vst [vmem:[#allocation2 + $0x68] sm:$0xff] %v1337_v18  ;;  %v1746_v26 = vld [vmem:[#allocation2 + $0x30] sm:$0xff] }
 0x1f1   : > { %2027 = vmatprep.mubr.bf16.mxu1 %v1744_v45  ;;  %v1431_v7 = vpop.permute.xlu1 %1430  ;;  %v1015_v54 = vld [vmem:[#allocation2 + $0x78] sm:$0xff] }
 0x1f2   : > { %v1071_v39 = vld [vmem:[#allocation2 + $0x90] sm:$0x80]  ;;  %2028 = vmatmul.mubr.bf16.gmra.mrb[20].mxu1 %v1743_v50  ;;  %v964_v56 = vpop.permute.xlu0 %963 }
 0x1f3   : > { %v1072_v23 = vsel %vm4172_vm14, 0, %v1071_v39  ;;  %v1016_v35 = vsel %vm4286_vm5, %v964_v56, %v1015_v54  ;;  %v1354_v39 = vld [vmem:[#allocation2 + $0xf8] sm:$0xff] }
 0x1f4   : > { %v1523_v38 = vld [vmem:[#allocation2 + $0x38] sm:$0x1]  ;;  %1073 = vst [vmem:[#allocation2 + $0x90] sm:$0x80] %v1072_v23  ;;  %1017 = vst [vmem:[#allocation2 + $0x78] sm:$0xff] %v1016_v35 }
 0x1f5   : > { %v1524_v0 = vsel %vm4381_vm4, 0, %v1523_v38  ;;  %v1429_v63 = vpop.permute.xlu1 %1428  ;;  %v1217_v57 = vld [vmem:[#allocation2 + $0x48] sm:$0x1]  ;;  %v1787_v13 = vld [vmem:[#allocation2 + $0x178] sm:$0xff]  ;;  %v1483_v38 = vld [vmem:[#allocation2 + $0x80] sm:$0xff] }
 0x1f6   : > { %1525 = vst [vmem:[#allocation2 + $0x38] sm:$0x1] %v1524_v0  ;;  %v1478_v59 = vsel %vm4347_vm13, %v1429_v63, %v1477_v42  ;;  %v1218_v4 = vsel %vm4334_vm10, 0, %v1217_v57  ;;  %v1117_v36 = vpop.permute.xlu0 %1116  ;;  %3104 = vmatmul.mubr.msk.bf16.gmra.mrb[44].mxu0 %vm747_vm0, %v1787_v13  ;;  %v1030_v13 = vld [vmem:[#allocation2 + $0xf0] sm:$0xff] }
 0x1f7   : > { %1614 = vst.msk [vmem:[#allocation2 + $0x38] sm:$0xff] %vm1156_vm7, %v4360_v37  ;;  %1479 = vst [vmem:[#allocation2 + $0x50] sm:$0xff] %v1478_v59  ;;  %v1386_v58 = vld [vmem:[#allocation2 + $0x68] sm:$0x80]  ;;  %v1171_v44 = vsel %vm4303_vm1, %v1117_v36, %v1170_v2  ;;  %v1345_v37 = vld [vmem:[#allocation2 + $0xb0] sm:$0xff] }
 0x1f8   : > { %1219 = vst [vmem:[#allocation2 + $0x48] sm:$0x1] %v1218_v4  ;;  %v1387_v52 = vsel %vm4295_vm8, 0, %v1386_v58  ;;  %1172 = vst [vmem:[#allocation2 + $0x60] sm:$0xff] %v1171_v44 }
 0x1f9   : > { %v878_v8 = vpop.permute.xlu1 %877  ;;  %1388 = vst [vmem:[#allocation2 + $0x68] sm:$0x80] %v1387_v52 }
 0x1fa   : > { %916 = vst.msk [vmem:[#allocation2 + $0xc0] sm:$0xff] %vm908_vm11, %v878_v8  ;;  %v1289_v27 = vpop.permute.xlu0 %1288 }
 0x1fb   : > { %v1068_v6 = vld [vmem:[#allocation2 + $0x78] sm:$0x80]  ;;  %v1346_v60 = vsel %vm4269_vm15, %v1289_v27, %v1345_v37  ;;  %v1492_v27 = vld [vmem:[#allocation2 + $0xc8] sm:$0xff] }
 0x1fc   : > { %v1069_v14 = vsel %vm4172_vm14, 0, %v1068_v6  ;;  %1347 = vst [vmem:[#allocation2 + $0xb0] sm:$0xff] %v1346_v60 }
 0x1fd   : > { %v4491_v3 = vpop.permute.xlu1 %1578  ;;  %1070 = vst [vmem:[#allocation2 + $0x78] sm:$0x80] %v1069_v14 }
 0x1fe   : > { %v1526_v1 = vld [vmem:[#allocation2 + $0x50] sm:$0x1]  ;;  %v1747_v55 = vld [vmem:[#allocation2 + $0x38] sm:$0xff]  ;;  %v970_v30 = vpop.permute.xlu0 %969 }
 0x1ff   : > { %v1527_v47 = vsel %vm4381_vm4, 0, %v1526_v1  ;;  %2035 = vmatprep.mubr.bf16.mxu1 %v1747_v55  ;;  %v1220_v20 = vld [vmem:[#allocation2 + $0x60] sm:$0x1]  ;;  %v1749_v18 = vld [vmem:[#allocation2 + $0x48] sm:$0xff] }
 0x200   : > { %1528 = vst [vmem:[#allocation2 + $0x50] sm:$0x1] %v1527_v47  ;;  %2036 = vmatmul.mubr.bf16.gmra.mrb[24].mxu1 %v1746_v26  ;;  %v1480_v11 = vld [vmem:[#allocation2 + $0x68] sm:$0xff]  ;;  %v1221_v19 = vsel %vm4334_vm10, 0, %v1220_v20 }
 0x201   : > { %1615 = vst.msk [vmem:[#allocation2 + $0x50] sm:$0xff] %vm1156_vm7, %v4460_v46  ;;  %v1024_v24 = vld [vmem:[#allocation2 + $0xc0] sm:$0xff]  ;;  %v876_v53 = vpop.permute.xlu1 %875  ;;  %v1481_v62 = vsel %vm4347_vm13, %v1431_v7, %v1480_v11  ;;  %1222 = vst [vmem:[#allocation2 + $0x60] sm:$0x1] %v1221_v19 }
 0x202   : > { %v1025_v48 = vsel %vm4286_vm5, %v970_v30, %v1024_v24  ;;  %915 = vst.msk [vmem:[#allocation2 + $0xa8] sm:$0xff] %vm908_vm11, %v876_v53  ;;  %1482 = vst [vmem:[#allocation2 + $0x68] sm:$0xff] %v1481_v62  ;;  %v4504_v10 = vpop.permute.xlu0 %1122 }
 0x203   : > { %1026 = vst [vmem:[#allocation2 + $0xc0] sm:$0xff] %v1025_v48  ;;  %v1395_v9 = vld [vmem:[#allocation2 + $0xb0] sm:$0x80] }
 0x204   : > { %v1173_v28 = vld [vmem:[#allocation2 + $0x78] sm:$0xff]  ;;  %v1396_v49 = vsel %vm4295_vm8, 0, %v1395_v9 }
 0x205   : > { %v4508_v61 = vpop.permute.xlu1 %1576  ;;  %v1174_v46 = vsel %vm4303_vm1, %v4449_v25, %v1173_v28  ;;  %1397 = vst [vmem:[#allocation2 + $0xb0] sm:$0x80] %v1396_v49  ;;  %v1176_v28 = vld [vmem:[#allocation2 + $0x90] sm:$0xff] }
 0x206   : > { %1175 = vst [vmem:[#allocation2 + $0x78] sm:$0xff] %v1174_v46  ;;  %v1287_v33 = vpop.permute.xlu0 %1286 }
 0x207   : > { %v1343_v16 = vsel %vm4269_vm15, %v1287_v33, %v1342_v43 }
 0x208   : > { %v1750_v34 = vld [vmem:[#allocation2 + $0x50] sm:$0xff]  ;;  %1344 = vst [vmem:[#allocation2 + $0x98] sm:$0xff] %v1343_v16  ;;  %v1752_v60 = vld [vmem:[#allocation2 + $0x60] sm:$0xff] }
 0x209   : > { %v4515_v31 = vpop.permute.xlu1 %1434  ;;  %2043 = vmatprep.mubr.bf16.mxu1 %v1750_v34  ;;  %v1529_v45 = vld [vmem:[#allocation2 + $0x68] sm:$0x1]  ;;  %v1357_v34 = vld [vmem:[#allocation2 + $0x110] sm:$0xff] }
 0x20a   : > { %v1077_v7 = vld [vmem:[#allocation2 + $0xc0] sm:$0x80]  ;;  %2044 = vmatmul.mubr.bf16.gmra.mrb[28].mxu1 %v1749_v18  ;;  %v1530_v50 = vsel %vm4381_vm4, 0, %v1529_v45  ;;  %v1295_v23 = vpop.permute.xlu0 %1294  ;;  %v1021_v4 = vld [vmem:[#allocation2 + $0xa8] sm:$0xff] }
 0x20b   : > { %v1078_v25 = vsel %vm4172_vm14, 0, %v1077_v7  ;;  %1531 = vst [vmem:[#allocation2 + $0x68] sm:$0x1] %v1530_v50  ;;  %v1355_v56 = vsel %vm4269_vm15, %v1295_v23, %v1354_v39  ;;  %v1495_v39 = vld [vmem:[#allocation2 + $0xe0] sm:$0xff] }
 0x20c   : > { %1079 = vst [vmem:[#allocation2 + $0xc0] sm:$0x80] %v1078_v25  ;;  %1616 = vst.msk [vmem:[#allocation2 + $0x68] sm:$0xff] %vm1156_vm7, %v4434_v32  ;;  %v1489_v54 = vld [vmem:[#allocation2 + $0xb0] sm:$0xff] }
 0x20d   : > { %1356 = vst [vmem:[#allocation2 + $0xf8] sm:$0xff] %v1355_v56  ;;  %v1433_v35 = vpop.permute.xlu1 %1432  ;;  %v1223_v0 = vld [vmem:[#allocation2 + $0x78] sm:$0x1]  ;;  %v1490_v42 = vsel %vm4347_vm13, %v4327_v51, %v1489_v54 }
 0x20e   : > { %v1484_v63 = vsel %vm4347_vm13, %v1433_v35, %v1483_v38  ;;  %v1224_v57 = vsel %vm4334_vm10, 0, %v1223_v0  ;;  %1491 = vst [vmem:[#allocation2 + $0xb0] sm:$0xff] %v1490_v42  ;;  %v968_v59 = vpop.permute.xlu0 %967 }
 0x20f   : > { %1485 = vst [vmem:[#allocation2 + $0x80] sm:$0xff] %v1484_v63  ;;  %1225 = vst [vmem:[#allocation2 + $0x78] sm:$0x1] %v1224_v57  ;;  %v1392_v32 = vld [vmem:[#allocation2 + $0x98] sm:$0x80]  ;;  %v1022_v36 = vsel %vm4286_vm5, %v968_v59, %v1021_v4 }
 0x210   : > { %v1393_v2 = vsel %vm4295_vm8, 0, %v1392_v32  ;;  %1023 = vst [vmem:[#allocation2 + $0xa8] sm:$0xff] %v1022_v36  ;;  %v1185_v32 = vld [vmem:[#allocation2 + $0xd8] sm:$0xff] }
 0x211   : > { %v884_v51 = vpop.permute.xlu1 %883  ;;  %1394 = vst [vmem:[#allocation2 + $0x98] sm:$0x80] %v1393_v2 }
 0x212   : > { %919 = vst.msk [vmem:[#allocation2 + $0x108] sm:$0xff] %vm908_vm11, %v884_v51  ;;  %v974_v58 = vpop.permute.xlu0 %973 }
 0x213   : > { %v1031_v52 = vsel %vm4286_vm5, %v974_v58, %v1030_v13  ;;  %v1753_v8 = vld [vmem:[#allocation2 + $0x68] sm:$0xff]  ;;  %v1182_v20 = vld [vmem:[#allocation2 + $0xc0] sm:$0xff] }
 0x214   : > { %v1404_v44 = vld [vmem:[#allocation2 + $0xf8] sm:$0x80]  ;;  %1032 = vst [vmem:[#allocation2 + $0xf0] sm:$0xff] %v1031_v52  ;;  %2051 = vmatprep.mubr.bf16.mxu1 %v1753_v8 }
 0x215   : > { %v1405_v37 = vsel %vm4295_vm8, 0, %v1404_v44  ;;  %v1439_v6 = vpop.permute.xlu1 %1438  ;;  %v1538_v14 = vld [vmem:[#allocation2 + $0xb0] sm:$0x1]  ;;  %2052 = vmatmul.mubr.bf16.gmra.mrb[32].mxu1 %v1752_v60 }
 0x216   : > { %1406 = vst [vmem:[#allocation2 + $0xf8] sm:$0x80] %v1405_v37  ;;  %v1532_v1 = vld [vmem:[#allocation2 + $0x80] sm:$0x1]  ;;  %v1493_v55 = vsel %vm4347_vm13, %v1439_v6, %v1492_v27  ;;  %v1539_v47 = vsel %vm4381_vm4, 0, %v1538_v14  ;;  %v1125_v26 = vpop.permute.xlu0 %1124  ;;  %v1755_v56 = vld [vmem:[#allocation2 + $0x78] sm:$0xff] }
 0x217   : > { %v1533_v30 = vsel %vm4381_vm4, 0, %v1532_v1  ;;  %1494 = vst [vmem:[#allocation2 + $0xc8] sm:$0xff] %v1493_v55  ;;  %1540 = vst [vmem:[#allocation2 + $0xb0] sm:$0x1] %v1539_v47  ;;  %v1074_v11 = vld [vmem:[#allocation2 + $0xa8] sm:$0x80]  ;;  %v1183_v19 = vsel %vm4303_vm1, %v1125_v26, %v1182_v20 }
 0x218   : > { %1534 = vst [vmem:[#allocation2 + $0x80] sm:$0x1] %v1533_v30  ;;  %v1486_v24 = vld [vmem:[#allocation2 + $0x98] sm:$0xff]  ;;  %v1075_v53 = vsel %vm4172_vm14, 0, %v1074_v11  ;;  %1184 = vst [vmem:[#allocation2 + $0xc0] sm:$0xff] %v1183_v19  ;;  %v1360_v37 = vld [vmem:[#allocation2 + $0x128] sm:$0xff] }
 0x219   : > { %1617 = vst.msk [vmem:[#allocation2 + $0x80] sm:$0xff] %vm1156_vm7, %v4508_v61  ;;  %v1581_v62 = vpop.permute.xlu1 %1580  ;;  %v1487_v48 = vsel %vm4347_vm13, %v4515_v31, %v1486_v24  ;;  %1076 = vst [vmem:[#allocation2 + $0xa8] sm:$0x80] %v1075_v53  ;;  %v1033_v63 = vld [vmem:[#allocation2 + $0x108] sm:$0xff] }
 0x21a   : > { %1619 = vst.msk [vmem:[#allocation2 + $0xb0] sm:$0xff] %vm1156_vm7, %v1581_v62  ;;  %1488 = vst [vmem:[#allocation2 + $0x98] sm:$0xff] %v1487_v48  ;;  %v1121_v9 = vpop.permute.xlu0 %1120 }
 0x21b   : > { %v1083_v49 = vld [vmem:[#allocation2 + $0xf0] sm:$0x80]  ;;  %v1177_v46 = vsel %vm4303_vm1, %v1121_v9, %v1176_v28 }
 0x21c   : > { %v1084_v61 = vsel %vm4172_vm14, 0, %v1083_v49  ;;  %1178 = vst [vmem:[#allocation2 + $0x90] sm:$0xff] %v1177_v46 }
 0x21d   : > { %v886_v43 = vpop.permute.xlu1 %885  ;;  %1085 = vst [vmem:[#allocation2 + $0xf0] sm:$0x80] %v1084_v61  ;;  %v1498_v30 = vld [vmem:[#allocation2 + $0xf8] sm:$0xff] }
 0x21e   : > { %v1541_v33 = vld [vmem:[#allocation2 + $0xc8] sm:$0x1]  ;;  %920 = vst.msk [vmem:[#allocation2 + $0x120] sm:$0xff] %vm908_vm11, %v886_v43  ;;  %v1297_v31 = vpop.permute.xlu0 %1296 }
 0x21f   : > { %v1542_v16 = vsel %vm4381_vm4, 0, %v1541_v33  ;;  %v1232_v18 = vld [vmem:[#allocation2 + $0xc0] sm:$0x1]  ;;  %v1358_v45 = vsel %vm4269_vm15, %v1297_v31, %v1357_v34 }
 0x220   : > { %1543 = vst [vmem:[#allocation2 + $0xc8] sm:$0x1] %v1542_v16  ;;  %v1756_v7 = vld [vmem:[#allocation2 + $0x80] sm:$0xff]  ;;  %v1179_v50 = vld [vmem:[#allocation2 + $0xa8] sm:$0xff]  ;;  %v1233_v25 = vsel %vm4334_vm10, 0, %v1232_v18  ;;  %1359 = vst [vmem:[#allocation2 + $0x110] sm:$0xff] %v1358_v45 }
 0x221   : > { %v1441_v23 = vpop.permute.xlu1 %1440  ;;  %2059 = vmatprep.mubr.bf16.mxu1 %v1756_v7  ;;  %v1535_v54 = vld [vmem:[#allocation2 + $0x98] sm:$0x1]  ;;  %v1180_v38 = vsel %vm4303_vm1, %v4504_v10, %v1179_v50  ;;  %1234 = vst [vmem:[#allocation2 + $0xc0] sm:$0x1] %v1233_v25  ;;  %v1762_v24 = vld [vmem:[#allocation2 + $0xb0] sm:$0xff] }
 0x222   : > { %v1496_v35 = vsel %vm4347_vm13, %v1441_v23, %v1495_v39  ;;  %2060 = vmatmul.mubr.bf16.gmra.mrb[36].mxu1 %v1755_v56  ;;  %v1536_v0 = vsel %vm4381_vm4, 0, %v1535_v54  ;;  %1181 = vst [vmem:[#allocation2 + $0xa8] sm:$0xff] %v1180_v38  ;;  %v976_v42 = vpop.permute.xlu0 %975  ;;  %v1363_v54 = vld [vmem:[#allocation2 + $0x140] sm:$0xff] }
 0x223   : > { %1497 = vst [vmem:[#allocation2 + $0xe0] sm:$0xff] %v1496_v35  ;;  %1537 = vst [vmem:[#allocation2 + $0x98] sm:$0x1] %v1536_v0  ;;  %v1226_v57 = vld [vmem:[#allocation2 + $0x90] sm:$0x1]  ;;  %v1034_v59 = vsel %vm4286_vm5, %v976_v42, %v1033_v63 }
 0x224   : > { %1618 = vst.msk [vmem:[#allocation2 + $0x98] sm:$0xff] %vm1156_vm7, %v4491_v3  ;;  %v1227_v10 = vsel %vm4334_vm10, 0, %v1226_v57  ;;  %1035 = vst [vmem:[#allocation2 + $0x108] sm:$0xff] %v1034_v59  ;;  %v1188_v61 = vld [vmem:[#allocation2 + $0xf0] sm:$0xff] }
 0x225   : > { %v1583_v4 = vpop.permute.xlu1 %1582  ;;  %1228 = vst [vmem:[#allocation2 + $0x90] sm:$0x1] %v1227_v10  ;;  %v1036_v48 = vld [vmem:[#allocation2 + $0x120] sm:$0xff] }
 0x226   : > { %1620 = vst.msk [vmem:[#allocation2 + $0xc8] sm:$0xff] %vm1156_vm7, %v1583_v4  ;;  %v1127_v36 = vpop.permute.xlu0 %1126 }
 0x227   : > { %v1407_v2 = vld [vmem:[#allocation2 + $0x110] sm:$0x80]  ;;  %v1186_v51 = vsel %vm4303_vm1, %v1127_v36, %v1185_v32 }
 0x228   : > { %v1408_v13 = vsel %vm4295_vm8, 0, %v1407_v2  ;;  %1187 = vst [vmem:[#allocation2 + $0xd8] sm:$0xff] %v1186_v51 }
 0x229   : > { %v888_v58 = vpop.permute.xlu1 %887  ;;  %v1229_v3 = vld [vmem:[#allocation2 + $0xa8] sm:$0x1]  ;;  %1409 = vst [vmem:[#allocation2 + $0x110] sm:$0x80] %v1408_v13 }
 0x22a   : > { %v1544_v44 = vld [vmem:[#allocation2 + $0xe0] sm:$0x1]  ;;  %921 = vst.msk [vmem:[#allocation2 + $0x138] sm:$0xff] %vm908_vm11, %v888_v58  ;;  %v1230_v52 = vsel %vm4334_vm10, 0, %v1229_v3  ;;  %v1299_v27 = vpop.permute.xlu0 %1298 }
 0x22b   : > { %v1545_v8 = vsel %vm4381_vm4, 0, %v1544_v44  ;;  %v4591_v6 = vpop.f32.mrb[16].mxu0  ;;  %1231 = vst [vmem:[#allocation2 + $0xa8] sm:$0x1] %v1230_v52  ;;  %v1086_v60 = vld [vmem:[#allocation2 + $0x108] sm:$0x80]  ;;  %v1361_v14 = vsel %vm4269_vm15, %v1299_v27, %v1360_v37 }
 0x22c   : > { %1546 = vst [vmem:[#allocation2 + $0xe0] sm:$0x1] %v1545_v8  ;;  %v1759_v1 = vld [vmem:[#allocation2 + $0x98] sm:$0xff]  ;;  %v4595_v55 = vpop.f32.mrb[17].mxu0  ;;  %v1087_v47 = vsel %vm4172_vm14, 0, %v1086_v60  ;;  %1362 = vst [vmem:[#allocation2 + $0x128] sm:$0xff] %v1361_v14 }
 0x22d   : > { %v1443_v26 = vpop.permute.xlu1 %1442  ;;  %2067 = vmatprep.mubr.bf16.mxu1 %v1759_v1  ;;  %v1758_v20 = vld [vmem:[#allocation2 + $0x90] sm:$0xff]  ;;  %v4599_v11 = vpop.f32.mrb[18].mxu0  ;;  %1088 = vst [vmem:[#allocation2 + $0x108] sm:$0x80] %v1087_v47  ;;  %v1765_v39 = vld [vmem:[#allocation2 + $0xc8] sm:$0xff]  ;;  %v1764_v3 = vld [vmem:[#allocation2 + $0xc0] sm:$0xff] }
 0x22e   : > { %v1499_v19 = vsel %vm4347_vm13, %v1443_v26, %v1498_v30  ;;  %2068 = vmatmul.mubr.bf16.gmra.mrb[40].mxu1 %v1758_v20  ;;  %v4603_v53 = vpop.f32.mrb[19].mxu0  ;;  %v978_v62 = vpop.permute.xlu0 %977 }
 0x22f   : > { %1500 = vst [vmem:[#allocation2 + $0xf8] sm:$0xff] %v1499_v19  ;;  %2075 = vmatprep.mubr.bf16.mxu1 %v1762_v24  ;;  %v1235_v9 = vld [vmem:[#allocation2 + $0xd8] sm:$0x1]  ;;  %v1037_v28 = vsel %vm4286_vm5, %v978_v62, %v1036_v48 }
 0x230   : > { %v1236_v49 = vsel %vm4334_vm10, 0, %v1235_v9  ;;  %1038 = vst [vmem:[#allocation2 + $0x120] sm:$0xff] %v1037_v28  ;;  %v1501_v63 = vld [vmem:[#allocation2 + $0x110] sm:$0xff] }
 0x231   : > { %v1585_v46 = vpop.permute.xlu1 %1584  ;;  %1237 = vst [vmem:[#allocation2 + $0xd8] sm:$0x1] %v1236_v49  ;;  %v1039_v4 = vld [vmem:[#allocation2 + $0x138] sm:$0xff] }
 0x232   : > { %1621 = vst.msk [vmem:[#allocation2 + $0xe0] sm:$0xff] %vm1156_vm7, %v1585_v46  ;;  %v1129_v43 = vpop.permute.xlu0 %1128  ;;  %v1761_v7 = vld [vmem:[#allocation2 + $0xa8] sm:$0xff] }
 0x233   : > { %v1410_v16 = vld [vmem:[#allocation2 + $0x128] sm:$0x80]  ;;  %v1189_v34 = vsel %vm4303_vm1, %v1129_v43, %v1188_v61 }
 0x234   : > { %v4610_v33 = vpop.f32.mrb[20].mxu0  ;;  %v1411_v18 = vsel %vm4295_vm8, 0, %v1410_v16  ;;  %1190 = vst [vmem:[#allocation2 + $0xf0] sm:$0xff] %v1189_v34  ;;  %v1191_v27 = vld [vmem:[#allocation2 + $0x108] sm:$0xff] }
 0x235   : > { %v4614_v31 = vpop.f32.mrb[21].mxu0  ;;  %v890_v45 = vpop.permute.xlu1 %889  ;;  %1412 = vst [vmem:[#allocation2 + $0x128] sm:$0x80] %v1411_v18 }
 0x236   : > { %v4618_v50 = vpop.f32.mrb[22].mxu0  ;;  %v1547_v25 = vld [vmem:[#allocation2 + $0xf8] sm:$0x1]  ;;  %922 = vst.msk [vmem:[#allocation2 + $0x150] sm:$0xff] %vm908_vm11, %v890_v45  ;;  %2076 = vmatmul.mubr.bf16.gmra.mrb[44].mxu1 %v1761_v7  ;;  %v1301_v38 = vpop.permute.xlu0 %1300 }
 0x237   : > { %v4621_v23 = vpop.f32.mrb[23].mxu0  ;;  %v1548_v56 = vsel %vm4381_vm4, 0, %v1547_v25  ;;  %2083 = vmatprep.mubr.bf16.mxu1 %v1765_v39  ;;  %v1089_v35 = vld [vmem:[#allocation2 + $0x120] sm:$0x80]  ;;  %v1364_v0 = vsel %vm4269_vm15, %v1301_v38, %v1363_v54  ;;  %v1366_v45 = vld [vmem:[#allocation2 + $0x158] sm:$0xff] }
 0x238   : > { %1549 = vst [vmem:[#allocation2 + $0xf8] sm:$0x1] %v1548_v56  ;;  %v1090_v42 = vsel %vm4172_vm14, 0, %v1089_v35  ;;  %1365 = vst [vmem:[#allocation2 + $0x140] sm:$0xff] %v1364_v0  ;;  %v1767_v43 = vld [vmem:[#allocation2 + $0xd8] sm:$0xff] }
 0x239   : > { %v1445_v57 = vpop.permute.xlu1 %1444  ;;  %1091 = vst [vmem:[#allocation2 + $0x120] sm:$0x80] %v1090_v42  ;;  %v1768_v52 = vld [vmem:[#allocation2 + $0xe0] sm:$0xff] }
 0x23a   : > { %v1502_v59 = vsel %vm4347_vm13, %v1445_v57, %v1501_v63  ;;  %v980_v10 = vpop.permute.xlu0 %979 }
 0x23b   : > { %1503 = vst [vmem:[#allocation2 + $0x110] sm:$0xff] %v1502_v59  ;;  %v1238_v36 = vld [vmem:[#allocation2 + $0xf0] sm:$0x1]  ;;  %v1040_v2 = vsel %vm4286_vm5, %v980_v10, %v1039_v4 }
 0x23c   : > { %v1239_v13 = vsel %vm4334_vm10, 0, %v1238_v36  ;;  %1041 = vst [vmem:[#allocation2 + $0x138] sm:$0xff] %v1040_v2  ;;  %v1504_v46 = vld [vmem:[#allocation2 + $0x128] sm:$0xff] }
 0x23d   : > { %v4631_v32 = vpop.f32.mrb[24].mxu0  ;;  %v1587_v58 = vpop.permute.xlu1 %1586  ;;  %1240 = vst [vmem:[#allocation2 + $0xf0] sm:$0x1] %v1239_v13  ;;  %v1042_v24 = vld [vmem:[#allocation2 + $0x150] sm:$0xff] }
 0x23e   : > { %v4635_v51 = vpop.f32.mrb[25].mxu0  ;;  %1622 = vst.msk [vmem:[#allocation2 + $0xf8] sm:$0xff] %vm1156_vm7, %v1587_v58  ;;  %2084 = vmatmul.mubr.bf16.gmra.mrb[48].mxu1 %v1764_v3  ;;  %v1131_v37 = vpop.permute.xlu0 %1130 }
 0x23f   : > { %v4639_v44 = vpop.f32.mrb[26].mxu0  ;;  %2091 = vmatprep.mubr.bf16.mxu1 %v1768_v52  ;;  %v1413_v60 = vld [vmem:[#allocation2 + $0x140] sm:$0x80]  ;;  %v1192_v14 = vsel %vm4303_vm1, %v1131_v37, %v1191_v27 }
 0x240   : > { %v4642_v8 = vpop.f32.mrb[27].mxu0  ;;  %v1414_v1 = vsel %vm4295_vm8, 0, %v1413_v60  ;;  %1193 = vst [vmem:[#allocation2 + $0x108] sm:$0xff] %v1192_v14  ;;  %v1194_v35 = vld [vmem:[#allocation2 + $0x120] sm:$0xff] }
 0x241   : > { %v892_v47 = vpop.permute.xlu1 %891  ;;  %1415 = vst [vmem:[#allocation2 + $0x140] sm:$0x80] %v1414_v1 }
 0x242   : > { %v1550_v30 = vld [vmem:[#allocation2 + $0x110] sm:$0x1]  ;;  %923 = vst.msk [vmem:[#allocation2 + $0x168] sm:$0xff] %vm908_vm11, %v892_v47  ;;  %v982_v19 = vpop.permute.xlu0 %981 }
 0x243   : > { %v1551_v26 = vsel %vm4381_vm4, 0, %v1550_v30  ;;  %v1092_v62 = vld [vmem:[#allocation2 + $0x138] sm:$0x80]  ;;  %v1043_v48 = vsel %vm4286_vm5, %v982_v19, %v1042_v24  ;;  %v3240_v19 = vld [vmem:[%s5001_s5 + $0x8] sm:$0xff]  }
 0x244   : > { %1552 = vst [vmem:[#allocation2 + $0x110] sm:$0x1] %v1551_v26  ;;  %v1093_v28 = vsel %vm4172_vm14, 0, %v1092_v62  ;;  %1044 = vst [vmem:[#allocation2 + $0x150] sm:$0xff] %v1043_v48  ;;  %v1770_v36 = vld [vmem:[#allocation2 + $0xf0] sm:$0xff]  ;;  %v3239_v26 = vld [vmem:[%s5001_s5] sm:$0xff]  }
 0x245   : > { %v4651_v20 = vpop.f32.mrb[28].mxu0  ;;  %v1447_v61 = vpop.permute.xlu1 %1446  ;;  %v1771_v16 = vld [vmem:[#allocation2 + $0xf8] sm:$0xff]  ;;  %1094 = vst [vmem:[#allocation2 + $0x138] sm:$0x80] %v1093_v28  ;;  %3107 = vmatprep.subr.bf16.mxu0 %v3239_v26 }
 0x246   : > { %v4655_v9 = vpop.f32.mrb[29].mxu0  ;;  %v1505_v34 = vsel %vm4347_vm13, %v1447_v61, %v1504_v46  ;;  %2092 = vmatmul.mubr.bf16.gmra.mrb[52].mxu1 %v1767_v43  ;;  %v1303_v7 = vpop.permute.xlu0 %1302  ;;  %3108 = vmatpush3.bf16.msra.mxu0 %v3239_v26 }
 0x247   : > { %v4659_v49 = vpop.f32.mrb[30].mxu0  ;;  %1506 = vst [vmem:[#allocation2 + $0x128] sm:$0xff] %v1505_v34  ;;  %2099 = vmatprep.mubr.bf16.mxu1 %v1771_v16  ;;  %v1241_v25 = vld [vmem:[#allocation2 + $0x108] sm:$0x1]  ;;  %v1367_v39 = vsel %vm4269_vm15, %v1303_v7, %v1366_v45  ;;  %3109 = vmatprep.subr.bf16.mxu0 %v3240_v19 }
 0x248   : > { %v4663_v18 = vpop.f32.mrb[31].mxu0  ;;  %v1242_v56 = vsel %vm4334_vm10, 0, %v1241_v25  ;;  %1368 = vst [vmem:[#allocation2 + $0x158] sm:$0xff] %v1367_v39  ;;  %v1507_v10 = vld [vmem:[#allocation2 + $0x140] sm:$0xff]  ;;  %v1369_v39 = vld [vmem:[#allocation2 + $0x170] sm:$0xff] }
 0x249   : > { %v1589_v54 = vpop.permute.xlu1 %1588  ;;  %1243 = vst [vmem:[#allocation2 + $0x108] sm:$0x1] %v1242_v56  ;;  %v1045_v27 = vld [vmem:[#allocation2 + $0x168] sm:$0xff] }
 0x24a   : > { %1623 = vst.msk [vmem:[#allocation2 + $0x110] sm:$0xff] %vm1156_vm7, %v1589_v54  ;;  %v1133_v38 = vpop.permute.xlu0 %1132  ;;  %3110 = vmatpush3.bf16.msra.mxu0 %v3240_v19 }
 0x24b   : > { %v1095_v42 = vld [vmem:[#allocation2 + $0x150] sm:$0x80]  ;;  %v1195_v63 = vsel %vm4303_vm1, %v1133_v38, %v1194_v35 }
 0x24c   : > { %v1096_v59 = vsel %vm4172_vm14, 0, %v1095_v42  ;;  %1196 = vst [vmem:[#allocation2 + $0x120] sm:$0xff] %v1195_v63  ;;  %v1197_v24 = vld [vmem:[#allocation2 + $0x138] sm:$0xff] }
 0x24d   : > { %v4670_v0 = vpop.f32.mrb[32].mxu0  ;;  %v1449_v4 = vpop.permute.xlu1 %1448  ;;  %1097 = vst [vmem:[#allocation2 + $0x150] sm:$0x80] %v1096_v59 }
 0x24e   : > { %v4674_v57 = vpop.f32.mrb[33].mxu0  ;;  %v1553_v13 = vld [vmem:[#allocation2 + $0x128] sm:$0x1]  ;;  %v1508_v58 = vsel %vm4347_vm13, %v1449_v4, %v1507_v10  ;;  %2100 = vmatmul.mubr.bf16.gmra.mrb[56].mxu1 %v1770_v36  ;;  %v984_v37 = vpop.permute.xlu0 %983 }
 0x24f   : > { %v4678_v2 = vpop.f32.mrb[34].mxu0  ;;  %v1554_v52 = vsel %vm4381_vm4, 0, %v1553_v13  ;;  %1509 = vst [vmem:[#allocation2 + $0x140] sm:$0xff] %v1508_v58  ;;  %v1416_v60 = vld [vmem:[#allocation2 + $0x158] sm:$0x80]  ;;  %v1046_v14 = vsel %vm4286_vm5, %v984_v37, %v1045_v27 }
 0x250   : > { %v4682_v3 = vpop.f32.mrb[35].mxu0  ;;  %1555 = vst [vmem:[#allocation2 + $0x128] sm:$0x1] %v1554_v52  ;;  %v1417_v1 = vsel %vm4295_vm8, 0, %v1416_v60  ;;  %1047 = vst [vmem:[#allocation2 + $0x168] sm:$0xff] %v1046_v14  ;;  %v1773_v16 = vld [vmem:[#allocation2 + $0x108] sm:$0xff] }
 0x251   : > { %v1591_v47 = vpop.permute.xlu1 %1590  ;;  %v1774_v30 = vld [vmem:[#allocation2 + $0x110] sm:$0xff]  ;;  %1418 = vst [vmem:[#allocation2 + $0x158] sm:$0x80] %v1417_v1 }
 0x252   : > { %1624 = vst.msk [vmem:[#allocation2 + $0x128] sm:$0xff] %vm1156_vm7, %v1591_v47  ;;  %2107 = vmatprep.mubr.bf16.mxu1 %v1774_v30  ;;  %v1135_v15 = vpop.permute.xlu0 %1134 }
 0x253   : > { %v1244_v48 = vld [vmem:[#allocation2 + $0x120] sm:$0x1]  ;;  %v1198_v28 = vsel %vm4303_vm1, %v1135_v15, %v1197_v24 }
 0x254   : > { %v1245_v61 = vsel %vm4334_vm10, 0, %v1244_v48  ;;  %1199 = vst [vmem:[#allocation2 + $0x138] sm:$0xff] %v1198_v28  ;;  %v1200_v36 = vld [vmem:[#allocation2 + $0x150] sm:$0xff] }
 0x255   : > { %v4697_v62 = vpop.f32.mrb[36].mxu0  ;;  %v1451_v43 = vpop.permute.xlu1 %1450  ;;  %1246 = vst [vmem:[#allocation2 + $0x120] sm:$0x1] %v1245_v61 }
 0x256   : > { %v4701_v46 = vpop.f32.mrb[37].mxu0  ;;  %v1556_v45 = vld [vmem:[#allocation2 + $0x140] sm:$0x1]  ;;  %2108 = vmatmul.mubr.bf16.gmra.mrb[60].mxu1 %v1773_v16  ;;  %v1305_v56 = vpop.permute.xlu0 %1304 }
 0x257   : > { %v4705_v34 = vpop.f32.mrb[38].mxu0  ;;  %v1557_v25 = vsel %vm4381_vm4, 0, %v1556_v45  ;;  %v1098_v54 = vld [vmem:[#allocation2 + $0x168] sm:$0x80]  ;;  %v1370_v38 = vsel %vm4269_vm15, %v1305_v56, %v1369_v39 }
 0x258   : > { %v4707_v7 = vpop.f32.mrb[39].mxu0  ;;  %1558 = vst [vmem:[#allocation2 + $0x140] sm:$0x1] %v1557_v25  ;;  %v1099_v35 = vsel %vm4172_vm14, 0, %v1098_v54  ;;  %v1510_v42 = vld [vmem:[#allocation2 + $0x158] sm:$0xff]  ;;  %1371 = vst [vmem:[#allocation2 + $0x170] sm:$0xff] %v1370_v38 }
 0x259   : > { %v1593_v63 = vpop.permute.xlu1 %1592  ;;  %v1777_v59 = vld [vmem:[#allocation2 + $0x128] sm:$0xff]  ;;  %1100 = vst [vmem:[#allocation2 + $0x168] sm:$0x80] %v1099_v35  ;;  %v1511_v10 = vsel %vm4347_vm13, %v1451_v43, %v1510_v42 }
 0x25a   : > { %1625 = vst.msk [vmem:[#allocation2 + $0x140] sm:$0xff] %vm1156_vm7, %v1593_v63  ;;  %2115 = vmatprep.mubr.bf16.mxu1 %v1777_v59  ;;  %1512 = vst [vmem:[#allocation2 + $0x158] sm:$0xff] %v1511_v10  ;;  %v1137_v4 = vpop.permute.xlu0 %1136 }
 0x25b   : > { %v1247_v13 = vld [vmem:[#allocation2 + $0x138] sm:$0x1]  ;;  %v1201_v21 = vsel %vm4303_vm1, %v1137_v4, %v1200_v36 }
 0x25c   : > { %v1248_v52 = vsel %vm4334_vm10, 0, %v1247_v13  ;;  %1202 = vst [vmem:[#allocation2 + $0x150] sm:$0xff] %v1201_v21  ;;  %v1776_v22 = vld [vmem:[#allocation2 + $0x120] sm:$0xff] }
 0x25d   : > { %v4718_v17 = vpop.f32.mrb[40].mxu0  ;;  %1249 = vst [vmem:[#allocation2 + $0x138] sm:$0x1] %v1248_v52  ;;  %v1595_v12 = vpop.permute.xlu1 %1594 }
 0x25e   : > { %v4722_v58 = vpop.f32.mrb[41].mxu0  ;;  %2116 = vmatmul.mubr.bf16.gmra.mrb[64].mxu1 %v1776_v22  ;;  %v1139_v1 = vpop.permute.xlu0 %1138 }
 0x25f   : > { %v4726_v37 = vpop.f32.mrb[42].mxu0  ;;  %v1419_v60 = vld [vmem:[#allocation2 + $0x170] sm:$0x80] }
 0x260   : > { %v4728_v27 = vpop.f32.mrb[43].mxu0  ;;  %v1420_v14 = vsel %vm4295_vm8, 0, %v1419_v60  ;;  %v1203_v47 = vld [vmem:[#allocation2 + $0x168] sm:$0xff] }
 0x261   : > { %v1780_v30 = vld [vmem:[#allocation2 + $0x140] sm:$0xff]  ;;  %v1559_v26 = vld [vmem:[#allocation2 + $0x158] sm:$0x1]  ;;  %1421 = vst [vmem:[#allocation2 + $0x170] sm:$0x80] %v1420_v14  ;;  %v1204_v19 = vsel %vm4303_vm1, %v1139_v1, %v1203_v47 }
 0x262   : > { %2123 = vmatprep.mubr.bf16.mxu1 %v1780_v30  ;;  %v1560_v15 = vsel %vm4381_vm4, 0, %v1559_v26  ;;  %1514 = vst.msk [vmem:[#allocation2 + $0x170] sm:$0xff] %vm1000_vm12, %v3377_v29  ;;  %1205 = vst [vmem:[#allocation2 + $0x168] sm:$0xff] %v1204_v19 }
 0x263   : > { %1561 = vst [vmem:[#allocation2 + $0x158] sm:$0x1] %v1560_v15  ;;  %v1250_v24 = vld [vmem:[#allocation2 + $0x150] sm:$0x1] }
 0x264   : > { %v1251_v48 = vsel %vm4334_vm10, 0, %v1250_v24  ;;  %1626 = vst.msk [vmem:[#allocation2 + $0x158] sm:$0xff] %vm1156_vm7, %v1595_v12  ;;  %v1779_v28 = vld [vmem:[#allocation2 + $0x138] sm:$0xff] }
 0x265   : > { %1252 = vst [vmem:[#allocation2 + $0x150] sm:$0x1] %v1251_v48 }
 0x266   : > { %2124 = vmatmul.mubr.bf16.gmra.mrb[68].mxu1 %v1779_v28 }
 0x269   : > { %v1562_v40 = vld [vmem:[#allocation2 + $0x170] sm:$0x1]  ;;  %v1253_v61 = vld [vmem:[#allocation2 + $0x168] sm:$0x1] }
 0x26a   : > { %v1563_v43 = vsel %vm4381_vm4, 0, %v1562_v40  ;;  %v1254_v16 = vsel %vm4334_vm10, 0, %v1253_v61 }
 0x26b   : > { %1564 = vst [vmem:[#allocation2 + $0x170] sm:$0x1] %v1563_v43  ;;  %1255 = vst [vmem:[#allocation2 + $0x168] sm:$0x1] %v1254_v16  ;;  %v1783_v45 = vld [vmem:[#allocation2 + $0x158] sm:$0xff] }
 0x26c   : > { %1627 = vst.msk [vmem:[#allocation2 + $0x170] sm:$0xff] %vm1156_vm7, %v3377_v29  ;;  %2131 = vmatprep.mubr.bf16.mxu1 %v1783_v45  ;;  %v1782_v25 = vld [vmem:[#allocation2 + $0x150] sm:$0xff] }
 0x26e   : > { %2132 = vmatmul.mubr.bf16.gmra.mrb[72].mxu1 %v1782_v25 }
 0x272   : > { %v1785_v56 = vld [vmem:[#allocation2 + $0x168] sm:$0xff] }
 0x273   : > { %v1786_v39 = vld [vmem:[#allocation2 + $0x170] sm:$0xff] }
 0x274   : > { %2139 = vmatprep.mubr.bf16.mxu1 %v1786_v39 }
 0x276   : > { %2140 = vmatmul.mubr.bf16.gmra.mrb[76].mxu1 %v1785_v56 }
 0x2b4   : > { %v2891_v54 = vpop.f32.mrb[16].mxu1 }
 0x2b5   : > { %v2892_v5 = vpop.f32.mrb[17].mxu1 }
 0x2b6   : > { %v2893_v38 = vadd.f32 %v2892_v5, %v2891_v54  ;;  %v2894_v35 = vpop.f32.mrb[18].mxu1 }
 0x2b7   : > { %v2895_v42 = vpop.f32.mrb[19].mxu1 }
 0x2b8   : > { %v2022_v63 = vadd.f32 %v2893_v38, %v4750_v41  ;;  %v2896_v29 = vadd.f32 %v2895_v42, %v2894_v35 }
 0x2ba   : > { %v2183_v59 = vadd.f32 %v4595_v55, %v2022_v63  ;;  %v2025_v10 = vadd.f32 %v2896_v29, %v4750_v41 }
 0x2bc   : > { %v2186_v4 = vadd.f32 %v4603_v53, %v2025_v10  ;;  %v2309_v36 = vmax.f32 %v2183_v59, 0.0 }
 0x2be   : > { %v2310_v13 = vmax.f32 %v2186_v4, 0.0 }
 0x2c0   : > { %v2341_v21 = vpack.c.bf16 %v2310_v13, %v2309_v36 }
 0x2c2   : > { %3111 = vmatprep.mubr.msk.bf16.mxu0 %vm747_vm0, %v2341_v21 }
 0x2c5   : > { %v2897_v52 = vpop.f32.mrb[20].mxu1 }
 0x2c6   : > { %v2898_v22 = vpop.f32.mrb[21].mxu1 }
 0x2c7   : > { %v2899_v60 = vadd.f32 %v2898_v22, %v2897_v52  ;;  %v2900_v14 = vpop.f32.mrb[22].mxu1 }
 0x2c8   : > { %v2901_v1 = vpop.f32.mrb[23].mxu1 }
 0x2c9   : > { %v2030_v47 = vadd.f32 %v2899_v60, %v4750_v41  ;;  %v2902_v30 = vadd.f32 %v2901_v1, %v2900_v14  ;;  %v4760_v19 = vpop.f32.mrb[44].mxu0 }
 0x2ca   : > { %v4762_v53 = vpop.f32.mrb[45].mxu0 }
 0x2cb   : > { %v2191_v26 = vadd.f32 %v4591_v6, %v2030_v47  ;;  %v2033_v55 = vadd.f32 %v2902_v30, %v4750_v41  ;;  %v4765_v24 = vpop.f32.mrb[46].mxu0 }
 0x2cc   : > { %v4767_v12 = vpop.f32.mrb[47].mxu0 }
 0x2cd   : > { %v2194_v15 = vadd.f32 %v4599_v11, %v2033_v55  ;;  %v2311_v48 = vmax.f32 %v2191_v26, 0.0 }
 0x2cf   : > { %v2312_v28 = vmax.f32 %v2194_v15, 0.0 }
 0x2d1   : > { %v2342_v40 = vpack.c.bf16 %v2312_v28, %v2311_v48 }
 0x2d3   : > { %v2903_v61 = vpop.f32.mrb[24].mxu1  ;;  %3112 = vmatmul.mubr.msk.bf16.vlgmr.msra.gmra.mrb[48].mxu0 %vm747_vm0, %v2342_v40 }
 0x2d4   : > { %v2904_v43 = vpop.f32.mrb[25].mxu1 }
 0x2d5   : > { %v2905_v6 = vadd.f32 %v2904_v43, %v2903_v61  ;;  %v2906_v16 = vpop.f32.mrb[26].mxu1 }
 0x2d6   : > { %v2907_v45 = vpop.f32.mrb[27].mxu1 }
 0x2d7   : > { %v2038_v25 = vadd.f32 %v2905_v6, %v4750_v41  ;;  %v2908_v39 = vadd.f32 %v2907_v45, %v2906_v16 }
 0x2d9   : > { %v2199_v56 = vadd.f32 %v4614_v31, %v2038_v25  ;;  %v2041_v11 = vadd.f32 %v2908_v39, %v4750_v41 }
 0x2db   : > { %v2202_v54 = vadd.f32 %v4621_v23, %v2041_v11  ;;  %v2313_v5 = vmax.f32 %v2199_v56, 0.0 }
 0x2dd   : > { %v2314_v38 = vmax.f32 %v2202_v54, 0.0  ;;  %v2909_v35 = vpop.f32.mrb[28].mxu1 }
 0x2de   : > { %v2910_v42 = vpop.f32.mrb[29].mxu1 }
 0x2df   : > { %v2343_v63 = vpack.c.bf16 %v2314_v38, %v2313_v5  ;;  %v2911_v29 = vadd.f32 %v2910_v42, %v2909_v35  ;;  %v2912_v59 = vpop.f32.mrb[30].mxu1 }
 0x2e0   : > { %v2913_v10 = vpop.f32.mrb[31].mxu1 }
 0x2e1   : > { %v2046_v4 = vadd.f32 %v2911_v29, %v4750_v41  ;;  %v2914_v36 = vadd.f32 %v2913_v10, %v2912_v59  ;;  %3115 = vmatprep.mubr.msk.bf16.mxu0 %vm747_vm0, %v2343_v63 }
 0x2e3   : > { %v2207_v13 = vadd.f32 %v4610_v33, %v2046_v4  ;;  %v2049_v31 = vadd.f32 %v2914_v36, %v4750_v41 }
 0x2e5   : > { %v2210_v21 = vadd.f32 %v4618_v50, %v2049_v31  ;;  %v2315_v23 = vmax.f32 %v2207_v13, 0.0 }
 0x2e7   : > { %v2316_v52 = vmax.f32 %v2210_v21, 0.0 }
 0x2e8   : > { %v2915_v60 = vpop.f32.mrb[32].mxu1 }
 0x2e9   : > { %v2344_v22 = vpack.c.bf16 %v2316_v52, %v2315_v23  ;;  %v2916_v14 = vpop.f32.mrb[33].mxu1 }
 0x2ea   : > { %v2917_v1 = vadd.f32 %v2916_v14, %v2915_v60  ;;  %v2918_v47 = vpop.f32.mrb[34].mxu1 }
 0x2eb   : > { %3116 = vmatmul.mubr.msk.bf16.gmra.mrb[52].mxu0 %vm747_vm0, %v2344_v22  ;;  %v2919_v30 = vpop.f32.mrb[35].mxu1 }
 0x2ec   : > { %v2054_v26 = vadd.f32 %v2917_v1, %v4750_v41  ;;  %v2920_v55 = vadd.f32 %v2919_v30, %v2918_v47 }
 0x2ee   : > { %v2215_v15 = vadd.f32 %v4635_v51, %v2054_v26  ;;  %v2057_v33 = vadd.f32 %v2920_v55, %v4750_v41 }
 0x2f0   : > { %v2218_v48 = vadd.f32 %v4642_v8, %v2057_v33  ;;  %v2317_v50 = vmax.f32 %v2215_v15, 0.0 }
 0x2f2   : > { %v2318_v28 = vmax.f32 %v2218_v48, 0.0 }
 0x2f4   : > { %v2345_v40 = vpack.c.bf16 %v2318_v28, %v2317_v50 }
 0x2f5   : > { %v2921_v61 = vpop.f32.mrb[36].mxu1 }
 0x2f6   : > { %v2922_v43 = vpop.f32.mrb[37].mxu1  ;;  %3119 = vmatprep.mubr.msk.bf16.mxu0 %vm747_vm0, %v2345_v40 }
 0x2f7   : > { %v2923_v6 = vadd.f32 %v2922_v43, %v2921_v61  ;;  %v2924_v16 = vpop.f32.mrb[38].mxu1 }
 0x2f8   : > { %v2925_v45 = vpop.f32.mrb[39].mxu1 }
 0x2f9   : > { %v2062_v25 = vadd.f32 %v2923_v6, %v4750_v41  ;;  %v2926_v39 = vadd.f32 %v2925_v45, %v2924_v16 }
 0x2fb   : > { %v2223_v56 = vadd.f32 %v4631_v32, %v2062_v25  ;;  %v2065_v51 = vadd.f32 %v2926_v39, %v4750_v41 }
 0x2fd   : > { %v2226_v11 = vadd.f32 %v4639_v44, %v2065_v51  ;;  %v2319_v8 = vmax.f32 %v2223_v56, 0.0 }
 0x2ff   : > { %v2320_v54 = vmax.f32 %v2226_v11, 0.0 }
 0x301   : > { %v2346_v5 = vpack.c.bf16 %v2320_v54, %v2319_v8  ;;  %v2927_v38 = vpop.f32.mrb[40].mxu1 }
 0x302   : > { %v2928_v35 = vpop.f32.mrb[41].mxu1 }
 0x303   : > { %v2929_v42 = vadd.f32 %v2928_v35, %v2927_v38  ;;  %v2930_v63 = vpop.f32.mrb[42].mxu1  ;;  %3120 = vmatmul.mubr.msk.bf16.gmra.mrb[56].mxu0 %vm747_vm0, %v2346_v5 }
 0x304   : > { %v2931_v29 = vpop.f32.mrb[43].mxu1 }
 0x305   : > { %v2070_v59 = vadd.f32 %v2929_v42, %v4750_v41  ;;  %v2932_v10 = vadd.f32 %v2931_v29, %v2930_v63 }
 0x307   : > { %v2231_v4 = vadd.f32 %v4655_v9, %v2070_v59  ;;  %v2073_v32 = vadd.f32 %v2932_v10, %v4750_v41 }
 0x309   : > { %v2234_v36 = vadd.f32 %v4663_v18, %v2073_v32  ;;  %v2933_v44 = vpop.f32.mrb[44].mxu1  ;;  %v2321_v31 = vmax.f32 %v2231_v4, 0.0 }
 0x30a   : > { %v2934_v13 = vpop.f32.mrb[45].mxu1 }
 0x30b   : > { %v2322_v21 = vmax.f32 %v2234_v36, 0.0  ;;  %v2935_v23 = vadd.f32 %v2934_v13, %v2933_v44  ;;  %v2936_v52 = vpop.f32.mrb[46].mxu1 }
 0x30c   : > { %v2937_v22 = vpop.f32.mrb[47].mxu1 }
 0x30d   : > { %v2347_v60 = vpack.c.bf16 %v2322_v21, %v2321_v31  ;;  %v2078_v14 = vadd.f32 %v2935_v23, %v4750_v41  ;;  %v2938_v1 = vadd.f32 %v2937_v22, %v2936_v52 }
 0x30f   : > { %v2239_v47 = vadd.f32 %v4651_v20, %v2078_v14  ;;  %v2081_v30 = vadd.f32 %v2938_v1, %v4750_v41  ;;  %3123 = vmatprep.mubr.msk.bf16.mxu0 %vm747_vm0, %v2347_v60 }
 0x311   : > { %v2242_v9 = vadd.f32 %v4659_v49, %v2081_v30  ;;  %v2939_v18 = vpop.f32.mrb[48].mxu1  ;;  %v2323_v55 = vmax.f32 %v2239_v47, 0.0 }
 0x312   : > { %v2940_v26 = vpop.f32.mrb[49].mxu1 }
 0x313   : > { %v2324_v15 = vmax.f32 %v2242_v9, 0.0  ;;  %v2941_v33 = vadd.f32 %v2940_v26, %v2939_v18  ;;  %v2942_v48 = vpop.f32.mrb[50].mxu1 }
 0x314   : > { %v2943_v50 = vpop.f32.mrb[51].mxu1 }
 0x315   : > { %v2348_v28 = vpack.c.bf16 %v2324_v15, %v2323_v55  ;;  %v2086_v40 = vadd.f32 %v2941_v33, %v4750_v41  ;;  %v2944_v61 = vadd.f32 %v2943_v50, %v2942_v48 }
 0x317   : > { %v2247_v43 = vadd.f32 %v4674_v57, %v2086_v40  ;;  %v2089_v20 = vadd.f32 %v2944_v61, %v4750_v41  ;;  %3124 = vmatmul.mubr.msk.bf16.gmra.mrb[60].mxu0 %vm747_vm0, %v2348_v28 }
 0x319   : > { %v2250_v6 = vadd.f32 %v4682_v3, %v2089_v20  ;;  %v2945_v49 = vpop.f32.mrb[52].mxu1  ;;  %v2325_v45 = vmax.f32 %v2247_v43, 0.0 }
 0x31a   : > { %v2946_v16 = vpop.f32.mrb[53].mxu1 }
 0x31b   : > { %v2326_v25 = vmax.f32 %v2250_v6, 0.0  ;;  %v2947_v39 = vadd.f32 %v2946_v16, %v2945_v49  ;;  %v2948_v56 = vpop.f32.mrb[54].mxu1 }
 0x31c   : > { %v2949_v51 = vpop.f32.mrb[55].mxu1 }
 0x31d   : > { %v2349_v11 = vpack.c.bf16 %v2326_v25, %v2325_v45  ;;  %v2094_v8 = vadd.f32 %v2947_v39, %v4750_v41  ;;  %v2950_v54 = vadd.f32 %v2949_v51, %v2948_v56 }
 0x31f   : > { %v2255_v5 = vadd.f32 %v4670_v0, %v2094_v8  ;;  %v2097_v57 = vadd.f32 %v2950_v54, %v4750_v41  ;;  %3127 = vmatprep.mubr.msk.bf16.mxu0 %vm747_vm0, %v2349_v11 }
 0x321   : > { %v2258_v38 = vadd.f32 %v4678_v2, %v2097_v57  ;;  %v2951_v3 = vpop.f32.mrb[56].mxu1  ;;  %v2327_v42 = vmax.f32 %v2255_v5, 0.0 }
 0x322   : > { %v2952_v35 = vpop.f32.mrb[57].mxu1 }
 0x323   : > { %v2328_v63 = vmax.f32 %v2258_v38, 0.0  ;;  %v2953_v29 = vadd.f32 %v2952_v35, %v2951_v3  ;;  %v2954_v59 = vpop.f32.mrb[58].mxu1 }
 0x324   : > { %v2955_v10 = vpop.f32.mrb[59].mxu1 }
 0x325   : > { %v2350_v4 = vpack.c.bf16 %v2328_v63, %v2327_v42  ;;  %v2102_v32 = vadd.f32 %v2953_v29, %v4750_v41  ;;  %v2956_v36 = vadd.f32 %v2955_v10, %v2954_v59 }
 0x327   : > { %v2263_v44 = vadd.f32 %v4701_v46, %v2102_v32  ;;  %v2105_v0 = vadd.f32 %v2956_v36, %v4750_v41  ;;  %3128 = vmatmul.mubr.msk.bf16.gmra.mrb[64].mxu0 %vm747_vm0, %v2350_v4 }
 0x329   : > { %v2266_v13 = vadd.f32 %v4707_v7, %v2105_v0  ;;  %v2957_v2 = vpop.f32.mrb[60].mxu1  ;;  %v2329_v21 = vmax.f32 %v2263_v44, 0.0 }
 0x32a   : > { %v2958_v31 = vpop.f32.mrb[61].mxu1 }
 0x32b   : > { %v2330_v23 = vmax.f32 %v2266_v13, 0.0  ;;  %v2959_v52 = vadd.f32 %v2958_v31, %v2957_v2  ;;  %v2960_v22 = vpop.f32.mrb[62].mxu1 }
 0x32c   : > { %v2961_v60 = vpop.f32.mrb[63].mxu1 }
 0x32d   : > { %v2351_v14 = vpack.c.bf16 %v2330_v23, %v2329_v21  ;;  %v2110_v1 = vadd.f32 %v2959_v52, %v4750_v41  ;;  %v2962_v47 = vadd.f32 %v2961_v60, %v2960_v22 }
 0x32f   : > { %v2271_v30 = vadd.f32 %v4697_v62, %v2110_v1  ;;  %v2113_v46 = vadd.f32 %v2962_v47, %v4750_v41  ;;  %3131 = vmatprep.mubr.msk.bf16.mxu0 %vm747_vm0, %v2351_v14  ;;  %v4843_v14 = vld [vmem:[%s5002_s6] ss:$0 sm:$0xff] }
 0x331   : > { %v2274_v9 = vadd.f32 %v4705_v34, %v2113_v46  ;;  %v2963_v7 = vpop.f32.mrb[64].mxu1  ;;  %v2331_v26 = vmax.f32 %v2271_v30, 0.0  ;;  %v3241_v30 = vld [vmem:[%s3531_s15 + $0x10] sm:$0xff] }
 0x332   : > { %v2964_v18 = vpop.f32.mrb[65].mxu1 }
 0x333   : > { %v2332_v55 = vmax.f32 %v2274_v9, 0.0  ;;  %v2965_v15 = vadd.f32 %v2964_v18, %v2963_v7  ;;  %v2966_v33 = vpop.f32.mrb[66].mxu1  ;;  %v3242_v18 = vld [vmem:[%s3531_s15] sm:$0xff] }
 0x334   : > { %v2967_v48 = vpop.f32.mrb[67].mxu1 }
 0x335   : > { %v2352_v50 = vpack.c.bf16 %v2332_v55, %v2331_v26  ;;  %v2118_v28 = vadd.f32 %v2965_v15, %v4750_v41  ;;  %v2968_v40 = vadd.f32 %v2967_v48, %v2966_v33  ;;  %v3243_v33 = vld [vmem:[%s3531_s15 + $0x18] sm:$0xff] }
 0x337   : > { %v2279_v61 = vadd.f32 %v4722_v58, %v2118_v28  ;;  %v2121_v62 = vadd.f32 %v2968_v40, %v4750_v41  ;;  %3132 = vmatmul.mubr.msk.bf16.gmra.mrb[68].mxu0 %vm747_vm0, %v2352_v50  ;;  %v3244_v28 = vld [vmem:[%s3531_s15 + $0x8] sm:$0xff] }
 0x339   : > { %v2282_v43 = vadd.f32 %v4728_v27, %v2121_v62  ;;  %v2969_v34 = vpop.f32.mrb[68].mxu1  ;;  %v2333_v6 = vmax.f32 %v2279_v61, 0.0 }
 0x33a   : > { %v2970_v20 = vpop.f32.mrb[69].mxu1 }
 0x33b   : > { %v2334_v49 = vmax.f32 %v2282_v43, 0.0  ;;  %v2971_v16 = vadd.f32 %v2970_v20, %v2969_v34  ;;  %v2972_v45 = vpop.f32.mrb[70].mxu1 }
 0x33c   : > { %v2973_v25 = vpop.f32.mrb[71].mxu1 }
 0x33d   : > { %v2353_v39 = vpack.c.bf16 %v2334_v49, %v2333_v6  ;;  %v2126_v56 = vadd.f32 %v2971_v16, %v4750_v41  ;;  %v2974_v51 = vadd.f32 %v2973_v25, %v2972_v45  ;;  %v3245_v16 = vld [vmem:[%s3531_s15 + $0x30] sm:$0xff] }
 0x33f   : > { %v2287_v11 = vadd.f32 %v4718_v17, %v2126_v56  ;;  %v2129_v58 = vadd.f32 %v2974_v51, %v4750_v41  ;;  %3135 = vmatprep.mubr.msk.bf16.mxu0 %vm747_vm0, %v2353_v39  ;;  %v3246_v56 = vld [vmem:[%s3531_s15 + $0x20] sm:$0xff] }
 0x341   : > { %v2290_v8 = vadd.f32 %v4726_v37, %v2129_v58  ;;  %v2975_v27 = vpop.f32.mrb[72].mxu1  ;;  %v2335_v5 = vmax.f32 %v2287_v11, 0.0 }
 0x342   : > { %v2976_v54 = vpop.f32.mrb[73].mxu1 }
 0x343   : > { %v2336_v57 = vmax.f32 %v2290_v8, 0.0  ;;  %v2977_v38 = vadd.f32 %v2976_v54, %v2975_v27  ;;  %v2978_v3 = vpop.f32.mrb[74].mxu1  ;;  %v3247_v8 = vld [vmem:[%s3531_s15 + $0x38] sm:$0xff] }
 0x344   : > { %v2979_v35 = vpop.f32.mrb[75].mxu1 }
 0x345   : > { %v2354_v42 = vpack.c.bf16 %v2336_v57, %v2335_v5  ;;  %v2980_v63 = vadd.f32 %v2979_v35, %v2978_v3  ;;  %v2134_v29 = vadd.f32 %v2977_v38, %v4750_v41  ;;  %v3248_v5 = vld [vmem:[%s3531_s15 + $0x28] sm:$0xff] }
 0x347   : > { %v2295_v59 = vadd.f32 %v4762_v53, %v2134_v29  ;;  %3136 = vmatmul.mubr.msk.bf16.gmra.mrb[72].mxu0 %vm747_vm0, %v2354_v42  ;;  %v2137_v17 = vadd.f32 %v2980_v63, %v4750_v41 }
 0x349   : > { %v2298_v10 = vadd.f32 %v4767_v12, %v2137_v17  ;;  %v2981_v37 = vpop.f32.mrb[76].mxu1  ;;  %v2337_v32 = vmax.f32 %v2295_v59, 0.0  ;;  %v3249_v17 = vld [vmem:[%s3531_s15 + $0x50] sm:$0xff] }
 0x34a   : > { %v2982_v4 = vpop.f32.mrb[77].mxu1 }
 0x34b   : > { %v2338_v36 = vmax.f32 %v2298_v10, 0.0  ;;  %v2983_v44 = vadd.f32 %v2982_v4, %v2981_v37  ;;  %v2984_v0 = vpop.f32.mrb[78].mxu1 }
 0x34c   : > { %v2985_v13 = vpop.f32.mrb[79].mxu1 }
 0x34d   : > { %v2355_v2 = vpack.c.bf16 %v2338_v36, %v2337_v32  ;;  %v2142_v31 = vadd.f32 %v2983_v44, %v4750_v41  ;;  %v2986_v21 = vadd.f32 %v2985_v13, %v2984_v0  ;;  %v3250_v32 = vld [vmem:[%s3531_s15 + $0x40] sm:$0xff]  ;;  %v3251_v13 = vld [vmem:[%s3531_s15 + $0x58] sm:$0xff] }
 0x34f   : > { %v2303_v53 = vadd.f32 %v4760_v19, %v2142_v31  ;;  %v2145_v23 = vadd.f32 %v2986_v21, %v4750_v41  ;;  %3139 = vmatprep.mubr.msk.bf16.mxu0 %vm747_vm0, %v2355_v2  ;;  %v3252_v21 = vld [vmem:[%s3531_s15 + $0x48] sm:$0xff] }
 0x351   : > { %v2306_v12 = vadd.f32 %v4765_v24, %v2145_v23  ;;  %v2339_v52 = vmax.f32 %v2303_v53, 0.0 }
 0x353   : > { %v2340_v22 = vmax.f32 %v2306_v12, 0.0 }
 0x355   : > { %v2356_v60 = vpack.c.bf16 %v2340_v22, %v2339_v52 }
 0x357   : > { %3140 = vmatmul.mubr.msk.bf16.gmra.mrb[76].mxu0 %vm747_vm0, %v2356_v60 }
 0x3a6   : > { %v3113_v1 = vpop.f32.mrb[48].mxu0 }
 0x3a7   : > { %v2471_v41 = vadd.f32 %v3113_v1, %v4843_v14  ;;  %v2462_v19 = vpop.f32.mrb[49].mxu0 }
 0x3a8   : > { %v2463_v47 = vadd.f32 %v4843_v14, %v2462_v19  ;;  %v3114_v24 = vpop.f32.mrb[50].mxu0  ;;  %v3253_v19 = vld [vmem:[%s3531_s15 + $0x70] sm:$0xff] }
 0x3a9   : > { %v2591_v46 = vadd.f32 %v3241_v30, %v2471_v41  ;;  %v2474_v9 = vadd.f32 %v3114_v24, %v4843_v14  ;;  %v2465_v7 = vpop.f32.mrb[51].mxu0 }
 0x3aa   : > { %v2589_v26 = vadd.f32 %v3242_v18, %v2463_v47  ;;  %v2466_v55 = vadd.f32 %v4843_v14, %v2465_v7 }
 0x3ab   : > { %v2623_v15 = vmax.f32 %v2591_v46, 0.0  ;;  %v2592_v48 = vadd.f32 %v3243_v33, %v2474_v9  ;;  %v3254_v46 = vld [vmem:[%s3531_s15 + $0x60] sm:$0xff]  ;;  %v3256_v33 = vld [vmem:[%s3531_s15 + $0x68] sm:$0xff] }
 0x3ac   : > { %v2621_v50 = vmax.f32 %v2589_v26, 0.0  ;;  %v2590_v40 = vadd.f32 %v3244_v28, %v2466_v55  ;;  %v3255_v26 = vld [vmem:[%s3531_s15 + $0x78] sm:$0xff] }
 0x3ad   : > { %2655 = vst [vmem:[%s4855_s8 + $0x10] sm:$0xff] %v2623_v15  ;;  %v2624_v61 = vmax.f32 %v2592_v48, 0.0 }
 0x3ae   : > { %2653 = vst [vmem:[%s4855_s8] sm:$0xff] %v2621_v50  ;;  %v2622_v62 = vmax.f32 %v2590_v40, 0.0 }
 0x3af   : > { %2656 = vst [vmem:[%s4855_s8 + $0x18] sm:$0xff] %v2624_v61 }
 0x3b0   : > { %2654 = vst [vmem:[%s4855_s8 + $0x8] sm:$0xff] %v2622_v62 }
 0x3be   : > { %v3117_v43 = vpop.f32.mrb[52].mxu0 }
 0x3bf   : > { %v2487_v34 = vadd.f32 %v3117_v43, %v4843_v14  ;;  %v2478_v20 = vpop.f32.mrb[53].mxu0 }
 0x3c0   : > { %v2479_v6 = vadd.f32 %v4843_v14, %v2478_v20  ;;  %v3118_v49 = vpop.f32.mrb[54].mxu0  ;;  %v3257_v20 = vld [vmem:[%s3531_s15 + $0x90] sm:$0xff] }
 0x3c1   : > { %v2595_v45 = vadd.f32 %v3245_v16, %v2487_v34  ;;  %v2490_v25 = vadd.f32 %v3118_v49, %v4843_v14  ;;  %v2481_v39 = vpop.f32.mrb[55].mxu0 }
 0x3c2   : > { %v2593_v51 = vadd.f32 %v3246_v56, %v2479_v6  ;;  %v2482_v11 = vadd.f32 %v4843_v14, %v2481_v39 }
 0x3c3   : > { %v2627_v58 = vmax.f32 %v2595_v45, 0.0  ;;  %v2596_v27 = vadd.f32 %v3247_v8, %v2490_v25  ;;  %v3258_v45 = vld [vmem:[%s3531_s15 + $0x80] sm:$0xff]  ;;  %v3260_v8 = vld [vmem:[%s3531_s15 + $0x88] sm:$0xff] }
 0x3c4   : > { %v2625_v54 = vmax.f32 %v2593_v51, 0.0  ;;  %v2594_v57 = vadd.f32 %v3248_v5, %v2482_v11  ;;  %v3259_v51 = vld [vmem:[%s3531_s15 + $0x98] sm:$0xff] }
 0x3c5   : > { %2659 = vst [vmem:[%s4855_s8 + $0x30] sm:$0xff] %v2627_v58  ;;  %v2628_v38 = vmax.f32 %v2596_v27, 0.0 }
 0x3c6   : > { %2657 = vst [vmem:[%s4855_s8 + $0x20] sm:$0xff] %v2625_v54  ;;  %v2626_v3 = vmax.f32 %v2594_v57, 0.0 }
 0x3c7   : > { %2660 = vst [vmem:[%s4855_s8 + $0x38] sm:$0xff] %v2628_v38 }
 0x3c8   : > { %2658 = vst [vmem:[%s4855_s8 + $0x28] sm:$0xff] %v2626_v3 }
 0x3d6   : > { %v3121_v35 = vpop.f32.mrb[56].mxu0 }
 0x3d7   : > { %v2503_v42 = vadd.f32 %v3121_v35, %v4843_v14  ;;  %v2494_v63 = vpop.f32.mrb[57].mxu0 }
 0x3d8   : > { %v2495_v29 = vadd.f32 %v4843_v14, %v2494_v63  ;;  %v3122_v59 = vpop.f32.mrb[58].mxu0  ;;  %v3261_v63 = vld [vmem:[%s3531_s15 + $0xb0] sm:$0xff] }
 0x3d9   : > { %v2599_v10 = vadd.f32 %v3249_v17, %v2503_v42  ;;  %v2506_v37 = vadd.f32 %v3122_v59, %v4843_v14  ;;  %v2497_v4 = vpop.f32.mrb[59].mxu0 }
 0x3da   : > { %v2597_v36 = vadd.f32 %v3250_v32, %v2495_v29  ;;  %v2498_v44 = vadd.f32 %v4843_v14, %v2497_v4 }
 0x3db   : > { %v2631_v0 = vmax.f32 %v2599_v10, 0.0  ;;  %v2600_v2 = vadd.f32 %v3251_v13, %v2506_v37  ;;  %v3262_v10 = vld [vmem:[%s3531_s15 + $0xa0] sm:$0xff]  ;;  %v3264_v13 = vld [vmem:[%s3531_s15 + $0xa8] sm:$0xff] }
 0x3dc   : > { %v2629_v31 = vmax.f32 %v2597_v36, 0.0  ;;  %v2598_v53 = vadd.f32 %v3252_v21, %v2498_v44  ;;  %v3263_v36 = vld [vmem:[%s3531_s15 + $0xb8] sm:$0xff] }
 0x3dd   : > { %2663 = vst [vmem:[%s4855_s8 + $0x50] sm:$0xff] %v2631_v0  ;;  %v2632_v23 = vmax.f32 %v2600_v2, 0.0 }
 0x3de   : > { %2661 = vst [vmem:[%s4855_s8 + $0x40] sm:$0xff] %v2629_v31  ;;  %v2630_v12 = vmax.f32 %v2598_v53, 0.0 }
 0x3df   : > { %2664 = vst [vmem:[%s4855_s8 + $0x58] sm:$0xff] %v2632_v23 }
 0x3e0   : > { %2662 = vst [vmem:[%s4855_s8 + $0x48] sm:$0xff] %v2630_v12 }
 0x3ea   : > { %v3125_v52 = vpop.f32.mrb[60].mxu0 }
 0x3eb   : > { %v2519_v22 = vadd.f32 %v3125_v52, %v4843_v14  ;;  %v2510_v60 = vpop.f32.mrb[61].mxu0 }
 0x3ec   : > { %v2511_v1 = vadd.f32 %v4843_v14, %v2510_v60  ;;  %v3126_v41 = vpop.f32.mrb[62].mxu0  ;;  %v3265_v60 = vld [vmem:[%s3531_s15 + $0xd0] sm:$0xff] }
 0x3ed   : > { %v2603_v47 = vadd.f32 %v3253_v19, %v2519_v22  ;;  %v2522_v24 = vadd.f32 %v3126_v41, %v4843_v14  ;;  %v2513_v30 = vpop.f32.mrb[63].mxu0 }
 0x3ee   : > { %v2601_v9 = vadd.f32 %v3254_v46, %v2511_v1  ;;  %v2514_v7 = vadd.f32 %v4843_v14, %v2513_v30 }
 0x3ef   : > { %v2635_v18 = vmax.f32 %v2603_v47, 0.0  ;;  %v2604_v55 = vadd.f32 %v3255_v26, %v2522_v24  ;;  %v3266_v47 = vld [vmem:[%s3531_s15 + $0xc0] sm:$0xff]  ;;  %v3268_v26 = vld [vmem:[%s3531_s15 + $0xc8] sm:$0xff] }
 0x3f0   : > { %v2633_v15 = vmax.f32 %v2601_v9, 0.0  ;;  %v2602_v48 = vadd.f32 %v3256_v33, %v2514_v7  ;;  %v3267_v9 = vld [vmem:[%s3531_s15 + $0xd8] sm:$0xff] }
 0x3f1   : > { %2667 = vst [vmem:[%s4855_s8 + $0x70] sm:$0xff] %v2635_v18  ;;  %v2636_v50 = vmax.f32 %v2604_v55, 0.0 }
 0x3f2   : > { %2665 = vst [vmem:[%s4855_s8 + $0x60] sm:$0xff] %v2633_v15  ;;  %v2634_v28 = vmax.f32 %v2602_v48, 0.0 }
 0x3f3   : > { %2668 = vst [vmem:[%s4855_s8 + $0x78] sm:$0xff] %v2636_v50 }
 0x3f4   : > { %2666 = vst [vmem:[%s4855_s8 + $0x68] sm:$0xff] %v2634_v28 }
 0x3fa   : > { %v3129_v40 = vpop.f32.mrb[64].mxu0 }
 0x3fb   : > { %v2535_v61 = vadd.f32 %v3129_v40, %v4843_v14  ;;  %v2526_v62 = vpop.f32.mrb[65].mxu0 }
 0x3fc   : > { %v2527_v43 = vadd.f32 %v4843_v14, %v2526_v62  ;;  %v3130_v34 = vpop.f32.mrb[66].mxu0  ;;  %v3269_v62 = vld [vmem:[%s3531_s15 + $0xf0] sm:$0xff] }
 0x3fd   : > { %v2607_v6 = vadd.f32 %v3257_v20, %v2535_v61  ;;  %v2538_v49 = vadd.f32 %v3130_v34, %v4843_v14  ;;  %v2529_v16 = vpop.f32.mrb[67].mxu0 }
 0x3fe   : > { %v2605_v25 = vadd.f32 %v3258_v45, %v2527_v43  ;;  %v2530_v39 = vadd.f32 %v4843_v14, %v2529_v16 }
 0x3ff   : > { %v2639_v56 = vmax.f32 %v2607_v6, 0.0  ;;  %v2608_v11 = vadd.f32 %v3259_v51, %v2538_v49  ;;  %v3270_v6 = vld [vmem:[%s3531_s15 + $0xe0] sm:$0xff]  ;;  %v3272_v51 = vld [vmem:[%s3531_s15 + $0xe8] sm:$0xff] }
 0x400   : > { %v2637_v58 = vmax.f32 %v2605_v25, 0.0  ;;  %v2606_v27 = vadd.f32 %v3260_v8, %v2530_v39  ;;  %v3271_v25 = vld [vmem:[%s3531_s15 + $0xf8] sm:$0xff]  ;;  %s3378_s15 = smov [#allocation6]  }
 0x401   : > { %2671 = vst [vmem:[%s4855_s8 + $0x90] sm:$0xff] %v2639_v56  ;;  %v2640_v54 = vmax.f32 %v2608_v11, 0.0  ;;  %s3307_s29 = sshll.u32 %s3378_s15, 4  ;;  %s3308_s29 = int_to_ptr.vmem [resolvable:$false] %s3307_s29 }
 0x402   : > { %2669 = vst [vmem:[%s4855_s8 + $0x80] sm:$0xff] %v2637_v58  ;;  %v2638_v5 = vmax.f32 %v2606_v27, 0.0  ;;  %s3309_s12 = scalar_lea.vmem %s3308_s29, 8192  ;;  %p3310_p8 = scmp.lt.s32.totalorder %s4949_s11, %s3308_s29 }
 0x403   : > { %2672 = vst [vmem:[%s4855_s8 + $0x98] sm:$0xff] %v2640_v54  ;;  %p3311_p10 = scmp.lt.s32.totalorder %s3309_s12, %s3303_s23 }
 0x404   : > { %2670 = vst [vmem:[%s4855_s8 + $0x88] sm:$0xff] %v2638_v5 }
 0x405   : > { %p3312_p0 = por %p3311_p10, %p3310_p8 }
 0x407   : > { %p3313_p2 = pnand %p3312_p0, %p3306_p13 }
 0x40a   : > { %v3133_v57 = vpop.f32.mrb[68].mxu0 }
 0x40b   : > { %v2551_v38 = vadd.f32 %v3133_v57, %v4843_v14  ;;  %v2542_v3 = vpop.f32.mrb[69].mxu0 }
 0x40c   : > { %v2543_v35 = vadd.f32 %v4843_v14, %v2542_v3  ;;  %v3134_v42 = vpop.f32.mrb[70].mxu0 }
 0x40d   : > { %v2611_v29 = vadd.f32 %v3261_v63, %v2551_v38  ;;  %v2554_v59 = vadd.f32 %v3134_v42, %v4843_v14  ;;  %v2545_v17 = vpop.f32.mrb[71].mxu0 }
 0x40e   : > { %v2609_v37 = vadd.f32 %v3262_v10, %v2543_v35  ;;  %v2546_v4 = vadd.f32 %v4843_v14, %v2545_v17 }
 0x40f   : > { %v2643_v32 = vmax.f32 %v2611_v29, 0.0  ;;  %v2612_v44 = vadd.f32 %v3263_v36, %v2554_v59 }
 0x410   : > { %v2641_v0 = vmax.f32 %v2609_v37, 0.0  ;;  %v2610_v2 = vadd.f32 %v3264_v13, %v2546_v4 }
 0x411   : > { %2675 = vst [vmem:[%s4855_s8 + $0xb0] sm:$0xff] %v2643_v32  ;;  %v2644_v31 = vmax.f32 %v2612_v44, 0.0 }
 0x412   : > { %2673 = vst [vmem:[%s4855_s8 + $0xa0] sm:$0xff] %v2641_v0  ;;  %v2642_v21 = vmax.f32 %v2610_v2, 0.0 }
 0x413   : > { %2676 = vst [vmem:[%s4855_s8 + $0xb8] sm:$0xff] %v2644_v31 }
 0x414   : > { %2674 = vst [vmem:[%s4855_s8 + $0xa8] sm:$0xff] %v2642_v21 }
 0x41a   : > { %v3137_v53 = vpop.f32.mrb[72].mxu0 }
 0x41b   : > { %v2567_v23 = vadd.f32 %v3137_v53, %v4843_v14  ;;  %v2558_v12 = vpop.f32.mrb[73].mxu0 }
 0x41c   : > { %v2559_v52 = vadd.f32 %v4843_v14, %v2558_v12  ;;  %v3138_v22 = vpop.f32.mrb[74].mxu0 }
 0x41d   : > { %v2615_v1 = vadd.f32 %v3265_v60, %v2567_v23  ;;  %v2570_v41 = vadd.f32 %v3138_v22, %v4843_v14  ;;  %v2561_v19 = vpop.f32.mrb[75].mxu0 }
 0x41e   : > { %v2613_v24 = vadd.f32 %v3266_v47, %v2559_v52  ;;  %v2562_v30 = vadd.f32 %v4843_v14, %v2561_v19 }
 0x41f   : > { %v2647_v46 = vmax.f32 %v2615_v1, 0.0  ;;  %v2616_v7 = vadd.f32 %v3267_v9, %v2570_v41 }
 0x420   : > { %v2645_v18 = vmax.f32 %v2613_v24, 0.0  ;;  %v2614_v55 = vadd.f32 %v3268_v26, %v2562_v30 }
 0x421   : > { %2679 = vst [vmem:[%s4855_s8 + $0xd0] sm:$0xff] %v2647_v46  ;;  %v2648_v15 = vmax.f32 %v2616_v7, 0.0 }
 0x422   : > { %2677 = vst [vmem:[%s4855_s8 + $0xc0] sm:$0xff] %v2645_v18  ;;  %v2646_v33 = vmax.f32 %v2614_v55, 0.0 }
 0x423   : > { %2680 = vst [vmem:[%s4855_s8 + $0xd8] sm:$0xff] %v2648_v15 }
 0x424   : > { %2678 = vst [vmem:[%s4855_s8 + $0xc8] sm:$0xff] %v2646_v33 }
 0x42a   : > { %v3141_v48 = vpop.f32.mrb[76].mxu0 }
 0x42b   : > { %v2583_v50 = vadd.f32 %v3141_v48, %v4843_v14  ;;  %v2574_v28 = vpop.f32.mrb[77].mxu0 }
 0x42c   : > { %v2575_v40 = vadd.f32 %v4843_v14, %v2574_v28  ;;  %v3142_v61 = vpop.f32.mrb[78].mxu0 }
 0x42d   : > { %v2619_v43 = vadd.f32 %v3269_v62, %v2583_v50  ;;  %v2586_v34 = vadd.f32 %v3142_v61, %v4843_v14  ;;  %v2577_v20 = vpop.f32.mrb[79].mxu0 }
 0x42e   : > { %v2617_v49 = vadd.f32 %v3270_v6, %v2575_v40  ;;  %v2578_v16 = vadd.f32 %v4843_v14, %v2577_v20 }
 0x42f   : > { %v2651_v45 = vmax.f32 %v2619_v43, 0.0  ;;  %v2620_v39 = vadd.f32 %v3271_v25, %v2586_v34 }
 0x430   : > { %v2649_v56 = vmax.f32 %v2617_v49, 0.0  ;;  %v2618_v11 = vadd.f32 %v3272_v51, %v2578_v16 }
 0x431   : > { %2683 = vst [vmem:[%s4855_s8 + $0xf0] sm:$0xff] %v2651_v45  ;;  %v2652_v58 = vmax.f32 %v2620_v39, 0.0 }
 0x432   : > { %2681 = vst [vmem:[%s4855_s8 + $0xe0] sm:$0xff] %v2649_v56  ;;  %v2650_v14 = vmax.f32 %v2618_v11, 0.0 }
 0x433   : > { %2684 = vst [vmem:[%s4855_s8 + $0xf8] sm:$0xff] %v2652_v58 }
 0x434   : > { %2682 = vst [vmem:[%s4855_s8 + $0xe8] sm:$0xff] %v2650_v14 }
 0x435   : > { %3316 = shalt.err (!%p3313_p2)
}
 0x436   : > { %s3317_s19 = scalar_lea.hbm %s4947_s22, 4096  ;;  %s3321_s8 = scalar_lea.hbm %s5003_s7, 8192 }
 0x437   : > { %p3318_p4 = scmp.ne.s32.totalorder %s4947_s22, %s3317_s19  ;;  %p3322_p9 = scmp.lt.u32.totalorder %s4947_s22, %s5003_s7 }
 0x438   : > { %p3323_p1 = scmp.lt.u32.totalorder %s3321_s8, %s3317_s19  ;;  %p3325_p6 = scmp.lt.u32.totalorder %s3317_s19, %s4947_s22 }
 0x439   : > { %p3319_p5 = pnand %p3318_p4, %p5034_p11 }
 0x43a   : > { %p3324_p3 = por %p3323_p1, %p3322_p9 }
 0x43b   : > { %p3320_p7 = pneg %p3319_p5 }
 0x43c   : > { %p3326_p12 = por %p3325_p6, %p3324_p3 }
 0x43e   : > { %p3327_p13 = pnand %p3326_p12, %p3320_p7 }
 0x440   : > { %3330 = shalt.err (!%p3327_p13)
}
 0x441   : > { %s3379_s20 = smov 128   ;;  %s3380_s23 = smov 8  }
 0x442   : > { %3161 = dma.vmem_to_hbm [thread:$0]  (%p5034_p11), %s4949_s11, 4096, %s4947_s22, %s2686_s28, %s3379_s20, %s3379_s20, %s3380_s23  }
 0x443 PF: > { %s2714_s15 = sand.u32 1, %s3357_s24   ;;  %p5035_p8 = scmp.ne.s32.totalorder %s5008_s14, 0 }
 0x444   : > { %p5036_p10 = scmp.ge.s32.totalorder %s3369_s27, 2  ;;  %s2715_s29 = scalar_lea.sflag [#allocation5], %s2714_s15 }
 0x446   : > { %p3168_p0 = pnand %p5036_p10, %p5035_p8 }
 0x448   : > { %3352 = dma.done.wait (!%p3168_p0), %s2715_s29, 4096  }
 0x449   : > { %3354 = vsyncadd (!%p3168_p0), %s2715_s29, 4294963200  ;;  %p20_p2 = scmp.ge.s32.totalorder %s3446_s30, 4   ;;  %s5037_s24 = smov %s3361_s25 }
 0x44a   : > { %s5038_s25 = smov %s3365_s26  ;;  %s5039_s26 = smov %s3458_s10 }
 0x44b   : > { %s5040_s27 = smov %s3446_s30  ;;  %22 = sbr.rel (!%p20_p2) target bundleno = 5 (0x5), region = 95 }
 0x452   :  { %2720 = vsyncpa [#allocation4], 1 }
 0x453   :  { %2722 = vsyncpa [#allocation4 + $0x1], 1 }
 0x454   :  { %2723 = vsyncpa [#allocation5], 1 }
 0x455   :  { %2725 = vsyncpa [#allocation5 + $0x1], 1 }

</bundles_post_ra>
